<compile_context>
chip_gen: v6e
topology: v6e:2x2x1
jax: 0.10.0
libtpu: 0.0.40
codegen_flags: <defaults>
</compile_context>

<pallas_src>
import functools

import jax
import jax.numpy as jnp
from jax.experimental import pallas as pl
from jax.experimental.pallas import tpu as pltpu


# ----------------------------------------------------------------------------
# Fused encoder kernel
# ----------------------------------------------------------------------------
def _encoder_kernel(p1_ref, w1_ref, w2_ref, w3_ref, wfc_ref, bc_ref, bfc_ref,
                    out_ref, s1_ref, s2_ref, p23_ref, fcin_ref,
                    *, nb, h1, h2):
    """Whole Encoder forward on VMEM-resident data.

    p1_ref : (2*2*(h1/2)^2*nb, 16*Cin) bf16 conv1 im2col patches, rows ordered
             (wy, wx, yi, xi, n) by *output* row/col parity (wy==0 <-> y odd).
    w*_ref : conv weights as bf16 (kh*kw*Cin, 64) GEMM matrices.
    wfc_ref: (h2*h2*64, 2*z_dim) bf16 fc_mu|fc_logvar weights with the NCHW
             flatten permutation folded in (row index = s*64 + c).
    bc_ref : (3, 64) f32 packed conv biases; bfc_ref: (1, 2*z_dim) f32.
    s1_ref : (2, 2, h1/2+1, (h1/2+1)*nb, 64) f32 zero-padded conv1 output,
             split by padded-row/col parity:
                 s1[wy, wx, yq, xq*nb+n, c] == conv2_padded_in[n, 2yq+wy, 2xq+wx, c]
    s2_ref : (h2+3, (h2+3)*nb, 64) f32 ZeroPad2d((1,2,1,2))-padded conv2 out.
    p23_ref: (h2, h2*nb, 16*64) f32 shared conv2/conv3 im2col patch buffer.
    fcin_ref: (nb, h2*h2*64) f32 flattened conv3 features (FC input).
    """
    f32 = jnp.float32
    bf16 = jnp.bfloat16
    hq = h1 // 2                        # conv1 outputs per parity class / axis

    # ------------------ conv1 + ReLU: one GEMM on prefetched bf16 patches ----
    y1 = jnp.dot(p1_ref[...], w1_ref[...], preferred_element_type=f32)
    y1 = jnp.maximum(y1 + bc_ref[0:1, :], 0.0)      # rows (wy, wx, yi, xi, n)

    # ------------------ scatter into padded, parity-split conv2 input --------
    # One (hq*nb, 64) slab store per (wy, wx, yi); every store is contiguous.
    s1_ref[...] = jnp.zeros_like(s1_ref)            # pad border (interior overwritten)
    for wy in range(2):
        for wx in range(2):
            yq0, xq0 = 1 - wy, 1 - wx
            for yi in range(hq):
                r0 = ((wy * 2 + wx) * hq + yi) * hq * nb
                s1_ref[wy, wx, yq0 + yi, xq0 * nb:xq0 * nb + hq * nb, :] = \
                    y1[r0:r0 + hq * nb, :]

    # ------------------ conv2 + ReLU (stride 2): slab im2col + h2 GEMMs ------
    for i in range(4):
        for j in range(4):
            c0 = (i * 4 + j) * 64
            p23_ref[:, :, c0:c0 + 64] = s1_ref[
                i % 2, j % 2, i // 2:i // 2 + h2,
                (j // 2) * nb:(j // 2 + h2) * nb, :]

    s2_ref[...] = jnp.zeros_like(s2_ref)            # ZeroPad2d((1, 2, 1, 2))
    for oy in range(h2):
        z = jnp.dot(p23_ref[oy].astype(bf16), w2_ref[...],
                    preferred_element_type=f32)
        z = jnp.maximum(z + bc_ref[1:2, :], 0.0)    # (h2*nb, 64) rows (ox, n)
        s2_ref[1 + oy, nb:nb + h2 * nb, :] = z

    # ------------------ conv3 + ReLU (stride 1): reuse the patch buffer ------
    for i in range(4):
        for j in range(4):
            c0 = (i * 4 + j) * 64
            p23_ref[:, :, c0:c0 + 64] = s2_ref[i:i + h2,
                                               j * nb:(j + h2) * nb, :]

    for oy in range(h2):
        z = jnp.dot(p23_ref[oy].astype(bf16), w3_ref[...],
                    preferred_element_type=f32)
        z = jnp.maximum(z + bc_ref[2:3, :], 0.0)    # (h2*nb, 64) rows (ox, n)
        for ox in range(h2):                         # flatten into the FC row
            s = oy * h2 + ox
            fcin_ref[:, s * 64:(s + 1) * 64] = z[ox * nb:(ox + 1) * nb, :]

    # ------------------ fused fc_mu | fc_logvar: ONE GEMM, K = h2*h2*64 ------
    out_ref[...] = jnp.dot(fcin_ref[...].astype(bf16), wfc_ref[...],
                           preferred_element_type=f32) + bfc_ref[...]


# ----------------------------------------------------------------------------
# One-time parameter prep (layout only: GEMM-order conv weights in bf16, fold
# the NCHW flatten into the pre-flattened FC weight, pack biases).
# ----------------------------------------------------------------------------
def prepare_params(params, width, z_dim):
    s_sp = (width // 4) ** 2

    def conv_mat(w):                    # (Cout, Cin, kh, kw) -> (kh*kw*Cin, Cout)
        co, ci, kh, kw = w.shape
        m = jnp.transpose(w, (2, 3, 1, 0)).reshape(kh * kw * ci, co)
        return m.astype(jnp.bfloat16)

    w_cat = jnp.concatenate([params["w_mu"], params["w_lv"]], axis=0)  # (2zd, 64*S)
    # PyTorch flatten index f = c*S + s  ->  wfc_flat[s*64 + c, d] = w_cat[d, c*S + s]
    wfc = jnp.transpose(w_cat.reshape(2 * z_dim, 64, s_sp), (2, 1, 0))
    wfc = wfc.reshape(s_sp * 64, 2 * z_dim).astype(jnp.bfloat16)
    return {
        "w1": conv_mat(params["w1"]),
        "w2": conv_mat(params["w2"]),
        "w3": conv_mat(params["w3"]),
        "wfc": wfc,
        "b_conv": jnp.stack([params["b1"], params["b2"], params["b3"]], axis=0),
        "b_fc": jnp.concatenate([params["b_mu"], params["b_lv"]]).reshape(1, 2 * z_dim),
    }


# ----------------------------------------------------------------------------
# conv1 patch prep (small host-side layout fusion, ~16 KB bf16 at this shape)
# ----------------------------------------------------------------------------
def _conv1_patches(x_nchw):
    """im2col for conv1 (k=4, stride=2, pad=1) with rows ordered
    (wy, wx, yi, xi, n) -- grouped by output row/col parity -- so the in-kernel
    scatter into the doubly parity-split conv2 input uses only contiguous
    slab stores."""
    x = jnp.transpose(x_nchw, (0, 2, 3, 1))                       # NHWC
    n, h, _, c = x.shape
    h1, hq = h // 2, h // 4
    xp = jnp.pad(x, ((0, 0), (1, 1), (1, 1), (0, 0)))
    cols = []
    for i in range(4):
        for j in range(4):
            cols.append(xp[:, i:i + 2 * h1 - 1:2, j:j + 2 * h1 - 1:2, :])
    p = jnp.stack(cols, axis=3).reshape(n, h1, h1, 16 * c)        # feat = (i, j, c)
    # wy == 0 <-> y odd, wy == 1 <-> y even (same for wx / x)
    p = jnp.stack([p[:, 1::2], p[:, 0::2]], axis=0)               # (2, n, hq, h1, K)
    p = jnp.stack([p[:, :, :, 1::2], p[:, :, :, 0::2]], axis=1)   # (2, 2, n, hq, hq, K)
    p = jnp.transpose(p, (0, 1, 3, 4, 2, 5))                      # (wy, wx, yi, xi, n, K)
    return p.reshape(2 * 2 * hq * hq * n, 16 * c).astype(jnp.bfloat16)


# ----------------------------------------------------------------------------
# Forward: single fused, grid-less pallas_call (all intermediates in VMEM)
# ----------------------------------------------------------------------------
def encoder_forward(x_nchw, prep):
    n, _, h, w = x_nchw.shape
    assert h == w and h % 4 == 0, (h, w)
    h1, h2 = h // 2, h // 4
    zd2 = prep["b_fc"].shape[1]
    p1 = _conv1_patches(x_nchw)

    kernel = functools.partial(_encoder_kernel, nb=n, h1=h1, h2=h2)
    out = pl.pallas_call(
        kernel,
        out_shape=jax.ShapeDtypeStruct((n, zd2), jnp.float32),
        in_specs=[pl.BlockSpec(memory_space=pltpu.MemorySpace.VMEM)] * 7,
        out_specs=pl.BlockSpec(memory_space=pltpu.MemorySpace.VMEM),
        scratch_shapes=[
            pltpu.VMEM((2, 2, h1 // 2 + 1, (h1 // 2 + 1) * n, 64), jnp.float32),  # s1
            pltpu.VMEM((h2 + 3, (h2 + 3) * n, 64), jnp.float32),                   # s2
            pltpu.VMEM((h2, h2 * n, 16 * 64), jnp.float32),                        # p2/p3 (shared)
            pltpu.VMEM((n, h2 * h2 * 64), jnp.float32),                            # FC input row
        ],
    )(p1, prep["w1"], prep["w2"], prep["w3"], prep["wfc"],
      prep["b_conv"], prep["b_fc"])
    zd = zd2 // 2
    return out[:, :zd], out[:, zd:]


# ----------------------------------------------------------------------------
# Deterministic synthetic parameters (PyTorch layouts)
# ----------------------------------------------------------------------------
def init_params(key, image_chan, width, z_dim):
    feat_dim = int(64 * (width * width) / 16)
    ks = jax.random.split(key, 10)
    f = lambda k, shp, s=0.05: (s * jax.random.normal(k, shp)).astype(jnp.float32)
    return {
        "w1": f(ks[0], (64, image_chan, 4, 4)), "b1": f(ks[1], (64,)),
        "w2": f(ks[2], (64, 64, 4, 4)),         "b2": f(ks[3], (64,)),
        "w3": f(ks[4], (64, 64, 4, 4)),         "b3": f(ks[5], (64,)),
        "w_mu": f(ks[6], (z_dim, feat_dim)),    "b_mu": f(ks[7], (z_dim,)),
        "w_lv": f(ks[8], (z_dim, feat_dim)),    "b_lv": f(ks[9], (z_dim,)),
    }


# ----------------------------------------------------------------------------
# Pure-JAX reference (mirrors the PyTorch module) for a sanity check
# ----------------------------------------------------------------------------
def _conv2d_ref(x_nhwc, w_torch, b, stride, pad_tblr):
    co, ci, kh, kw = w_torch.shape
    pt, pb, p_l, p_r = pad_tblr
    xp = jnp.pad(x_nhwc, ((0, 0), (pt, pb), (p_l, p_r), (0, 0)))
    n, hp, wp, c = xp.shape
    oh = (hp - kh) // stride + 1
    ow = (wp - kw) // stride + 1
    cols = []
    for i in range(kh):
        for j in range(kw):
            cols.append(xp[:, i:i + (oh - 1) * stride + 1:stride,
                           j:j + (ow - 1) * stride + 1:stride, :])
    p = jnp.stack(cols, axis=3).reshape(n * oh * ow, kh * kw * c)
    wm = jnp.transpose(w_torch, (2, 3, 1, 0)).reshape(kh * kw * ci, co)
    out = jnp.dot(p, wm, precision=jax.lax.Precision.HIGHEST) + b
    return out.reshape(n, oh, ow, co)


def encoder_reference(x_nchw, params):
    x = jnp.transpose(x_nchw, (0, 2, 3, 1))
    x = jax.nn.relu(_conv2d_ref(x, params["w1"], params["b1"], 2, (1, 1, 1, 1)))
    x = jax.nn.relu(_conv2d_ref(x, params["w2"], params["b2"], 2, (1, 1, 1, 1)))
    x = jax.nn.relu(_conv2d_ref(x, params["w3"], params["b3"], 1, (1, 2, 1, 2)))
    x = jnp.transpose(x, (0, 3, 1, 2)).reshape(x.shape[0], -1)
    hi = jax.lax.Precision.HIGHEST
    mu = jnp.dot(x, params["w_mu"].T, precision=hi) + params["b_mu"]
    logvar = jnp.dot(x, params["w_lv"].T, precision=hi) + params["b_lv"]
    return mu, logvar


if __name__ == "__main__":
    # opt: image_chan=4, width=16, z_dim=8; batch=2
    batch, image_chan, width, z_dim = 2, 4, 16, 8

    key = jax.random.PRNGKey(0)
    k_x, k_p = jax.random.split(key)
    x = jax.random.normal(k_x, (batch, image_chan, width, width), dtype=jnp.float32)
    params = init_params(k_p, image_chan, width, z_dim)
    prep = prepare_params(params, width, z_dim)

    mu, logvar = jax.jit(encoder_forward)(x, prep)
    mu = jax.block_until_ready(mu)
    logvar = jax.block_until_ready(logvar)

    assert mu.shape == (batch, z_dim), mu.shape
    assert logvar.shape == (batch, z_dim), logvar.shape
    assert bool(jnp.all(jnp.isfinite(mu))) and bool(jnp.all(jnp.isfinite(logvar)))

    # Numerical sanity check. Tolerance accommodates single-pass bf16 MXU
    # operands (vs. the f32 HIGHEST-precision reference); an indexing/layout
    # bug would produce errors orders of magnitude larger.
    mu_ref, lv_ref = encoder_reference(x, params)
    assert jnp.allclose(mu, mu_ref, atol=3e-2, rtol=3e-2)
    assert jnp.allclose(logvar, lv_ref, atol=3e-2, rtol=3e-2)

    print("KERNEL_OK")
</pallas_src>

<mosaic_0001>
module attributes {stable_mosaic.version = 11 : i64} {
  func.func @_encoder_kernel(%arg0: memref<128x64xbf16, #tpu.memory_space<vmem>>, %arg1: memref<64x64xbf16, #tpu.memory_space<vmem>>, %arg2: memref<1024x64xbf16, #tpu.memory_space<vmem>>, %arg3: memref<1024x64xbf16, #tpu.memory_space<vmem>>, %arg4: memref<1024x16xbf16, #tpu.memory_space<vmem>>, %arg5: memref<3x64xf32, #tpu.memory_space<vmem>>, %arg6: memref<1x16xf32, #tpu.memory_space<vmem>>, %arg7: memref<2x16xf32, #tpu.memory_space<vmem>>, %arg8: memref<2x2x5x10x64xf32, #tpu.memory_space<vmem>>, %arg9: memref<7x14x64xf32, #tpu.memory_space<vmem>>, %arg10: memref<4x8x1024xf32, #tpu.memory_space<vmem>>, %arg11: memref<2x1024xf32, #tpu.memory_space<vmem>>) attributes {dimension_semantics = [], scalar_prefetch = 0 : i64, scratch_operands = 4 : i64, tpu.core_type = #tpu.core_type<tc>} {
    %c0 = arith.constant 0 : index
    %c0_0 = arith.constant 0 : index
    %0 = vector.load %arg0[%c0, %c0_0] : memref<128x64xbf16, #tpu.memory_space<vmem>>, vector<128x64xbf16>
    %c0_1 = arith.constant 0 : index
    %c0_2 = arith.constant 0 : index
    %1 = vector.load %arg1[%c0_1, %c0_2] : memref<64x64xbf16, #tpu.memory_space<vmem>>, vector<64x64xbf16>
    %cst = arith.constant dense<0.000000e+00> : vector<128x64xf32>
    %2 = tpu.matmul %0, %1, %cst {dimension_numbers = #tpu.dot_dimension_numbers<[1], [0], [0], [1], [0, 0, 1, 1], [], []>} : vector<128x64xbf16>, vector<64x64xbf16>, vector<128x64xf32> -> vector<128x64xf32>
    %c0_3 = arith.constant 0 : index
    %c0_4 = arith.constant 0 : index
    %3 = vector.load %arg5[%c0_3, %c0_4] : memref<3x64xf32, #tpu.memory_space<vmem>>, vector<1x64xf32>
    %4 = vector.broadcast %3 : vector<1x64xf32> to vector<128x64xf32>
    %5 = arith.addf %2, %4 : vector<128x64xf32>
    %cst_5 = arith.constant 0.000000e+00 : f32
    %6 = vector.broadcast %cst_5 : f32 to vector<128x64xf32>
    %7 = arith.maximumf %5, %6 : vector<128x64xf32>
    %cst_6 = arith.constant 0.000000e+00 : f32
    %8 = vector.broadcast %cst_6 : f32 to vector<2x2x5x10x64xf32>
    %c0_7 = arith.constant 0 : index
    %c0_8 = arith.constant 0 : index
    %c0_9 = arith.constant 0 : index
    %c0_10 = arith.constant 0 : index
    %c0_11 = arith.constant 0 : index
    %9 = vector.load %arg8[%c0_7, %c0_8, %c0_9, %c0_10, %c0_11] : memref<2x2x5x10x64xf32, #tpu.memory_space<vmem>>, vector<2x2x5x10x64xf32>
    tpu.vector_store %arg8[%c0_7, %c0_8, %c0_9, %c0_10, %c0_11], %8 {strides = array<i32>} : memref<2x2x5x10x64xf32, #tpu.memory_space<vmem>>, vector<2x2x5x10x64xf32>,
    %10 = vector.extract_strided_slice %7 {offsets = [0, 0], sizes = [8, 64], strides = [1, 1]} : vector<128x64xf32> to vector<8x64xf32>
    %c0_12 = arith.constant 0 : index
    %c0_13 = arith.constant 0 : index
    %c1 = arith.constant 1 : index
    %c2 = arith.constant 2 : index
    %c0_14 = arith.constant 0 : index
    %11 = vector.load %arg8[%c0_12, %c0_13, %c1, %c2, %c0_14] : memref<2x2x5x10x64xf32, #tpu.memory_space<vmem>>, vector<1x1x1x8x64xf32>
    %12 = vector.shape_cast %11 : vector<1x1x1x8x64xf32> to vector<8x64xf32>
    %13 = vector.shape_cast %10 : vector<8x64xf32> to vector<1x1x1x8x64xf32>
    tpu.vector_store %arg8[%c0_12, %c0_13, %c1, %c2, %c0_14], %13 {strides = array<i32>} : memref<2x2x5x10x64xf32, #tpu.memory_space<vmem>>, vector<1x1x1x8x64xf32>,
    %14 = vector.extract_strided_slice %7 {offsets = [8, 0], sizes = [8, 64], strides = [1, 1]} : vector<128x64xf32> to vector<8x64xf32>
    %c0_15 = arith.constant 0 : index
    %c0_16 = arith.constant 0 : index
    %c2_17 = arith.constant 2 : index
    %c2_18 = arith.constant 2 : index
    %c0_19 = arith.constant 0 : index
    %15 = vector.load %arg8[%c0_15, %c0_16, %c2_17, %c2_18, %c0_19] : memref<2x2x5x10x64xf32, #tpu.memory_space<vmem>>, vector<1x1x1x8x64xf32>
    %16 = vector.shape_cast %15 : vector<1x1x1x8x64xf32> to vector<8x64xf32>
    %17 = vector.shape_cast %14 : vector<8x64xf32> to vector<1x1x1x8x64xf32>
    tpu.vector_store %arg8[%c0_15, %c0_16, %c2_17, %c2_18, %c0_19], %17 {strides = array<i32>} : memref<2x2x5x10x64xf32, #tpu.memory_space<vmem>>, vector<1x1x1x8x64xf32>,
    %18 = vector.extract_strided_slice %7 {offsets = [16, 0], sizes = [8, 64], strides = [1, 1]} : vector<128x64xf32> to vector<8x64xf32>
    %c0_20 = arith.constant 0 : index
    %c0_21 = arith.constant 0 : index
    %c3 = arith.constant 3 : index
    %c2_22 = arith.constant 2 : index
    %c0_23 = arith.constant 0 : index
    %19 = vector.load %arg8[%c0_20, %c0_21, %c3, %c2_22, %c0_23] : memref<2x2x5x10x64xf32, #tpu.memory_space<vmem>>, vector<1x1x1x8x64xf32>
    %20 = vector.shape_cast %19 : vector<1x1x1x8x64xf32> to vector<8x64xf32>
    %21 = vector.shape_cast %18 : vector<8x64xf32> to vector<1x1x1x8x64xf32>
    tpu.vector_store %arg8[%c0_20, %c0_21, %c3, %c2_22, %c0_23], %21 {strides = array<i32>} : memref<2x2x5x10x64xf32, #tpu.memory_space<vmem>>, vector<1x1x1x8x64xf32>,
    %22 = vector.extract_strided_slice %7 {offsets = [24, 0], sizes = [8, 64], strides = [1, 1]} : vector<128x64xf32> to vector<8x64xf32>
    %c0_24 = arith.constant 0 : index
    %c0_25 = arith.constant 0 : index
    %c4 = arith.constant 4 : index
    %c2_26 = arith.constant 2 : index
    %c0_27 = arith.constant 0 : index
    %23 = vector.load %arg8[%c0_24, %c0_25, %c4, %c2_26, %c0_27] : memref<2x2x5x10x64xf32, #tpu.memory_space<vmem>>, vector<1x1x1x8x64xf32>
    %24 = vector.shape_cast %23 : vector<1x1x1x8x64xf32> to vector<8x64xf32>
    %25 = vector.shape_cast %22 : vector<8x64xf32> to vector<1x1x1x8x64xf32>
    tpu.vector_store %arg8[%c0_24, %c0_25, %c4, %c2_26, %c0_27], %25 {strides = array<i32>} : memref<2x2x5x10x64xf32, #tpu.memory_space<vmem>>, vector<1x1x1x8x64xf32>,
    %26 = vector.extract_strided_slice %7 {offsets = [32, 0], sizes = [8, 64], strides = [1, 1]} : vector<128x64xf32> to vector<8x64xf32>
    %c0_28 = arith.constant 0 : index
    %c1_29 = arith.constant 1 : index
    %c1_30 = arith.constant 1 : index
    %c0_31 = arith.constant 0 : index
    %c0_32 = arith.constant 0 : index
    %27 = vector.load %arg8[%c0_28, %c1_29, %c1_30, %c0_31, %c0_32] : memref<2x2x5x10x64xf32, #tpu.memory_space<vmem>>, vector<1x1x1x8x64xf32>
    %28 = vector.shape_cast %27 : vector<1x1x1x8x64xf32> to vector<8x64xf32>
    %29 = vector.shape_cast %26 : vector<8x64xf32> to vector<1x1x1x8x64xf32>
    tpu.vector_store %arg8[%c0_28, %c1_29, %c1_30, %c0_31, %c0_32], %29 {strides = array<i32>} : memref<2x2x5x10x64xf32, #tpu.memory_space<vmem>>, vector<1x1x1x8x64xf32>,
    %30 = vector.extract_strided_slice %7 {offsets = [40, 0], sizes = [8, 64], strides = [1, 1]} : vector<128x64xf32> to vector<8x64xf32>
    %c0_33 = arith.constant 0 : index
    %c1_34 = arith.constant 1 : index
    %c2_35 = arith.constant 2 : index
    %c0_36 = arith.constant 0 : index
    %c0_37 = arith.constant 0 : index
    %31 = vector.load %arg8[%c0_33, %c1_34, %c2_35, %c0_36, %c0_37] : memref<2x2x5x10x64xf32, #tpu.memory_space<vmem>>, vector<1x1x1x8x64xf32>
    %32 = vector.shape_cast %31 : vector<1x1x1x8x64xf32> to vector<8x64xf32>
    %33 = vector.shape_cast %30 : vector<8x64xf32> to vector<1x1x1x8x64xf32>
    tpu.vector_store %arg8[%c0_33, %c1_34, %c2_35, %c0_36, %c0_37], %33 {strides = array<i32>} : memref<2x2x5x10x64xf32, #tpu.memory_space<vmem>>, vector<1x1x1x8x64xf32>,
    %34 = vector.extract_strided_slice %7 {offsets = [48, 0], sizes = [8, 64], strides = [1, 1]} : vector<128x64xf32> to vector<8x64xf32>
    %c0_38 = arith.constant 0 : index
    %c1_39 = arith.constant 1 : index
    %c3_40 = arith.constant 3 : index
    %c0_41 = arith.constant 0 : index
    %c0_42 = arith.constant 0 : index
    %35 = vector.load %arg8[%c0_38, %c1_39, %c3_40, %c0_41, %c0_42] : memref<2x2x5x10x64xf32, #tpu.memory_space<vmem>>, vector<1x1x1x8x64xf32>
    %36 = vector.shape_cast %35 : vector<1x1x1x8x64xf32> to vector<8x64xf32>
    %37 = vector.shape_cast %34 : vector<8x64xf32> to vector<1x1x1x8x64xf32>
    tpu.vector_store %arg8[%c0_38, %c1_39, %c3_40, %c0_41, %c0_42], %37 {strides = array<i32>} : memref<2x2x5x10x64xf32, #tpu.memory_space<vmem>>, vector<1x1x1x8x64xf32>,
    %38 = vector.extract_strided_slice %7 {offsets = [56, 0], sizes = [8, 64], strides = [1, 1]} : vector<128x64xf32> to vector<8x64xf32>
    %c0_43 = arith.constant 0 : index
    %c1_44 = arith.constant 1 : index
    %c4_45 = arith.constant 4 : index
    %c0_46 = arith.constant 0 : index
    %c0_47 = arith.constant 0 : index
    %39 = vector.load %arg8[%c0_43, %c1_44, %c4_45, %c0_46, %c0_47] : memref<2x2x5x10x64xf32, #tpu.memory_space<vmem>>, vector<1x1x1x8x64xf32>
    %40 = vector.shape_cast %39 : vector<1x1x1x8x64xf32> to vector<8x64xf32>
    %41 = vector.shape_cast %38 : vector<8x64xf32> to vector<1x1x1x8x64xf32>
    tpu.vector_store %arg8[%c0_43, %c1_44, %c4_45, %c0_46, %c0_47], %41 {strides = array<i32>} : memref<2x2x5x10x64xf32, #tpu.memory_space<vmem>>, vector<1x1x1x8x64xf32>,
    %42 = vector.extract_strided_slice %7 {offsets = [64, 0], sizes = [8, 64], strides = [1, 1]} : vector<128x64xf32> to vector<8x64xf32>
    %c1_48 = arith.constant 1 : index
    %c0_49 = arith.constant 0 : index
    %c0_50 = arith.constant 0 : index
    %c2_51 = arith.constant 2 : index
    %c0_52 = arith.constant 0 : index
    %43 = vector.load %arg8[%c1_48, %c0_49, %c0_50, %c2_51, %c0_52] : memref<2x2x5x10x64xf32, #tpu.memory_space<vmem>>, vector<1x1x1x8x64xf32>
    %44 = vector.shape_cast %43 : vector<1x1x1x8x64xf32> to vector<8x64xf32>
    %45 = vector.shape_cast %42 : vector<8x64xf32> to vector<1x1x1x8x64xf32>
    tpu.vector_store %arg8[%c1_48, %c0_49, %c0_50, %c2_51, %c0_52], %45 {strides = array<i32>} : memref<2x2x5x10x64xf32, #tpu.memory_space<vmem>>, vector<1x1x1x8x64xf32>,
    %46 = vector.extract_strided_slice %7 {offsets = [72, 0], sizes = [8, 64], strides = [1, 1]} : vector<128x64xf32> to vector<8x64xf32>
    %c1_53 = arith.constant 1 : index
    %c0_54 = arith.constant 0 : index
    %c1_55 = arith.constant 1 : index
    %c2_56 = arith.constant 2 : index
    %c0_57 = arith.constant 0 : index
    %47 = vector.load %arg8[%c1_53, %c0_54, %c1_55, %c2_56, %c0_57] : memref<2x2x5x10x64xf32, #tpu.memory_space<vmem>>, vector<1x1x1x8x64xf32>
    %48 = vector.shape_cast %47 : vector<1x1x1x8x64xf32> to vector<8x64xf32>
    %49 = vector.shape_cast %46 : vector<8x64xf32> to vector<1x1x1x8x64xf32>
    tpu.vector_store %arg8[%c1_53, %c0_54, %c1_55, %c2_56, %c0_57], %49 {strides = array<i32>} : memref<2x2x5x10x64xf32, #tpu.memory_space<vmem>>, vector<1x1x1x8x64xf32>,
    %50 = vector.extract_strided_slice %7 {offsets = [80, 0], sizes = [8, 64], strides = [1, 1]} : vector<128x64xf32> to vector<8x64xf32>
    %c1_58 = arith.constant 1 : index
    %c0_59 = arith.constant 0 : index
    %c2_60 = arith.constant 2 : index
    %c2_61 = arith.constant 2 : index
    %c0_62 = arith.constant 0 : index
    %51 = vector.load %arg8[%c1_58, %c0_59, %c2_60, %c2_61, %c0_62] : memref<2x2x5x10x64xf32, #tpu.memory_space<vmem>>, vector<1x1x1x8x64xf32>
    %52 = vector.shape_cast %51 : vector<1x1x1x8x64xf32> to vector<8x64xf32>
    %53 = vector.shape_cast %50 : vector<8x64xf32> to vector<1x1x1x8x64xf32>
    tpu.vector_store %arg8[%c1_58, %c0_59, %c2_60, %c2_61, %c0_62], %53 {strides = array<i32>} : memref<2x2x5x10x64xf32, #tpu.memory_space<vmem>>, vector<1x1x1x8x64xf32>,
    %54 = vector.extract_strided_slice %7 {offsets = [88, 0], sizes = [8, 64], strides = [1, 1]} : vector<128x64xf32> to vector<8x64xf32>
    %c1_63 = arith.constant 1 : index
    %c0_64 = arith.constant 0 : index
    %c3_65 = arith.constant 3 : index
    %c2_66 = arith.constant 2 : index
    %c0_67 = arith.constant 0 : index
    %55 = vector.load %arg8[%c1_63, %c0_64, %c3_65, %c2_66, %c0_67] : memref<2x2x5x10x64xf32, #tpu.memory_space<vmem>>, vector<1x1x1x8x64xf32>
    %56 = vector.shape_cast %55 : vector<1x1x1x8x64xf32> to vector<8x64xf32>
    %57 = vector.shape_cast %54 : vector<8x64xf32> to vector<1x1x1x8x64xf32>
    tpu.vector_store %arg8[%c1_63, %c0_64, %c3_65, %c2_66, %c0_67], %57 {strides = array<i32>} : memref<2x2x5x10x64xf32, #tpu.memory_space<vmem>>, vector<1x1x1x8x64xf32>,
    %58 = vector.extract_strided_slice %7 {offsets = [96, 0], sizes = [8, 64], strides = [1, 1]} : vector<128x64xf32> to vector<8x64xf32>
    %c1_68 = arith.constant 1 : index
    %c1_69 = arith.constant 1 : index
    %c0_70 = arith.constant 0 : index
    %c0_71 = arith.constant 0 : index
    %c0_72 = arith.constant 0 : index
    %59 = vector.load %arg8[%c1_68, %c1_69, %c0_70, %c0_71, %c0_72] : memref<2x2x5x10x64xf32, #tpu.memory_space<vmem>>, vector<1x1x1x8x64xf32>
    %60 = vector.shape_cast %59 : vector<1x1x1x8x64xf32> to vector<8x64xf32>
    %61 = vector.shape_cast %58 : vector<8x64xf32> to vector<1x1x1x8x64xf32>
    tpu.vector_store %arg8[%c1_68, %c1_69, %c0_70, %c0_71, %c0_72], %61 {strides = array<i32>} : memref<2x2x5x10x64xf32, #tpu.memory_space<vmem>>, vector<1x1x1x8x64xf32>,
    %62 = vector.extract_strided_slice %7 {offsets = [104, 0], sizes = [8, 64], strides = [1, 1]} : vector<128x64xf32> to vector<8x64xf32>
    %c1_73 = arith.constant 1 : index
    %c1_74 = arith.constant 1 : index
    %c1_75 = arith.constant 1 : index
    %c0_76 = arith.constant 0 : index
    %c0_77 = arith.constant 0 : index
    %63 = vector.load %arg8[%c1_73, %c1_74, %c1_75, %c0_76, %c0_77] : memref<2x2x5x10x64xf32, #tpu.memory_space<vmem>>, vector<1x1x1x8x64xf32>
    %64 = vector.shape_cast %63 : vector<1x1x1x8x64xf32> to vector<8x64xf32>
    %65 = vector.shape_cast %62 : vector<8x64xf32> to vector<1x1x1x8x64xf32>
    tpu.vector_store %arg8[%c1_73, %c1_74, %c1_75, %c0_76, %c0_77], %65 {strides = array<i32>} : memref<2x2x5x10x64xf32, #tpu.memory_space<vmem>>, vector<1x1x1x8x64xf32>,
    %66 = vector.extract_strided_slice %7 {offsets = [112, 0], sizes = [8, 64], strides = [1, 1]} : vector<128x64xf32> to vector<8x64xf32>
    %c1_78 = arith.constant 1 : index
    %c1_79 = arith.constant 1 : index
    %c2_80 = arith.constant 2 : index
    %c0_81 = arith.constant 0 : index
    %c0_82 = arith.constant 0 : index
    %67 = vector.load %arg8[%c1_78, %c1_79, %c2_80, %c0_81, %c0_82] : memref<2x2x5x10x64xf32, #tpu.memory_space<vmem>>, vector<1x1x1x8x64xf32>
    %68 = vector.shape_cast %67 : vector<1x1x1x8x64xf32> to vector<8x64xf32>
    %69 = vector.shape_cast %66 : vector<8x64xf32> to vector<1x1x1x8x64xf32>
    tpu.vector_store %arg8[%c1_78, %c1_79, %c2_80, %c0_81, %c0_82], %69 {strides = array<i32>} : memref<2x2x5x10x64xf32, #tpu.memory_space<vmem>>, vector<1x1x1x8x64xf32>,
    %70 = vector.extract_strided_slice %7 {offsets = [120, 0], sizes = [8, 64], strides = [1, 1]} : vector<128x64xf32> to vector<8x64xf32>
    %c1_83 = arith.constant 1 : index
    %c1_84 = arith.constant 1 : index
    %c3_85 = arith.constant 3 : index
    %c0_86 = arith.constant 0 : index
    %c0_87 = arith.constant 0 : index
    %71 = vector.load %arg8[%c1_83, %c1_84, %c3_85, %c0_86, %c0_87] : memref<2x2x5x10x64xf32, #tpu.memory_space<vmem>>, vector<1x1x1x8x64xf32>
    %72 = vector.shape_cast %71 : vector<1x1x1x8x64xf32> to vector<8x64xf32>
    %73 = vector.shape_cast %70 : vector<8x64xf32> to vector<1x1x1x8x64xf32>
    tpu.vector_store %arg8[%c1_83, %c1_84, %c3_85, %c0_86, %c0_87], %73 {strides = array<i32>} : memref<2x2x5x10x64xf32, #tpu.memory_space<vmem>>, vector<1x1x1x8x64xf32>,
    %c0_88 = arith.constant 0 : index
    %c0_89 = arith.constant 0 : index
    %c0_90 = arith.constant 0 : index
    %c0_91 = arith.constant 0 : index
    %c0_92 = arith.constant 0 : index
    %74 = vector.load %arg8[%c0_88, %c0_89, %c0_90, %c0_91, %c0_92] : memref<2x2x5x10x64xf32, #tpu.memory_space<vmem>>, vector<1x1x4x8x64xf32>
    %75 = vector.shape_cast %74 : vector<1x1x4x8x64xf32> to vector<4x8x64xf32>
    %c0_93 = arith.constant 0 : index
    %c0_94 = arith.constant 0 : index
    %c0_95 = arith.constant 0 : index
    %76 = vector.load %arg10[%c0_93, %c0_94, %c0_95] : memref<4x8x1024xf32, #tpu.memory_space<vmem>>, vector<4x8x64xf32>
    tpu.vector_store %arg10[%c0_93, %c0_94, %c0_95], %75 {strides = array<i32>} : memref<4x8x1024xf32, #tpu.memory_space<vmem>>, vector<4x8x64xf32>,
    %c0_96 = arith.constant 0 : index
    %c1_97 = arith.constant 1 : index
    %c0_98 = arith.constant 0 : index
    %c0_99 = arith.constant 0 : index
    %c0_100 = arith.constant 0 : index
    %77 = vector.load %arg8[%c0_96, %c1_97, %c0_98, %c0_99, %c0_100] : memref<2x2x5x10x64xf32, #tpu.memory_space<vmem>>, vector<1x1x4x8x64xf32>
    %78 = vector.shape_cast %77 : vector<1x1x4x8x64xf32> to vector<4x8x64xf32>
    %c0_101 = arith.constant 0 : index
    %c0_102 = arith.constant 0 : index
    %c64 = arith.constant 64 : index
    %79 = vector.load %arg10[%c0_101, %c0_102, %c64] : memref<4x8x1024xf32, #tpu.memory_space<vmem>>, vector<4x8x64xf32>
    tpu.vector_store %arg10[%c0_101, %c0_102, %c64], %78 {strides = array<i32>} : memref<4x8x1024xf32, #tpu.memory_space<vmem>>, vector<4x8x64xf32>,
    %c0_103 = arith.constant 0 : index
    %c0_104 = arith.constant 0 : index
    %c0_105 = arith.constant 0 : index
    %c2_106 = arith.constant 2 : index
    %c0_107 = arith.constant 0 : index
    %80 = vector.load %arg8[%c0_103, %c0_104, %c0_105, %c2_106, %c0_107] : memref<2x2x5x10x64xf32, #tpu.memory_space<vmem>>, vector<1x1x4x8x64xf32>
    %81 = vector.shape_cast %80 : vector<1x1x4x8x64xf32> to vector<4x8x64xf32>
    %c0_108 = arith.constant 0 : index
    %c0_109 = arith.constant 0 : index
    %c128 = arith.constant 128 : index
    %82 = vector.load %arg10[%c0_108, %c0_109, %c128] : memref<4x8x1024xf32, #tpu.memory_space<vmem>>, vector<4x8x64xf32>
    tpu.vector_store %arg10[%c0_108, %c0_109, %c128], %81 {strides = array<i32>} : memref<4x8x1024xf32, #tpu.memory_space<vmem>>, vector<4x8x64xf32>,
    %c0_110 = arith.constant 0 : index
    %c1_111 = arith.constant 1 : index
    %c0_112 = arith.constant 0 : index
    %c2_113 = arith.constant 2 : index
    %c0_114 = arith.constant 0 : index
    %83 = vector.load %arg8[%c0_110, %c1_111, %c0_112, %c2_113, %c0_114] : memref<2x2x5x10x64xf32, #tpu.memory_space<vmem>>, vector<1x1x4x8x64xf32>
    %84 = vector.shape_cast %83 : vector<1x1x4x8x64xf32> to vector<4x8x64xf32>
    %c0_115 = arith.constant 0 : index
    %c0_116 = arith.constant 0 : index
    %c192 = arith.constant 192 : index
    %85 = vector.load %arg10[%c0_115, %c0_116, %c192] : memref<4x8x1024xf32, #tpu.memory_space<vmem>>, vector<4x8x64xf32>
    tpu.vector_store %arg10[%c0_115, %c0_116, %c192], %84 {strides = array<i32>} : memref<4x8x1024xf32, #tpu.memory_space<vmem>>, vector<4x8x64xf32>,
    %c1_117 = arith.constant 1 : index
    %c0_118 = arith.constant 0 : index
    %c0_119 = arith.constant 0 : index
    %c0_120 = arith.constant 0 : index
    %c0_121 = arith.constant 0 : index
    %86 = vector.load %arg8[%c1_117, %c0_118, %c0_119, %c0_120, %c0_121] : memref<2x2x5x10x64xf32, #tpu.memory_space<vmem>>, vector<1x1x4x8x64xf32>
    %87 = vector.shape_cast %86 : vector<1x1x4x8x64xf32> to vector<4x8x64xf32>
    %c0_122 = arith.constant 0 : index
    %c0_123 = arith.constant 0 : index
    %c256 = arith.constant 256 : index
    %88 = vector.load %arg10[%c0_122, %c0_123, %c256] : memref<4x8x1024xf32, #tpu.memory_space<vmem>>, vector<4x8x64xf32>
    tpu.vector_store %arg10[%c0_122, %c0_123, %c256], %87 {strides = array<i32>} : memref<4x8x1024xf32, #tpu.memory_space<vmem>>, vector<4x8x64xf32>,
    %c1_124 = arith.constant 1 : index
    %c1_125 = arith.constant 1 : index
    %c0_126 = arith.constant 0 : index
    %c0_127 = arith.constant 0 : index
    %c0_128 = arith.constant 0 : index
    %89 = vector.load %arg8[%c1_124, %c1_125, %c0_126, %c0_127, %c0_128] : memref<2x2x5x10x64xf32, #tpu.memory_space<vmem>>, vector<1x1x4x8x64xf32>
    %90 = vector.shape_cast %89 : vector<1x1x4x8x64xf32> to vector<4x8x64xf32>
    %c0_129 = arith.constant 0 : index
    %c0_130 = arith.constant 0 : index
    %c320 = arith.constant 320 : index
    %91 = vector.load %arg10[%c0_129, %c0_130, %c320] : memref<4x8x1024xf32, #tpu.memory_space<vmem>>, vector<4x8x64xf32>
    tpu.vector_store %arg10[%c0_129, %c0_130, %c320], %90 {strides = array<i32>} : memref<4x8x1024xf32, #tpu.memory_space<vmem>>, vector<4x8x64xf32>,
    %c1_131 = arith.constant 1 : index
    %c0_132 = arith.constant 0 : index
    %c0_133 = arith.constant 0 : index
    %c2_134 = arith.constant 2 : index
    %c0_135 = arith.constant 0 : index
    %92 = vector.load %arg8[%c1_131, %c0_132, %c0_133, %c2_134, %c0_135] : memref<2x2x5x10x64xf32, #tpu.memory_space<vmem>>, vector<1x1x4x8x64xf32>
    %93 = vector.shape_cast %92 : vector<1x1x4x8x64xf32> to vector<4x8x64xf32>
    %c0_136 = arith.constant 0 : index
    %c0_137 = arith.constant 0 : index
    %c384 = arith.constant 384 : index
    %94 = vector.load %arg10[%c0_136, %c0_137, %c384] : memref<4x8x1024xf32, #tpu.memory_space<vmem>>, vector<4x8x64xf32>
    tpu.vector_store %arg10[%c0_136, %c0_137, %c384], %93 {strides = array<i32>} : memref<4x8x1024xf32, #tpu.memory_space<vmem>>, vector<4x8x64xf32>,
    %c1_138 = arith.constant 1 : index
    %c1_139 = arith.constant 1 : index
    %c0_140 = arith.constant 0 : index
    %c2_141 = arith.constant 2 : index
    %c0_142 = arith.constant 0 : index
    %95 = vector.load %arg8[%c1_138, %c1_139, %c0_140, %c2_141, %c0_142] : memref<2x2x5x10x64xf32, #tpu.memory_space<vmem>>, vector<1x1x4x8x64xf32>
    %96 = vector.shape_cast %95 : vector<1x1x4x8x64xf32> to vector<4x8x64xf32>
    %c0_143 = arith.constant 0 : index
    %c0_144 = arith.constant 0 : index
    %c448 = arith.constant 448 : index
    %97 = vector.load %arg10[%c0_143, %c0_144, %c448] : memref<4x8x1024xf32, #tpu.memory_space<vmem>>, vector<4x8x64xf32>
    tpu.vector_store %arg10[%c0_143, %c0_144, %c448], %96 {strides = array<i32>} : memref<4x8x1024xf32, #tpu.memory_space<vmem>>, vector<4x8x64xf32>,
    %c0_145 = arith.constant 0 : index
    %c0_146 = arith.constant 0 : index
    %c1_147 = arith.constant 1 : index
    %c0_148 = arith.constant 0 : index
    %c0_149 = arith.constant 0 : index
    %98 = vector.load %arg8[%c0_145, %c0_146, %c1_147, %c0_148, %c0_149] : memref<2x2x5x10x64xf32, #tpu.memory_space<vmem>>, vector<1x1x4x8x64xf32>
    %99 = vector.shape_cast %98 : vector<1x1x4x8x64xf32> to vector<4x8x64xf32>
    %c0_150 = arith.constant 0 : index
    %c0_151 = arith.constant 0 : index
    %c512 = arith.constant 512 : index
    %100 = vector.load %arg10[%c0_150, %c0_151, %c512] : memref<4x8x1024xf32, #tpu.memory_space<vmem>>, vector<4x8x64xf32>
    tpu.vector_store %arg10[%c0_150, %c0_151, %c512], %99 {strides = array<i32>} : memref<4x8x1024xf32, #tpu.memory_space<vmem>>, vector<4x8x64xf32>,
    %c0_152 = arith.constant 0 : index
    %c1_153 = arith.constant 1 : index
    %c1_154 = arith.constant 1 : index
    %c0_155 = arith.constant 0 : index
    %c0_156 = arith.constant 0 : index
    %101 = vector.load %arg8[%c0_152, %c1_153, %c1_154, %c0_155, %c0_156] : memref<2x2x5x10x64xf32, #tpu.memory_space<vmem>>, vector<1x1x4x8x64xf32>
    %102 = vector.shape_cast %101 : vector<1x1x4x8x64xf32> to vector<4x8x64xf32>
    %c0_157 = arith.constant 0 : index
    %c0_158 = arith.constant 0 : index
    %c576 = arith.constant 576 : index
    %103 = vector.load %arg10[%c0_157, %c0_158, %c576] : memref<4x8x1024xf32, #tpu.memory_space<vmem>>, vector<4x8x64xf32>
    tpu.vector_store %arg10[%c0_157, %c0_158, %c576], %102 {strides = array<i32>} : memref<4x8x1024xf32, #tpu.memory_space<vmem>>, vector<4x8x64xf32>,
    %c0_159 = arith.constant 0 : index
    %c0_160 = arith.constant 0 : index
    %c1_161 = arith.constant 1 : index
    %c2_162 = arith.constant 2 : index
    %c0_163 = arith.constant 0 : index
    %104 = vector.load %arg8[%c0_159, %c0_160, %c1_161, %c2_162, %c0_163] : memref<2x2x5x10x64xf32, #tpu.memory_space<vmem>>, vector<1x1x4x8x64xf32>
    %105 = vector.shape_cast %104 : vector<1x1x4x8x64xf32> to vector<4x8x64xf32>
    %c0_164 = arith.constant 0 : index
    %c0_165 = arith.constant 0 : index
    %c640 = arith.constant 640 : index
    %106 = vector.load %arg10[%c0_164, %c0_165, %c640] : memref<4x8x1024xf32, #tpu.memory_space<vmem>>, vector<4x8x64xf32>
    tpu.vector_store %arg10[%c0_164, %c0_165, %c640], %105 {strides = array<i32>} : memref<4x8x1024xf32, #tpu.memory_space<vmem>>, vector<4x8x64xf32>,
    %c0_166 = arith.constant 0 : index
    %c1_167 = arith.constant 1 : index
    %c1_168 = arith.constant 1 : index
    %c2_169 = arith.constant 2 : index
    %c0_170 = arith.constant 0 : index
    %107 = vector.load %arg8[%c0_166, %c1_167, %c1_168, %c2_169, %c0_170] : memref<2x2x5x10x64xf32, #tpu.memory_space<vmem>>, vector<1x1x4x8x64xf32>
    %108 = vector.shape_cast %107 : vector<1x1x4x8x64xf32> to vector<4x8x64xf32>
    %c0_171 = arith.constant 0 : index
    %c0_172 = arith.constant 0 : index
    %c704 = arith.constant 704 : index
    %109 = vector.load %arg10[%c0_171, %c0_172, %c704] : memref<4x8x1024xf32, #tpu.memory_space<vmem>>, vector<4x8x64xf32>
    tpu.vector_store %arg10[%c0_171, %c0_172, %c704], %108 {strides = array<i32>} : memref<4x8x1024xf32, #tpu.memory_space<vmem>>, vector<4x8x64xf32>,
    %c1_173 = arith.constant 1 : index
    %c0_174 = arith.constant 0 : index
    %c1_175 = arith.constant 1 : index
    %c0_176 = arith.constant 0 : index
    %c0_177 = arith.constant 0 : index
    %110 = vector.load %arg8[%c1_173, %c0_174, %c1_175, %c0_176, %c0_177] : memref<2x2x5x10x64xf32, #tpu.memory_space<vmem>>, vector<1x1x4x8x64xf32>
    %111 = vector.shape_cast %110 : vector<1x1x4x8x64xf32> to vector<4x8x64xf32>
    %c0_178 = arith.constant 0 : index
    %c0_179 = arith.constant 0 : index
    %c768 = arith.constant 768 : index
    %112 = vector.load %arg10[%c0_178, %c0_179, %c768] : memref<4x8x1024xf32, #tpu.memory_space<vmem>>, vector<4x8x64xf32>
    tpu.vector_store %arg10[%c0_178, %c0_179, %c768], %111 {strides = array<i32>} : memref<4x8x1024xf32, #tpu.memory_space<vmem>>, vector<4x8x64xf32>,
    %c1_180 = arith.constant 1 : index
    %c1_181 = arith.constant 1 : index
    %c1_182 = arith.constant 1 : index
    %c0_183 = arith.constant 0 : index
    %c0_184 = arith.constant 0 : index
    %113 = vector.load %arg8[%c1_180, %c1_181, %c1_182, %c0_183, %c0_184] : memref<2x2x5x10x64xf32, #tpu.memory_space<vmem>>, vector<1x1x4x8x64xf32>
    %114 = vector.shape_cast %113 : vector<1x1x4x8x64xf32> to vector<4x8x64xf32>
    %c0_185 = arith.constant 0 : index
    %c0_186 = arith.constant 0 : index
    %c832 = arith.constant 832 : index
    %115 = vector.load %arg10[%c0_185, %c0_186, %c832] : memref<4x8x1024xf32, #tpu.memory_space<vmem>>, vector<4x8x64xf32>
    tpu.vector_store %arg10[%c0_185, %c0_186, %c832], %114 {strides = array<i32>} : memref<4x8x1024xf32, #tpu.memory_space<vmem>>, vector<4x8x64xf32>,
    %c1_187 = arith.constant 1 : index
    %c0_188 = arith.constant 0 : index
    %c1_189 = arith.constant 1 : index
    %c2_190 = arith.constant 2 : index
    %c0_191 = arith.constant 0 : index
    %116 = vector.load %arg8[%c1_187, %c0_188, %c1_189, %c2_190, %c0_191] : memref<2x2x5x10x64xf32, #tpu.memory_space<vmem>>, vector<1x1x4x8x64xf32>
    %117 = vector.shape_cast %116 : vector<1x1x4x8x64xf32> to vector<4x8x64xf32>
    %c0_192 = arith.constant 0 : index
    %c0_193 = arith.constant 0 : index
    %c896 = arith.constant 896 : index
    %118 = vector.load %arg10[%c0_192, %c0_193, %c896] : memref<4x8x1024xf32, #tpu.memory_space<vmem>>, vector<4x8x64xf32>
    tpu.vector_store %arg10[%c0_192, %c0_193, %c896], %117 {strides = array<i32>} : memref<4x8x1024xf32, #tpu.memory_space<vmem>>, vector<4x8x64xf32>,
    %c1_194 = arith.constant 1 : index
    %c1_195 = arith.constant 1 : index
    %c1_196 = arith.constant 1 : index
    %c2_197 = arith.constant 2 : index
    %c0_198 = arith.constant 0 : index
    %119 = vector.load %arg8[%c1_194, %c1_195, %c1_196, %c2_197, %c0_198] : memref<2x2x5x10x64xf32, #tpu.memory_space<vmem>>, vector<1x1x4x8x64xf32>
    %120 = vector.shape_cast %119 : vector<1x1x4x8x64xf32> to vector<4x8x64xf32>
    %c0_199 = arith.constant 0 : index
    %c0_200 = arith.constant 0 : index
    %c960 = arith.constant 960 : index
    %121 = vector.load %arg10[%c0_199, %c0_200, %c960] : memref<4x8x1024xf32, #tpu.memory_space<vmem>>, vector<4x8x64xf32>
    tpu.vector_store %arg10[%c0_199, %c0_200, %c960], %120 {strides = array<i32>} : memref<4x8x1024xf32, #tpu.memory_space<vmem>>, vector<4x8x64xf32>,
    %cst_201 = arith.constant 0.000000e+00 : f32
    %122 = vector.broadcast %cst_201 : f32 to vector<7x14x64xf32>
    %c0_202 = arith.constant 0 : index
    %c0_203 = arith.constant 0 : index
    %c0_204 = arith.constant 0 : index
    %123 = vector.load %arg9[%c0_202, %c0_203, %c0_204] : memref<7x14x64xf32, #tpu.memory_space<vmem>>, vector<7x14x64xf32>
    tpu.vector_store %arg9[%c0_202, %c0_203, %c0_204], %122 {strides = array<i32>} : memref<7x14x64xf32, #tpu.memory_space<vmem>>, vector<7x14x64xf32>,
    %c0_205 = arith.constant 0 : index
    %c0_206 = arith.constant 0 : index
    %c0_207 = arith.constant 0 : index
    %124 = vector.load %arg10[%c0_205, %c0_206, %c0_207] : memref<4x8x1024xf32, #tpu.memory_space<vmem>>, vector<1x8x1024xf32>
    %125 = vector.shape_cast %124 : vector<1x8x1024xf32> to vector<8x1024xf32>
    %126 = arith.truncf %125 : vector<8x1024xf32> to vector<8x1024xbf16>
    %c0_208 = arith.constant 0 : index
    %c0_209 = arith.constant 0 : index
    %127 = vector.load %arg2[%c0_208, %c0_209] : memref<1024x64xbf16, #tpu.memory_space<vmem>>, vector<1024x64xbf16>
    %cst_210 = arith.constant dense<0.000000e+00> : vector<8x64xf32>
    %128 = tpu.matmul %126, %127, %cst_210 {dimension_numbers = #tpu.dot_dimension_numbers<[1], [0], [0], [1], [0, 0, 1, 1], [], []>} : vector<8x1024xbf16>, vector<1024x64xbf16>, vector<8x64xf32> -> vector<8x64xf32>
    %c1_211 = arith.constant 1 : index
    %c0_212 = arith.constant 0 : index
    %129 = vector.load %arg5[%c1_211, %c0_212] : memref<3x64xf32, #tpu.memory_space<vmem>>, vector<1x64xf32>
    %130 = vector.broadcast %129 : vector<1x64xf32> to vector<8x64xf32>
    %131 = arith.addf %128, %130 : vector<8x64xf32>
    %cst_213 = arith.constant 0.000000e+00 : f32
    %132 = vector.broadcast %cst_213 : f32 to vector<8x64xf32>
    %133 = arith.maximumf %131, %132 : vector<8x64xf32>
    %c1_214 = arith.constant 1 : index
    %c2_215 = arith.constant 2 : index
    %c0_216 = arith.constant 0 : index
    %134 = vector.load %arg9[%c1_214, %c2_215, %c0_216] : memref<7x14x64xf32, #tpu.memory_space<vmem>>, vector<1x8x64xf32>
    %135 = vector.shape_cast %134 : vector<1x8x64xf32> to vector<8x64xf32>
    %136 = vector.shape_cast %133 : vector<8x64xf32> to vector<1x8x64xf32>
    tpu.vector_store %arg9[%c1_214, %c2_215, %c0_216], %136 {strides = array<i32>} : memref<7x14x64xf32, #tpu.memory_space<vmem>>, vector<1x8x64xf32>,
    %c1_217 = arith.constant 1 : index
    %c0_218 = arith.constant 0 : index
    %c0_219 = arith.constant 0 : index
    %137 = vector.load %arg10[%c1_217, %c0_218, %c0_219] : memref<4x8x1024xf32, #tpu.memory_space<vmem>>, vector<1x8x1024xf32>
    %138 = vector.shape_cast %137 : vector<1x8x1024xf32> to vector<8x1024xf32>
    %139 = arith.truncf %138 : vector<8x1024xf32> to vector<8x1024xbf16>
    %c0_220 = arith.constant 0 : index
    %c0_221 = arith.constant 0 : index
    %140 = vector.load %arg2[%c0_220, %c0_221] : memref<1024x64xbf16, #tpu.memory_space<vmem>>, vector<1024x64xbf16>
    %cst_222 = arith.constant dense<0.000000e+00> : vector<8x64xf32>
    %141 = tpu.matmul %139, %140, %cst_222 {dimension_numbers = #tpu.dot_dimension_numbers<[1], [0], [0], [1], [0, 0, 1, 1], [], []>} : vector<8x1024xbf16>, vector<1024x64xbf16>, vector<8x64xf32> -> vector<8x64xf32>
    %c1_223 = arith.constant 1 : index
    %c0_224 = arith.constant 0 : index
    %142 = vector.load %arg5[%c1_223, %c0_224] : memref<3x64xf32, #tpu.memory_space<vmem>>, vector<1x64xf32>
    %143 = vector.broadcast %142 : vector<1x64xf32> to vector<8x64xf32>
    %144 = arith.addf %141, %143 : vector<8x64xf32>
    %cst_225 = arith.constant 0.000000e+00 : f32
    %145 = vector.broadcast %cst_225 : f32 to vector<8x64xf32>
    %146 = arith.maximumf %144, %145 : vector<8x64xf32>
    %c2_226 = arith.constant 2 : index
    %c2_227 = arith.constant 2 : index
    %c0_228 = arith.constant 0 : index
    %147 = vector.load %arg9[%c2_226, %c2_227, %c0_228] : memref<7x14x64xf32, #tpu.memory_space<vmem>>, vector<1x8x64xf32>
    %148 = vector.shape_cast %147 : vector<1x8x64xf32> to vector<8x64xf32>
    %149 = vector.shape_cast %146 : vector<8x64xf32> to vector<1x8x64xf32>
    tpu.vector_store %arg9[%c2_226, %c2_227, %c0_228], %149 {strides = array<i32>} : memref<7x14x64xf32, #tpu.memory_space<vmem>>, vector<1x8x64xf32>,
    %c2_229 = arith.constant 2 : index
    %c0_230 = arith.constant 0 : index
    %c0_231 = arith.constant 0 : index
    %150 = vector.load %arg10[%c2_229, %c0_230, %c0_231] : memref<4x8x1024xf32, #tpu.memory_space<vmem>>, vector<1x8x1024xf32>
    %151 = vector.shape_cast %150 : vector<1x8x1024xf32> to vector<8x1024xf32>
    %152 = arith.truncf %151 : vector<8x1024xf32> to vector<8x1024xbf16>
    %c0_232 = arith.constant 0 : index
    %c0_233 = arith.constant 0 : index
    %153 = vector.load %arg2[%c0_232, %c0_233] : memref<1024x64xbf16, #tpu.memory_space<vmem>>, vector<1024x64xbf16>
    %cst_234 = arith.constant dense<0.000000e+00> : vector<8x64xf32>
    %154 = tpu.matmul %152, %153, %cst_234 {dimension_numbers = #tpu.dot_dimension_numbers<[1], [0], [0], [1], [0, 0, 1, 1], [], []>} : vector<8x1024xbf16>, vector<1024x64xbf16>, vector<8x64xf32> -> vector<8x64xf32>
    %c1_235 = arith.constant 1 : index
    %c0_236 = arith.constant 0 : index
    %155 = vector.load %arg5[%c1_235, %c0_236] : memref<3x64xf32, #tpu.memory_space<vmem>>, vector<1x64xf32>
    %156 = vector.broadcast %155 : vector<1x64xf32> to vector<8x64xf32>
    %157 = arith.addf %154, %156 : vector<8x64xf32>
    %cst_237 = arith.constant 0.000000e+00 : f32
    %158 = vector.broadcast %cst_237 : f32 to vector<8x64xf32>
    %159 = arith.maximumf %157, %158 : vector<8x64xf32>
    %c3_238 = arith.constant 3 : index
    %c2_239 = arith.constant 2 : index
    %c0_240 = arith.constant 0 : index
    %160 = vector.load %arg9[%c3_238, %c2_239, %c0_240] : memref<7x14x64xf32, #tpu.memory_space<vmem>>, vector<1x8x64xf32>
    %161 = vector.shape_cast %160 : vector<1x8x64xf32> to vector<8x64xf32>
    %162 = vector.shape_cast %159 : vector<8x64xf32> to vector<1x8x64xf32>
    tpu.vector_store %arg9[%c3_238, %c2_239, %c0_240], %162 {strides = array<i32>} : memref<7x14x64xf32, #tpu.memory_space<vmem>>, vector<1x8x64xf32>,
    %c3_241 = arith.constant 3 : index
    %c0_242 = arith.constant 0 : index
    %c0_243 = arith.constant 0 : index
    %163 = vector.load %arg10[%c3_241, %c0_242, %c0_243] : memref<4x8x1024xf32, #tpu.memory_space<vmem>>, vector<1x8x1024xf32>
    %164 = vector.shape_cast %163 : vector<1x8x1024xf32> to vector<8x1024xf32>
    %165 = arith.truncf %164 : vector<8x1024xf32> to vector<8x1024xbf16>
    %c0_244 = arith.constant 0 : index
    %c0_245 = arith.constant 0 : index
    %166 = vector.load %arg2[%c0_244, %c0_245] : memref<1024x64xbf16, #tpu.memory_space<vmem>>, vector<1024x64xbf16>
    %cst_246 = arith.constant dense<0.000000e+00> : vector<8x64xf32>
    %167 = tpu.matmul %165, %166, %cst_246 {dimension_numbers = #tpu.dot_dimension_numbers<[1], [0], [0], [1], [0, 0, 1, 1], [], []>} : vector<8x1024xbf16>, vector<1024x64xbf16>, vector<8x64xf32> -> vector<8x64xf32>
    %c1_247 = arith.constant 1 : index
    %c0_248 = arith.constant 0 : index
    %168 = vector.load %arg5[%c1_247, %c0_248] : memref<3x64xf32, #tpu.memory_space<vmem>>, vector<1x64xf32>
    %169 = vector.broadcast %168 : vector<1x64xf32> to vector<8x64xf32>
    %170 = arith.addf %167, %169 : vector<8x64xf32>
    %cst_249 = arith.constant 0.000000e+00 : f32
    %171 = vector.broadcast %cst_249 : f32 to vector<8x64xf32>
    %172 = arith.maximumf %170, %171 : vector<8x64xf32>
    %c4_250 = arith.constant 4 : index
    %c2_251 = arith.constant 2 : index
    %c0_252 = arith.constant 0 : index
    %173 = vector.load %arg9[%c4_250, %c2_251, %c0_252] : memref<7x14x64xf32, #tpu.memory_space<vmem>>, vector<1x8x64xf32>
    %174 = vector.shape_cast %173 : vector<1x8x64xf32> to vector<8x64xf32>
    %175 = vector.shape_cast %172 : vector<8x64xf32> to vector<1x8x64xf32>
    tpu.vector_store %arg9[%c4_250, %c2_251, %c0_252], %175 {strides = array<i32>} : memref<7x14x64xf32, #tpu.memory_space<vmem>>, vector<1x8x64xf32>,
    %c0_253 = arith.constant 0 : index
    %c0_254 = arith.constant 0 : index
    %c0_255 = arith.constant 0 : index
    %176 = vector.load %arg9[%c0_253, %c0_254, %c0_255] : memref<7x14x64xf32, #tpu.memory_space<vmem>>, vector<4x8x64xf32>
    %c0_256 = arith.constant 0 : index
    %c0_257 = arith.constant 0 : index
    %c0_258 = arith.constant 0 : index
    %177 = vector.load %arg10[%c0_256, %c0_257, %c0_258] : memref<4x8x1024xf32, #tpu.memory_space<vmem>>, vector<4x8x64xf32>
    tpu.vector_store %arg10[%c0_256, %c0_257, %c0_258], %176 {strides = array<i32>} : memref<4x8x1024xf32, #tpu.memory_space<vmem>>, vector<4x8x64xf32>,
    %c0_259 = arith.constant 0 : index
    %c2_260 = arith.constant 2 : index
    %c0_261 = arith.constant 0 : index
    %178 = vector.load %arg9[%c0_259, %c2_260, %c0_261] : memref<7x14x64xf32, #tpu.memory_space<vmem>>, vector<4x8x64xf32>
    %c0_262 = arith.constant 0 : index
    %c0_263 = arith.constant 0 : index
    %c64_264 = arith.constant 64 : index
    %179 = vector.load %arg10[%c0_262, %c0_263, %c64_264] : memref<4x8x1024xf32, #tpu.memory_space<vmem>>, vector<4x8x64xf32>
    tpu.vector_store %arg10[%c0_262, %c0_263, %c64_264], %178 {strides = array<i32>} : memref<4x8x1024xf32, #tpu.memory_space<vmem>>, vector<4x8x64xf32>,
    %c0_265 = arith.constant 0 : index
    %c4_266 = arith.constant 4 : index
    %c0_267 = arith.constant 0 : index
    %180 = vector.load %arg9[%c0_265, %c4_266, %c0_267] : memref<7x14x64xf32, #tpu.memory_space<vmem>>, vector<4x8x64xf32>
    %c0_268 = arith.constant 0 : index
    %c0_269 = arith.constant 0 : index
    %c128_270 = arith.constant 128 : index
    %181 = vector.load %arg10[%c0_268, %c0_269, %c128_270] : memref<4x8x1024xf32, #tpu.memory_space<vmem>>, vector<4x8x64xf32>
    tpu.vector_store %arg10[%c0_268, %c0_269, %c128_270], %180 {strides = array<i32>} : memref<4x8x1024xf32, #tpu.memory_space<vmem>>, vector<4x8x64xf32>,
    %c0_271 = arith.constant 0 : index
    %c6 = arith.constant 6 : index
    %c0_272 = arith.constant 0 : index
    %182 = vector.load %arg9[%c0_271, %c6, %c0_272] : memref<7x14x64xf32, #tpu.memory_space<vmem>>, vector<4x8x64xf32>
    %c0_273 = arith.constant 0 : index
    %c0_274 = arith.constant 0 : index
    %c192_275 = arith.constant 192 : index
    %183 = vector.load %arg10[%c0_273, %c0_274, %c192_275] : memref<4x8x1024xf32, #tpu.memory_space<vmem>>, vector<4x8x64xf32>
    tpu.vector_store %arg10[%c0_273, %c0_274, %c192_275], %182 {strides = array<i32>} : memref<4x8x1024xf32, #tpu.memory_space<vmem>>, vector<4x8x64xf32>,
    %c1_276 = arith.constant 1 : index
    %c0_277 = arith.constant 0 : index
    %c0_278 = arith.constant 0 : index
    %184 = vector.load %arg9[%c1_276, %c0_277, %c0_278] : memref<7x14x64xf32, #tpu.memory_space<vmem>>, vector<4x8x64xf32>
    %c0_279 = arith.constant 0 : index
    %c0_280 = arith.constant 0 : index
    %c256_281 = arith.constant 256 : index
    %185 = vector.load %arg10[%c0_279, %c0_280, %c256_281] : memref<4x8x1024xf32, #tpu.memory_space<vmem>>, vector<4x8x64xf32>
    tpu.vector_store %arg10[%c0_279, %c0_280, %c256_281], %184 {strides = array<i32>} : memref<4x8x1024xf32, #tpu.memory_space<vmem>>, vector<4x8x64xf32>,
    %c1_282 = arith.constant 1 : index
    %c2_283 = arith.constant 2 : index
    %c0_284 = arith.constant 0 : index
    %186 = vector.load %arg9[%c1_282, %c2_283, %c0_284] : memref<7x14x64xf32, #tpu.memory_space<vmem>>, vector<4x8x64xf32>
    %c0_285 = arith.constant 0 : index
    %c0_286 = arith.constant 0 : index
    %c320_287 = arith.constant 320 : index
    %187 = vector.load %arg10[%c0_285, %c0_286, %c320_287] : memref<4x8x1024xf32, #tpu.memory_space<vmem>>, vector<4x8x64xf32>
    tpu.vector_store %arg10[%c0_285, %c0_286, %c320_287], %186 {strides = array<i32>} : memref<4x8x1024xf32, #tpu.memory_space<vmem>>, vector<4x8x64xf32>,
    %c1_288 = arith.constant 1 : index
    %c4_289 = arith.constant 4 : index
    %c0_290 = arith.constant 0 : index
    %188 = vector.load %arg9[%c1_288, %c4_289, %c0_290] : memref<7x14x64xf32, #tpu.memory_space<vmem>>, vector<4x8x64xf32>
    %c0_291 = arith.constant 0 : index
    %c0_292 = arith.constant 0 : index
    %c384_293 = arith.constant 384 : index
    %189 = vector.load %arg10[%c0_291, %c0_292, %c384_293] : memref<4x8x1024xf32, #tpu.memory_space<vmem>>, vector<4x8x64xf32>
    tpu.vector_store %arg10[%c0_291, %c0_292, %c384_293], %188 {strides = array<i32>} : memref<4x8x1024xf32, #tpu.memory_space<vmem>>, vector<4x8x64xf32>,
    %c1_294 = arith.constant 1 : index
    %c6_295 = arith.constant 6 : index
    %c0_296 = arith.constant 0 : index
    %190 = vector.load %arg9[%c1_294, %c6_295, %c0_296] : memref<7x14x64xf32, #tpu.memory_space<vmem>>, vector<4x8x64xf32>
    %c0_297 = arith.constant 0 : index
    %c0_298 = arith.constant 0 : index
    %c448_299 = arith.constant 448 : index
    %191 = vector.load %arg10[%c0_297, %c0_298, %c448_299] : memref<4x8x1024xf32, #tpu.memory_space<vmem>>, vector<4x8x64xf32>
    tpu.vector_store %arg10[%c0_297, %c0_298, %c448_299], %190 {strides = array<i32>} : memref<4x8x1024xf32, #tpu.memory_space<vmem>>, vector<4x8x64xf32>,
    %c2_300 = arith.constant 2 : index
    %c0_301 = arith.constant 0 : index
    %c0_302 = arith.constant 0 : index
    %192 = vector.load %arg9[%c2_300, %c0_301, %c0_302] : memref<7x14x64xf32, #tpu.memory_space<vmem>>, vector<4x8x64xf32>
    %c0_303 = arith.constant 0 : index
    %c0_304 = arith.constant 0 : index
    %c512_305 = arith.constant 512 : index
    %193 = vector.load %arg10[%c0_303, %c0_304, %c512_305] : memref<4x8x1024xf32, #tpu.memory_space<vmem>>, vector<4x8x64xf32>
    tpu.vector_store %arg10[%c0_303, %c0_304, %c512_305], %192 {strides = array<i32>} : memref<4x8x1024xf32, #tpu.memory_space<vmem>>, vector<4x8x64xf32>,
    %c2_306 = arith.constant 2 : index
    %c2_307 = arith.constant 2 : index
    %c0_308 = arith.constant 0 : index
    %194 = vector.load %arg9[%c2_306, %c2_307, %c0_308] : memref<7x14x64xf32, #tpu.memory_space<vmem>>, vector<4x8x64xf32>
    %c0_309 = arith.constant 0 : index
    %c0_310 = arith.constant 0 : index
    %c576_311 = arith.constant 576 : index
    %195 = vector.load %arg10[%c0_309, %c0_310, %c576_311] : memref<4x8x1024xf32, #tpu.memory_space<vmem>>, vector<4x8x64xf32>
    tpu.vector_store %arg10[%c0_309, %c0_310, %c576_311], %194 {strides = array<i32>} : memref<4x8x1024xf32, #tpu.memory_space<vmem>>, vector<4x8x64xf32>,
    %c2_312 = arith.constant 2 : index
    %c4_313 = arith.constant 4 : index
    %c0_314 = arith.constant 0 : index
    %196 = vector.load %arg9[%c2_312, %c4_313, %c0_314] : memref<7x14x64xf32, #tpu.memory_space<vmem>>, vector<4x8x64xf32>
    %c0_315 = arith.constant 0 : index
    %c0_316 = arith.constant 0 : index
    %c640_317 = arith.constant 640 : index
    %197 = vector.load %arg10[%c0_315, %c0_316, %c640_317] : memref<4x8x1024xf32, #tpu.memory_space<vmem>>, vector<4x8x64xf32>
    tpu.vector_store %arg10[%c0_315, %c0_316, %c640_317], %196 {strides = array<i32>} : memref<4x8x1024xf32, #tpu.memory_space<vmem>>, vector<4x8x64xf32>,
    %c2_318 = arith.constant 2 : index
    %c6_319 = arith.constant 6 : index
    %c0_320 = arith.constant 0 : index
    %198 = vector.load %arg9[%c2_318, %c6_319, %c0_320] : memref<7x14x64xf32, #tpu.memory_space<vmem>>, vector<4x8x64xf32>
    %c0_321 = arith.constant 0 : index
    %c0_322 = arith.constant 0 : index
    %c704_323 = arith.constant 704 : index
    %199 = vector.load %arg10[%c0_321, %c0_322, %c704_323] : memref<4x8x1024xf32, #tpu.memory_space<vmem>>, vector<4x8x64xf32>
    tpu.vector_store %arg10[%c0_321, %c0_322, %c704_323], %198 {strides = array<i32>} : memref<4x8x1024xf32, #tpu.memory_space<vmem>>, vector<4x8x64xf32>,
    %c3_324 = arith.constant 3 : index
    %c0_325 = arith.constant 0 : index
    %c0_326 = arith.constant 0 : index
    %200 = vector.load %arg9[%c3_324, %c0_325, %c0_326] : memref<7x14x64xf32, #tpu.memory_space<vmem>>, vector<4x8x64xf32>
    %c0_327 = arith.constant 0 : index
    %c0_328 = arith.constant 0 : index
    %c768_329 = arith.constant 768 : index
    %201 = vector.load %arg10[%c0_327, %c0_328, %c768_329] : memref<4x8x1024xf32, #tpu.memory_space<vmem>>, vector<4x8x64xf32>
    tpu.vector_store %arg10[%c0_327, %c0_328, %c768_329], %200 {strides = array<i32>} : memref<4x8x1024xf32, #tpu.memory_space<vmem>>, vector<4x8x64xf32>,
    %c3_330 = arith.constant 3 : index
    %c2_331 = arith.constant 2 : index
    %c0_332 = arith.constant 0 : index
    %202 = vector.load %arg9[%c3_330, %c2_331, %c0_332] : memref<7x14x64xf32, #tpu.memory_space<vmem>>, vector<4x8x64xf32>
    %c0_333 = arith.constant 0 : index
    %c0_334 = arith.constant 0 : index
    %c832_335 = arith.constant 832 : index
    %203 = vector.load %arg10[%c0_333, %c0_334, %c832_335] : memref<4x8x1024xf32, #tpu.memory_space<vmem>>, vector<4x8x64xf32>
    tpu.vector_store %arg10[%c0_333, %c0_334, %c832_335], %202 {strides = array<i32>} : memref<4x8x1024xf32, #tpu.memory_space<vmem>>, vector<4x8x64xf32>,
    %c3_336 = arith.constant 3 : index
    %c4_337 = arith.constant 4 : index
    %c0_338 = arith.constant 0 : index
    %204 = vector.load %arg9[%c3_336, %c4_337, %c0_338] : memref<7x14x64xf32, #tpu.memory_space<vmem>>, vector<4x8x64xf32>
    %c0_339 = arith.constant 0 : index
    %c0_340 = arith.constant 0 : index
    %c896_341 = arith.constant 896 : index
    %205 = vector.load %arg10[%c0_339, %c0_340, %c896_341] : memref<4x8x1024xf32, #tpu.memory_space<vmem>>, vector<4x8x64xf32>
    tpu.vector_store %arg10[%c0_339, %c0_340, %c896_341], %204 {strides = array<i32>} : memref<4x8x1024xf32, #tpu.memory_space<vmem>>, vector<4x8x64xf32>,
    %c3_342 = arith.constant 3 : index
    %c6_343 = arith.constant 6 : index
    %c0_344 = arith.constant 0 : index
    %206 = vector.load %arg9[%c3_342, %c6_343, %c0_344] : memref<7x14x64xf32, #tpu.memory_space<vmem>>, vector<4x8x64xf32>
    %c0_345 = arith.constant 0 : index
    %c0_346 = arith.constant 0 : index
    %c960_347 = arith.constant 960 : index
    %207 = vector.load %arg10[%c0_345, %c0_346, %c960_347] : memref<4x8x1024xf32, #tpu.memory_space<vmem>>, vector<4x8x64xf32>
    tpu.vector_store %arg10[%c0_345, %c0_346, %c960_347], %206 {strides = array<i32>} : memref<4x8x1024xf32, #tpu.memory_space<vmem>>, vector<4x8x64xf32>,
    %c0_348 = arith.constant 0 : index
    %c0_349 = arith.constant 0 : index
    %c0_350 = arith.constant 0 : index
    %208 = vector.load %arg10[%c0_348, %c0_349, %c0_350] : memref<4x8x1024xf32, #tpu.memory_space<vmem>>, vector<1x8x1024xf32>
    %209 = vector.shape_cast %208 : vector<1x8x1024xf32> to vector<8x1024xf32>
    %210 = arith.truncf %209 : vector<8x1024xf32> to vector<8x1024xbf16>
    %c0_351 = arith.constant 0 : index
    %c0_352 = arith.constant 0 : index
    %211 = vector.load %arg3[%c0_351, %c0_352] : memref<1024x64xbf16, #tpu.memory_space<vmem>>, vector<1024x64xbf16>
    %cst_353 = arith.constant dense<0.000000e+00> : vector<8x64xf32>
    %212 = tpu.matmul %210, %211, %cst_353 {dimension_numbers = #tpu.dot_dimension_numbers<[1], [0], [0], [1], [0, 0, 1, 1], [], []>} : vector<8x1024xbf16>, vector<1024x64xbf16>, vector<8x64xf32> -> vector<8x64xf32>
    %c2_354 = arith.constant 2 : index
    %c0_355 = arith.constant 0 : index
    %213 = vector.load %arg5[%c2_354, %c0_355] : memref<3x64xf32, #tpu.memory_space<vmem>>, vector<1x64xf32>
    %214 = vector.broadcast %213 : vector<1x64xf32> to vector<8x64xf32>
    %215 = arith.addf %212, %214 : vector<8x64xf32>
    %cst_356 = arith.constant 0.000000e+00 : f32
    %216 = vector.broadcast %cst_356 : f32 to vector<8x64xf32>
    %217 = arith.maximumf %215, %216 : vector<8x64xf32>
    %218 = vector.extract_strided_slice %217 {offsets = [0, 0], sizes = [2, 64], strides = [1, 1]} : vector<8x64xf32> to vector<2x64xf32>
    %c0_357 = arith.constant 0 : index
    %c0_358 = arith.constant 0 : index
    %219 = vector.load %arg11[%c0_357, %c0_358] : memref<2x1024xf32, #tpu.memory_space<vmem>>, vector<2x64xf32>
    tpu.vector_store %arg11[%c0_357, %c0_358], %218 {strides = array<i32>} : memref<2x1024xf32, #tpu.memory_space<vmem>>, vector<2x64xf32>,
    %220 = vector.extract_strided_slice %217 {offsets = [2, 0], sizes = [2, 64], strides = [1, 1]} : vector<8x64xf32> to vector<2x64xf32>
    %c0_359 = arith.constant 0 : index
    %c64_360 = arith.constant 64 : index
    %221 = vector.load %arg11[%c0_359, %c64_360] : memref<2x1024xf32, #tpu.memory_space<vmem>>, vector<2x64xf32>
    tpu.vector_store %arg11[%c0_359, %c64_360], %220 {strides = array<i32>} : memref<2x1024xf32, #tpu.memory_space<vmem>>, vector<2x64xf32>,
    %222 = vector.extract_strided_slice %217 {offsets = [4, 0], sizes = [2, 64], strides = [1, 1]} : vector<8x64xf32> to vector<2x64xf32>
    %c0_361 = arith.constant 0 : index
    %c128_362 = arith.constant 128 : index
    %223 = vector.load %arg11[%c0_361, %c128_362] : memref<2x1024xf32, #tpu.memory_space<vmem>>, vector<2x64xf32>
    tpu.vector_store %arg11[%c0_361, %c128_362], %222 {strides = array<i32>} : memref<2x1024xf32, #tpu.memory_space<vmem>>, vector<2x64xf32>,
    %224 = vector.extract_strided_slice %217 {offsets = [6, 0], sizes = [2, 64], strides = [1, 1]} : vector<8x64xf32> to vector<2x64xf32>
    %c0_363 = arith.constant 0 : index
    %c192_364 = arith.constant 192 : index
    %225 = vector.load %arg11[%c0_363, %c192_364] : memref<2x1024xf32, #tpu.memory_space<vmem>>, vector<2x64xf32>
    tpu.vector_store %arg11[%c0_363, %c192_364], %224 {strides = array<i32>} : memref<2x1024xf32, #tpu.memory_space<vmem>>, vector<2x64xf32>,
    %c1_365 = arith.constant 1 : index
    %c0_366 = arith.constant 0 : index
    %c0_367 = arith.constant 0 : index
    %226 = vector.load %arg10[%c1_365, %c0_366, %c0_367] : memref<4x8x1024xf32, #tpu.memory_space<vmem>>, vector<1x8x1024xf32>
    %227 = vector.shape_cast %226 : vector<1x8x1024xf32> to vector<8x1024xf32>
    %228 = arith.truncf %227 : vector<8x1024xf32> to vector<8x1024xbf16>
    %c0_368 = arith.constant 0 : index
    %c0_369 = arith.constant 0 : index
    %229 = vector.load %arg3[%c0_368, %c0_369] : memref<1024x64xbf16, #tpu.memory_space<vmem>>, vector<1024x64xbf16>
    %cst_370 = arith.constant dense<0.000000e+00> : vector<8x64xf32>
    %230 = tpu.matmul %228, %229, %cst_370 {dimension_numbers = #tpu.dot_dimension_numbers<[1], [0], [0], [1], [0, 0, 1, 1], [], []>} : vector<8x1024xbf16>, vector<1024x64xbf16>, vector<8x64xf32> -> vector<8x64xf32>
    %c2_371 = arith.constant 2 : index
    %c0_372 = arith.constant 0 : index
    %231 = vector.load %arg5[%c2_371, %c0_372] : memref<3x64xf32, #tpu.memory_space<vmem>>, vector<1x64xf32>
    %232 = vector.broadcast %231 : vector<1x64xf32> to vector<8x64xf32>
    %233 = arith.addf %230, %232 : vector<8x64xf32>
    %cst_373 = arith.constant 0.000000e+00 : f32
    %234 = vector.broadcast %cst_373 : f32 to vector<8x64xf32>
    %235 = arith.maximumf %233, %234 : vector<8x64xf32>
    %236 = vector.extract_strided_slice %235 {offsets = [0, 0], sizes = [2, 64], strides = [1, 1]} : vector<8x64xf32> to vector<2x64xf32>
    %c0_374 = arith.constant 0 : index
    %c256_375 = arith.constant 256 : index
    %237 = vector.load %arg11[%c0_374, %c256_375] : memref<2x1024xf32, #tpu.memory_space<vmem>>, vector<2x64xf32>
    tpu.vector_store %arg11[%c0_374, %c256_375], %236 {strides = array<i32>} : memref<2x1024xf32, #tpu.memory_space<vmem>>, vector<2x64xf32>,
    %238 = vector.extract_strided_slice %235 {offsets = [2, 0], sizes = [2, 64], strides = [1, 1]} : vector<8x64xf32> to vector<2x64xf32>
    %c0_376 = arith.constant 0 : index
    %c320_377 = arith.constant 320 : index
    %239 = vector.load %arg11[%c0_376, %c320_377] : memref<2x1024xf32, #tpu.memory_space<vmem>>, vector<2x64xf32>
    tpu.vector_store %arg11[%c0_376, %c320_377], %238 {strides = array<i32>} : memref<2x1024xf32, #tpu.memory_space<vmem>>, vector<2x64xf32>,
    %240 = vector.extract_strided_slice %235 {offsets = [4, 0], sizes = [2, 64], strides = [1, 1]} : vector<8x64xf32> to vector<2x64xf32>
    %c0_378 = arith.constant 0 : index
    %c384_379 = arith.constant 384 : index
    %241 = vector.load %arg11[%c0_378, %c384_379] : memref<2x1024xf32, #tpu.memory_space<vmem>>, vector<2x64xf32>
    tpu.vector_store %arg11[%c0_378, %c384_379], %240 {strides = array<i32>} : memref<2x1024xf32, #tpu.memory_space<vmem>>, vector<2x64xf32>,
    %242 = vector.extract_strided_slice %235 {offsets = [6, 0], sizes = [2, 64], strides = [1, 1]} : vector<8x64xf32> to vector<2x64xf32>
    %c0_380 = arith.constant 0 : index
    %c448_381 = arith.constant 448 : index
    %243 = vector.load %arg11[%c0_380, %c448_381] : memref<2x1024xf32, #tpu.memory_space<vmem>>, vector<2x64xf32>
    tpu.vector_store %arg11[%c0_380, %c448_381], %242 {strides = array<i32>} : memref<2x1024xf32, #tpu.memory_space<vmem>>, vector<2x64xf32>,
    %c2_382 = arith.constant 2 : index
    %c0_383 = arith.constant 0 : index
    %c0_384 = arith.constant 0 : index
    %244 = vector.load %arg10[%c2_382, %c0_383, %c0_384] : memref<4x8x1024xf32, #tpu.memory_space<vmem>>, vector<1x8x1024xf32>
    %245 = vector.shape_cast %244 : vector<1x8x1024xf32> to vector<8x1024xf32>
    %246 = arith.truncf %245 : vector<8x1024xf32> to vector<8x1024xbf16>
    %c0_385 = arith.constant 0 : index
    %c0_386 = arith.constant 0 : index
    %247 = vector.load %arg3[%c0_385, %c0_386] : memref<1024x64xbf16, #tpu.memory_space<vmem>>, vector<1024x64xbf16>
    %cst_387 = arith.constant dense<0.000000e+00> : vector<8x64xf32>
    %248 = tpu.matmul %246, %247, %cst_387 {dimension_numbers = #tpu.dot_dimension_numbers<[1], [0], [0], [1], [0, 0, 1, 1], [], []>} : vector<8x1024xbf16>, vector<1024x64xbf16>, vector<8x64xf32> -> vector<8x64xf32>
    %c2_388 = arith.constant 2 : index
    %c0_389 = arith.constant 0 : index
    %249 = vector.load %arg5[%c2_388, %c0_389] : memref<3x64xf32, #tpu.memory_space<vmem>>, vector<1x64xf32>
    %250 = vector.broadcast %249 : vector<1x64xf32> to vector<8x64xf32>
    %251 = arith.addf %248, %250 : vector<8x64xf32>
    %cst_390 = arith.constant 0.000000e+00 : f32
    %252 = vector.broadcast %cst_390 : f32 to vector<8x64xf32>
    %253 = arith.maximumf %251, %252 : vector<8x64xf32>
    %254 = vector.extract_strided_slice %253 {offsets = [0, 0], sizes = [2, 64], strides = [1, 1]} : vector<8x64xf32> to vector<2x64xf32>
    %c0_391 = arith.constant 0 : index
    %c512_392 = arith.constant 512 : index
    %255 = vector.load %arg11[%c0_391, %c512_392] : memref<2x1024xf32, #tpu.memory_space<vmem>>, vector<2x64xf32>
    tpu.vector_store %arg11[%c0_391, %c512_392], %254 {strides = array<i32>} : memref<2x1024xf32, #tpu.memory_space<vmem>>, vector<2x64xf32>,
    %256 = vector.extract_strided_slice %253 {offsets = [2, 0], sizes = [2, 64], strides = [1, 1]} : vector<8x64xf32> to vector<2x64xf32>
    %c0_393 = arith.constant 0 : index
    %c576_394 = arith.constant 576 : index
    %257 = vector.load %arg11[%c0_393, %c576_394] : memref<2x1024xf32, #tpu.memory_space<vmem>>, vector<2x64xf32>
    tpu.vector_store %arg11[%c0_393, %c576_394], %256 {strides = array<i32>} : memref<2x1024xf32, #tpu.memory_space<vmem>>, vector<2x64xf32>,
    %258 = vector.extract_strided_slice %253 {offsets = [4, 0], sizes = [2, 64], strides = [1, 1]} : vector<8x64xf32> to vector<2x64xf32>
    %c0_395 = arith.constant 0 : index
    %c640_396 = arith.constant 640 : index
    %259 = vector.load %arg11[%c0_395, %c640_396] : memref<2x1024xf32, #tpu.memory_space<vmem>>, vector<2x64xf32>
    tpu.vector_store %arg11[%c0_395, %c640_396], %258 {strides = array<i32>} : memref<2x1024xf32, #tpu.memory_space<vmem>>, vector<2x64xf32>,
    %260 = vector.extract_strided_slice %253 {offsets = [6, 0], sizes = [2, 64], strides = [1, 1]} : vector<8x64xf32> to vector<2x64xf32>
    %c0_397 = arith.constant 0 : index
    %c704_398 = arith.constant 704 : index
    %261 = vector.load %arg11[%c0_397, %c704_398] : memref<2x1024xf32, #tpu.memory_space<vmem>>, vector<2x64xf32>
    tpu.vector_store %arg11[%c0_397, %c704_398], %260 {strides = array<i32>} : memref<2x1024xf32, #tpu.memory_space<vmem>>, vector<2x64xf32>,
    %c3_399 = arith.constant 3 : index
    %c0_400 = arith.constant 0 : index
    %c0_401 = arith.constant 0 : index
    %262 = vector.load %arg10[%c3_399, %c0_400, %c0_401] : memref<4x8x1024xf32, #tpu.memory_space<vmem>>, vector<1x8x1024xf32>
    %263 = vector.shape_cast %262 : vector<1x8x1024xf32> to vector<8x1024xf32>
    %264 = arith.truncf %263 : vector<8x1024xf32> to vector<8x1024xbf16>
    %c0_402 = arith.constant 0 : index
    %c0_403 = arith.constant 0 : index
    %265 = vector.load %arg3[%c0_402, %c0_403] : memref<1024x64xbf16, #tpu.memory_space<vmem>>, vector<1024x64xbf16>
    %cst_404 = arith.constant dense<0.000000e+00> : vector<8x64xf32>
    %266 = tpu.matmul %264, %265, %cst_404 {dimension_numbers = #tpu.dot_dimension_numbers<[1], [0], [0], [1], [0, 0, 1, 1], [], []>} : vector<8x1024xbf16>, vector<1024x64xbf16>, vector<8x64xf32> -> vector<8x64xf32>
    %c2_405 = arith.constant 2 : index
    %c0_406 = arith.constant 0 : index
    %267 = vector.load %arg5[%c2_405, %c0_406] : memref<3x64xf32, #tpu.memory_space<vmem>>, vector<1x64xf32>
    %268 = vector.broadcast %267 : vector<1x64xf32> to vector<8x64xf32>
    %269 = arith.addf %266, %268 : vector<8x64xf32>
    %cst_407 = arith.constant 0.000000e+00 : f32
    %270 = vector.broadcast %cst_407 : f32 to vector<8x64xf32>
    %271 = arith.maximumf %269, %270 : vector<8x64xf32>
    %272 = vector.extract_strided_slice %271 {offsets = [0, 0], sizes = [2, 64], strides = [1, 1]} : vector<8x64xf32> to vector<2x64xf32>
    %c0_408 = arith.constant 0 : index
    %c768_409 = arith.constant 768 : index
    %273 = vector.load %arg11[%c0_408, %c768_409] : memref<2x1024xf32, #tpu.memory_space<vmem>>, vector<2x64xf32>
    tpu.vector_store %arg11[%c0_408, %c768_409], %272 {strides = array<i32>} : memref<2x1024xf32, #tpu.memory_space<vmem>>, vector<2x64xf32>,
    %274 = vector.extract_strided_slice %271 {offsets = [2, 0], sizes = [2, 64], strides = [1, 1]} : vector<8x64xf32> to vector<2x64xf32>
    %c0_410 = arith.constant 0 : index
    %c832_411 = arith.constant 832 : index
    %275 = vector.load %arg11[%c0_410, %c832_411] : memref<2x1024xf32, #tpu.memory_space<vmem>>, vector<2x64xf32>
    tpu.vector_store %arg11[%c0_410, %c832_411], %274 {strides = array<i32>} : memref<2x1024xf32, #tpu.memory_space<vmem>>, vector<2x64xf32>,
    %276 = vector.extract_strided_slice %271 {offsets = [4, 0], sizes = [2, 64], strides = [1, 1]} : vector<8x64xf32> to vector<2x64xf32>
    %c0_412 = arith.constant 0 : index
    %c896_413 = arith.constant 896 : index
    %277 = vector.load %arg11[%c0_412, %c896_413] : memref<2x1024xf32, #tpu.memory_space<vmem>>, vector<2x64xf32>
    tpu.vector_store %arg11[%c0_412, %c896_413], %276 {strides = array<i32>} : memref<2x1024xf32, #tpu.memory_space<vmem>>, vector<2x64xf32>,
    %278 = vector.extract_strided_slice %271 {offsets = [6, 0], sizes = [2, 64], strides = [1, 1]} : vector<8x64xf32> to vector<2x64xf32>
    %c0_414 = arith.constant 0 : index
    %c960_415 = arith.constant 960 : index
    %279 = vector.load %arg11[%c0_414, %c960_415] : memref<2x1024xf32, #tpu.memory_space<vmem>>, vector<2x64xf32>
    tpu.vector_store %arg11[%c0_414, %c960_415], %278 {strides = array<i32>} : memref<2x1024xf32, #tpu.memory_space<vmem>>, vector<2x64xf32>,
    %c0_416 = arith.constant 0 : index
    %c0_417 = arith.constant 0 : index
    %280 = vector.load %arg11[%c0_416, %c0_417] : memref<2x1024xf32, #tpu.memory_space<vmem>>, vector<2x1024xf32>
    %281 = arith.truncf %280 : vector<2x1024xf32> to vector<2x1024xbf16>
    %c0_418 = arith.constant 0 : index
    %c0_419 = arith.constant 0 : index
    %282 = vector.load %arg4[%c0_418, %c0_419] : memref<1024x16xbf16, #tpu.memory_space<vmem>>, vector<1024x16xbf16>
    %cst_420 = arith.constant dense<0.000000e+00> : vector<2x16xf32>
    %283 = tpu.matmul %281, %282, %cst_420 {dimension_numbers = #tpu.dot_dimension_numbers<[1], [0], [0], [1], [0, 0, 1, 1], [], []>} : vector<2x1024xbf16>, vector<1024x16xbf16>, vector<2x16xf32> -> vector<2x16xf32>
    %c0_421 = arith.constant 0 : index
    %c0_422 = arith.constant 0 : index
    %284 = vector.load %arg6[%c0_421, %c0_422] : memref<1x16xf32, #tpu.memory_space<vmem>>, vector<1x16xf32>
    %285 = vector.broadcast %284 : vector<1x16xf32> to vector<2x16xf32>
    %286 = arith.addf %283, %285 : vector<2x16xf32>
    %c0_423 = arith.constant 0 : index
    %c0_424 = arith.constant 0 : index
    %287 = vector.load %arg7[%c0_423, %c0_424] : memref<2x16xf32, #tpu.memory_space<vmem>>, vector<2x16xf32>
    tpu.vector_store %arg7[%c0_423, %c0_424], %286 {strides = array<i32>} : memref<2x16xf32, #tpu.memory_space<vmem>>, vector<2x16xf32>,
    return
  }
}

</mosaic_0001>

<bundles_post_ra>
// kernel: encoder_forward.1
= control target key start
LH: loop header
LB: loop body
LE: loop exit
PB: predicated region body
PF: predicated region fallthrough
CT: control target
= control target key end

     0   :  { %vm120_vm0 = vcmask 523264   ;;  %vm259_vm1 = vcmask 517120   ;;  %v9307_v12 = vmov 0.0   ;;  %vm360_vm2 = vcmask 1048064   ;;  %s11592_s1 = inlined_call_operand.vmem [shape: bf16[64,64], index: 1, kind: input, shape index: {}]   ;;  %s11593_s0 = inlined_call_operand.vmem [shape: bf16[128,64], index: 0, kind: input, shape index: {}]   ;;  %s11594_s2 = inlined_call_operand.vmem [shape: bf16[1024,64], index: 2, kind: input, shape index: {}]   ;;  %s11595_s5 = inlined_call_operand.vmem [shape: f32[3,64], index: 5, kind: input, shape index: {}]   ;;  %s11596_s3 = inlined_call_operand.vmem [shape: bf16[1024,64], index: 3, kind: input, shape index: {}]   ;;  %s11597_s4 = inlined_call_operand.vmem [shape: bf16[1024,16], index: 4, kind: input, shape index: {}]   ;;  %s11598_s6 = inlined_call_operand.vmem [shape: f32[1,16], index: 6, kind: input, shape index: {}]   ;;  %s11599_s7 = inlined_call_operand.vmem [shape: f32[2,16], index: 7, kind: output, shape index: {}]  }
   0x1   :  { %v8716_v0 = vld [vmem:[%s11592_s1 + $0x18] sm:$0xff]   ;;  %v8717_v1 = vld [vmem:[%s11592_s1 + $0x10] sm:$0xff]   ;;  %v8718_v2 = vld [vmem:[%s11592_s1 + $0x8] sm:$0xff]   ;;  %265 = vst.msk [vmem:[#allocation2 + $0x30] sm:$0xff] %vm120_vm0, %v9307_v12  ;;  %vm590_vm3 = vcmask 521216   ;;  %vm4354_vm4 = vcmask 1041920  }
   0x2   :  { %8689 = vmatprep.subr.bf16.mxu0 %v8716_v0  ;;  %v8720_v3 = vld [vmem:[%s11593_s0] sm:$0xff]   ;;  %v8721_v5 = vld [vmem:[%s11593_s0 + $0x8] sm:$0xff]   ;;  %v8722_v6 = vld [vmem:[%s11593_s0 + $0x10] sm:$0xff]   ;;  %266 = vst.msk [vmem:[#allocation2 + $0x38] sm:$0x3] %vm259_vm1, %v9307_v12  ;;  %vm7273_vm5 = vcmask 123904  }
   0x3   :  { %8690 = vmatpush3.bf16.msra.mxu0 %v8716_v0  ;;  %8697 = vmatprep.mubr.msk.bf16.mxu0 %vm120_vm0, %v8720_v3  ;;  %v8719_v4 = vld [vmem:[%s11592_s1] sm:$0xff]   ;;  %v8723_v7 = vld [vmem:[%s11593_s0 + $0x18] sm:$0xff]   ;;  %v8725_v9 = vld [vmem:[%s11593_s0 + $0x28] sm:$0xff]   ;;  %258 = vst.msk [vmem:[#allocation2] sm:$0xff] %vm120_vm0, %v9307_v12 }
   0x4   :  { %8691 = vmatprep.subr.bf16.mxu0 %v8717_v1  ;;  %v8724_v8 = vld [vmem:[%s11593_s0 + $0x20] sm:$0xff]   ;;  %v8726_v10 = vld [vmem:[%s11593_s0 + $0x30] sm:$0xff]   ;;  %v8727_v11 = vld [vmem:[%s11593_s0 + $0x38] sm:$0xff]   ;;  %260 = vst.msk [vmem:[#allocation2 + $0x8] sm:$0x3] %vm259_vm1, %v9307_v12  ;;  %s9308_s0 = smov 64  }
   0x5   :  { %261 = vst.msk [vmem:[#allocation2 + $0x10] sm:$0xff] %vm120_vm0, %v9307_v12  ;;  %263 = vst.msk [vmem:[#allocation2 + $0x20] sm:$0xff] %vm120_vm0, %v9307_v12  ;;  %v8728_v17 = vld [vmem:[%s11594_s2 + $0x78] sm:$0xff]   ;;  %v8730_v19 = vld [vmem:[%s11594_s2 + $0x70] sm:$0xff]  }
   0x6   :  { %262 = vst.msk [vmem:[#allocation2 + $0x18] sm:$0x3] %vm259_vm1, %v9307_v12  ;;  %264 = vst.msk [vmem:[#allocation2 + $0x28] sm:$0x3] %vm259_vm1, %v9307_v12  ;;  %v8729_v18 = vld [vmem:[%s11594_s2 + $0x38] sm:$0xff]   ;;  %7897 = vmatprep.subr.bf16.mxu1 %v8728_v17  ;;  %v8731_v20 = vld [vmem:[%s11594_s2 + $0x30] sm:$0xff]  }
   0x7   :  { %8692 = vmatpush3.bf16.msra.mxu0 %v8717_v1  ;;  %267 = vst.msk [vmem:[#allocation2 + $0x40] sm:$0xff] %vm120_vm0, %v9307_v12  ;;  %269 = vst.msk [vmem:[#allocation2 + $0x50] sm:$0xff] %vm120_vm0, %v9307_v12  ;;  %7898 = vmatpush3.bf16.msra.mxu1 %v8729_v18  ;;  %v8732_v21 = vld [vmem:[%s11594_s2 + $0x68] sm:$0xff]   ;;  %v8734_v23 = vld [vmem:[%s11594_s2 + $0x60] sm:$0xff]  }
   0x8   :  { %8693 = vmatprep.subr.bf16.mxu0 %v8718_v2  ;;  %268 = vst.msk [vmem:[#allocation2 + $0x48] sm:$0x3] %vm259_vm1, %v9307_v12  ;;  %270 = vst.msk [vmem:[#allocation2 + $0x58] sm:$0x3] %vm259_vm1, %v9307_v12  ;;  %7899 = vmatprep.subr.bf16.mxu1 %v8730_v19  ;;  %v8733_v22 = vld [vmem:[%s11594_s2 + $0x28] sm:$0xff]   ;;  %v8735_v24 = vld [vmem:[%s11594_s2 + $0x20] sm:$0xff]  }
   0x9   :  { %271 = vst.msk [vmem:[#allocation2 + $0x60] sm:$0xff] %vm120_vm0, %v9307_v12  ;;  %273 = vst.msk [vmem:[#allocation2 + $0x70] sm:$0xff] %vm120_vm0, %v9307_v12  ;;  %v8736_v25 = vld [vmem:[%s11594_s2 + $0x58] sm:$0xff]   ;;  %v8738_v28 = vld [vmem:[%s11594_s2 + $0x50] sm:$0xff]  }
   0xa   :  { %272 = vst.msk [vmem:[#allocation2 + $0x68] sm:$0x3] %vm259_vm1, %v9307_v12  ;;  %274 = vst.msk [vmem:[#allocation2 + $0x78] sm:$0x3] %vm259_vm1, %v9307_v12  ;;  %v331_v16 = vld [vmem:[#allocation2] sm:$0xff]  ;;  %v8737_v26 = vld [vmem:[%s11594_s2 + $0x18] sm:$0xff]  }
   0xb   :  { %8694 = vmatpush3.bf16.msra.mxu0 %v8718_v2  ;;  %275 = vst.msk [vmem:[#allocation2 + $0x80] sm:$0xff] %vm120_vm0, %v9307_v12  ;;  %277 = vst.msk [vmem:[#allocation2 + $0x90] sm:$0xff] %vm120_vm0, %v9307_v12  ;;  %v365_v15 = vld [vmem:[#allocation2 + $0x2] sm:$0xff]  ;;  %7900 = vmatpush3.bf16.msra.mxu1 %v8731_v20  ;;  %v8743_v27 = vld [vmem:[%s11594_s2 + $0xf8] sm:$0xff]  }
   0xc   :  { %8695 = vmatprep.subr.bf16.mxu0 %v8719_v4  ;;  %276 = vst.msk [vmem:[#allocation2 + $0x88] sm:$0x3] %vm259_vm1, %v9307_v12  ;;  %278 = vst.msk [vmem:[#allocation2 + $0x98] sm:$0x3] %vm259_vm1, %v9307_v12  ;;  %7901 = vmatprep.subr.bf16.mxu1 %v8732_v21  ;;  %v8739_v29 = vld [vmem:[%s11594_s2 + $0x10] sm:$0xff]   ;;  %v8745_v30 = vld [vmem:[%s11594_s2 + $0xb8] sm:$0xff]  }
   0xd   :  { %279 = vst.msk [vmem:[#allocation2 + $0xa0] sm:$0xff] %vm120_vm0, %v9307_v12  ;;  %281 = vst.msk [vmem:[#allocation2 + $0xb0] sm:$0xff] %vm120_vm0, %v9307_v12  ;;  %v8740_v31 = vld [vmem:[%s11594_s2 + $0x48] sm:$0xff]   ;;  %v8742_v33 = vld [vmem:[%s11594_s2 + $0x40] sm:$0xff]  }
   0xe   :  { %280 = vst.msk [vmem:[#allocation2 + $0xa8] sm:$0x3] %vm259_vm1, %v9307_v12  ;;  %282 = vst.msk [vmem:[#allocation2 + $0xb8] sm:$0x3] %vm259_vm1, %v9307_v12  ;;  %v340_v14 = vld [vmem:[#allocation2 + $0x50] sm:$0xff]  ;;  %v8741_v32 = vld [vmem:[%s11594_s2 + $0x8] sm:$0xff]  }
   0xf   :  { %8696 = vmatpush3.bf16.msra.mxu0 %v8719_v4  ;;  %283 = vst.msk [vmem:[#allocation2 + $0xc0] sm:$0xff] %vm120_vm0, %v9307_v12  ;;  %285 = vst.msk [vmem:[#allocation2 + $0xd0] sm:$0xff] %vm120_vm0, %v9307_v12  ;;  %v373_v13 = vld [vmem:[#allocation2 + $0x52] sm:$0xff]  ;;  %7902 = vmatpush3.bf16.msra.mxu1 %v8733_v22  ;;  %v8744_v34 = vld [vmem:[%s11594_s2] sm:$0xff]  }
  0x10   :  { %284 = vst.msk [vmem:[#allocation2 + $0xc8] sm:$0x3] %vm259_vm1, %v9307_v12  ;;  %286 = vst.msk [vmem:[#allocation2 + $0xd8] sm:$0x3] %vm259_vm1, %v9307_v12  ;;  %381 = vrot.lane.b32.xlu0 %v373_v13, %s9308_s0  ;;  %7903 = vmatprep.subr.bf16.mxu1 %v8734_v23  ;;  %v9549_v35 = vld [vmem:[%s11595_s5] ss:$0 sm:$0xff] }
  0x11   :  { %287 = vst.msk [vmem:[#allocation2 + $0xe0] sm:$0xff] %vm120_vm0, %v9307_v12  ;;  %289 = vst.msk [vmem:[#allocation2 + $0xf0] sm:$0xff] %vm120_vm0, %v9307_v12  ;;  %7919 = vmatprep.subr.bf16.mxu0 %v8743_v27  ;;  %v8746_v54 = vld [vmem:[%s11594_s2 + $0xf0] sm:$0xff]   ;;  %v8747_v55 = vld [vmem:[%s11594_s2 + $0x178] sm:$0xff]  }
  0x12   :  { %8698 = vmatmul.mubr.msk.bf16.vlgmr.msra.gmra.mxu0 %vm120_vm0, %v8721_v5  ;;  %288 = vst.msk [vmem:[#allocation2 + $0xe8] sm:$0x3] %vm259_vm1, %v9307_v12  ;;  %290 = vst.msk [vmem:[#allocation2 + $0xf8] sm:$0x3] %vm259_vm1, %v9307_v12  ;;  %v8748_v59 = vld [vmem:[%s11594_s2 + $0xb0] sm:$0xff]   ;;  %v8749_v60 = vld [vmem:[%s11594_s2 + $0x138] sm:$0xff]  }
  0x13   :  { %8701 = vmatprep.mubr.msk.bf16.mxu0 %vm120_vm0, %v8722_v6  ;;  %291 = vst.msk [vmem:[#allocation2 + $0x100] sm:$0xff] %vm120_vm0, %v9307_v12  ;;  %293 = vst.msk [vmem:[#allocation2 + $0x110] sm:$0xff] %vm120_vm0, %v9307_v12  ;;  %7904 = vmatpush3.bf16.msra.mxu1 %v8735_v24  ;;  %v8750_v61 = vld [vmem:[%s11594_s2 + $0xe8] sm:$0xff]   ;;  %v8751_v0 = vld [vmem:[%s11594_s2 + $0x170] sm:$0xff]  }
  0x14   :  { %292 = vst.msk [vmem:[#allocation2 + $0x108] sm:$0x3] %vm259_vm1, %v9307_v12  ;;  %294 = vst.msk [vmem:[#allocation2 + $0x118] sm:$0x3] %vm259_vm1, %v9307_v12  ;;  %348 = vrot.lane.b32.xlu0 %v340_v14, %s9308_s0  ;;  %7905 = vmatprep.subr.bf16.mxu1 %v8736_v25  ;;  %v8752_v2 = vld [vmem:[%s11594_s2 + $0xa8] sm:$0xff]   ;;  %v8753_v3 = vld [vmem:[%s11594_s2 + $0x130] sm:$0xff]  }
  0x15   :  { %295 = vst.msk [vmem:[#allocation2 + $0x120] sm:$0xff] %vm120_vm0, %v9307_v12  ;;  %297 = vst.msk [vmem:[#allocation2 + $0x130] sm:$0xff] %vm120_vm0, %v9307_v12  ;;  %7920 = vmatpush3.bf16.msra.mxu0 %v8745_v30  ;;  %v8754_v4 = vld [vmem:[%s11594_s2 + $0xe0] sm:$0xff]   ;;  %v8758_v27 = vld [vmem:[%s11594_s2 + $0xd8] sm:$0xff]  }
  0x16   :  { %296 = vst.msk [vmem:[#allocation2 + $0x128] sm:$0x3] %vm259_vm1, %v9307_v12  ;;  %298 = vst.msk [vmem:[#allocation2 + $0x138] sm:$0x3] %vm259_vm1, %v9307_v12  ;;  %7921 = vmatprep.subr.bf16.mxu0 %v8746_v54  ;;  %v8756_v14 = vld [vmem:[%s11594_s2 + $0xa0] sm:$0xff]   ;;  %v8767_v54 = vld [vmem:[%s11594_s2 + $0x150] sm:$0xff]  }
  0x17   :  { %589 = vst.msk [vmem:[#allocation3] sm:$0xff] %vm120_vm0, %v9307_v12  ;;  %592 = vst.msk [vmem:[#allocation3 + $0x10] sm:$0xff] %vm120_vm0, %v9307_v12  ;;  %7906 = vmatpush3.bf16.msra.mxu1 %v8737_v26  ;;  %v8759_v30 = vld [vmem:[%s11594_s2 + $0x160] sm:$0xff]  }
  0x18   :  { %594 = vst.msk [vmem:[#allocation3 + $0x20] sm:$0xff] %vm120_vm0, %v9307_v12  ;;  %596 = vst.msk [vmem:[#allocation3 + $0x30] sm:$0xff] %vm120_vm0, %v9307_v12  ;;  %7907 = vmatprep.subr.bf16.mxu1 %v8738_v28 }
  0x19   :  { %598 = vst.msk [vmem:[#allocation3 + $0x40] sm:$0xff] %vm120_vm0, %v9307_v12  ;;  %600 = vst.msk [vmem:[#allocation3 + $0x50] sm:$0xff] %vm120_vm0, %v9307_v12  ;;  %7922 = vmatpush3.bf16.msra.mxu0 %v8748_v59  ;;  %v8768_v59 = vld [vmem:[%s11594_s2 + $0x88] sm:$0xff]  }
  0x1a   :  { %8702 = vmatmul.mubr.msk.bf16.gmra.mxu0 %vm120_vm0, %v8723_v7  ;;  %602 = vst.msk [vmem:[#allocation3 + $0x60] sm:$0xff] %vm120_vm0, %v9307_v12  ;;  %369 = vst.msk [vmem:[#allocation4 + $0x8] sm:$0xff] %vm120_vm0, %v365_v15  ;;  %v8755_v7 = vld [vmem:[%s11594_s2 + $0x168] sm:$0xff]   ;;  %7923 = vmatprep.subr.bf16.mxu0 %v8750_v61 }
  0x1b   :  { %8705 = vmatprep.mubr.msk.bf16.mxu0 %vm120_vm0, %v8724_v8  ;;  %335 = vst.msk [vmem:[#allocation4] sm:$0xff] %vm120_vm0, %v331_v16  ;;  %7908 = vmatpush3.bf16.msra.mxu1 %v8739_v29  ;;  %v8757_v15 = vld [vmem:[%s11594_s2 + $0x128] sm:$0xff]  }
  0x1c   :  { %7909 = vmatprep.subr.bf16.mxu1 %v8740_v31  ;;  %v8760_v31 = vld [vmem:[%s11594_s2 + $0x98] sm:$0xff]   ;;  %593 = vst.msk [vmem:[#allocation3 + $0x18] sm:$0x3f] %vm590_vm3, %v9307_v12  ;;  %591 = vst.msk [vmem:[#allocation3 + $0x8] sm:$0x3f] %vm590_vm3, %v9307_v12 }
  0x1d   :  { %7924 = vmatpush3.bf16.msra.mxu0 %v8752_v2  ;;  %v8772_v2 = vld [vmem:[%s11594_s2 + $0x80] sm:$0xff]   ;;  %595 = vst.msk [vmem:[#allocation3 + $0x28] sm:$0x3f] %vm590_vm3, %v9307_v12  ;;  %597 = vst.msk [vmem:[#allocation3 + $0x38] sm:$0x3f] %vm590_vm3, %v9307_v12 }
  0x1e   :  { %7925 = vmatprep.subr.bf16.mxu0 %v8754_v4  ;;  %599 = vst.msk [vmem:[#allocation3 + $0x48] sm:$0x3f] %vm590_vm3, %v9307_v12  ;;  %601 = vst.msk [vmem:[#allocation3 + $0x58] sm:$0x3f] %vm590_vm3, %v9307_v12 }
  0x1f   :  { %7910 = vmatpush3.bf16.msra.mxu1 %v8741_v32  ;;  %v8761_v32 = vld [vmem:[%s11594_s2 + $0x120] sm:$0xff]   ;;  %603 = vst.msk [vmem:[#allocation3 + $0x68] sm:$0x3f] %vm590_vm3, %v9307_v12  ;;  %v8880_v12 = vld [vmem:[%s11594_s2 + $0xa8] sm:$0xff]  }
  0x20   :  { %7911 = vmatprep.subr.bf16.mxu1 %v8742_v33 }
  0x21   :  { %7926 = vmatpush3.bf16.msra.mxu0 %v8756_v14 }
  0x22   :  { %8706 = vmatmul.mubr.msk.bf16.gmra.mxu0 %vm120_vm0, %v8725_v9  ;;  %7927 = vmatprep.subr.bf16.mxu0 %v8758_v27 }
  0x23   :  { %8709 = vmatprep.mubr.msk.bf16.mxu0 %vm120_vm0, %v8726_v10  ;;  %7912 = vmatpush3.bf16.msra.mxu1 %v8744_v34 }
  0x24   :  { %7941 = vmatprep.subr.bf16.mxu1 %v8747_v55 }
  0x25   :  { %7928 = vmatpush3.bf16.msra.mxu0 %v8760_v31 }
  0x2a   :  { %8710 = vmatmul.mubr.msk.bf16.gmra.mxu0 %vm120_vm0, %v8727_v11 }
  0x82   :  { %v382_v36 = vpop.permute.xlu0 %381 }
  0x83   :  { %393 = vst.msk [vmem:[#allocation4 + $0x8] sm:$0xff] %vm360_vm2, %v382_v36 }
  0x86   :  { %v349_v39 = vpop.permute.xlu0 %348 }
  0x87   :  { %361 = vst.msk [vmem:[#allocation4] sm:$0xff] %vm360_vm2, %v349_v39 }
  0x8a   :  { %v605_v50 = vld [vmem:[#allocation4 + $0x8] sm:$0xff] }
  0x8b   :  { %v613_v53 = vpack.c.bf16 %v605_v50, %v605_v50 }
  0x8d   :  { %1169 = vmatprep.mubr.bf16.mxu1 %v613_v53  ;;  %v8766_v53 = vld [vmem:[%s11594_s2 + $0xc8] sm:$0xff]  }
  0x8e   :  { %v604_v56 = vld [vmem:[#allocation4] sm:$0xff] }
  0x8f   :  { %v612_v58 = vpack.c.bf16 %v604_v56, %v604_v56 }
  0x91   :  { %1170 = vmatmul.mubr.bf16.vlgmr.msra.gmra.mxu1 %v612_v58 }
  0x92   :  { %7942 = vmatpush3.bf16.msra.mxu1 %v8749_v60 }
  0x93   :  { %7943 = vmatprep.subr.bf16.mxu1 %v8751_v0  ;;  %v8770_v0 = vld [vmem:[%s11594_s2 + $0xc0] sm:$0xff]  }
  0x96   :  { %7944 = vmatpush3.bf16.msra.mxu1 %v8753_v3  ;;  %v8773_v3 = vld [vmem:[%s11594_s2 + $0x108] sm:$0xff]  }
  0x97   :  { %7945 = vmatprep.subr.bf16.mxu1 %v8755_v7  ;;  %v8775_v7 = vld [vmem:[%s11594_s2 + $0x1f8] sm:$0xff]  }
  0x9a   :  { %7946 = vmatpush3.bf16.msra.mxu1 %v8757_v15 }
  0x9b   :  { %7947 = vmatprep.subr.bf16.mxu1 %v8759_v30  ;;  %v536_v30 = vld [vmem:[#allocation2 + $0x130] sm:$0xff] }
  0x9e   :  { %7948 = vmatpush3.bf16.msra.mxu1 %v8761_v32 }
  0xd2   :  { %v8699_v37 = vpop.f32.mrf.mxu0 }
  0xd3   :  { %v188_v38 = vadd.f32 %v8699_v37, %v9549_v35 }
  0xd4   :  { %v179_v40 = vpop.f32.mrf.mxu0 }
  0xd5   :  { %v244_v41 = vmax.f32 %v188_v38, 0.0  ;;  %v180_v42 = vadd.f32 %v9549_v35, %v179_v40 }
  0xd6   :  { %v8700_v43 = vpop.f32.mrf.mxu0 }
  0xd7   :  { %304 = vst.msk [vmem:[#allocation2 + $0x32] sm:$0xff] %vm120_vm0, %v244_v41  ;;  %v242_v44 = vmax.f32 %v180_v42, 0.0  ;;  %v191_v45 = vadd.f32 %v8700_v43, %v9549_v35  ;;  %v8762_v42 = vld [vmem:[%s11594_s2 + $0xd0] sm:$0xff]   ;;  %v8763_v43 = vld [vmem:[%s11594_s2 + $0x158] sm:$0xff]  }
  0xd8   :  { %v182_v46 = vpop.f32.mrf.mxu0  ;;  %7929 = vmatprep.subr.bf16.mxu0 %v8762_v42  ;;  %7949 = vmatprep.subr.bf16.mxu1 %v8763_v43 }
  0xd9   :  { %300 = vst.msk [vmem:[#allocation2 + $0x12] sm:$0xff] %vm120_vm0, %v242_v44  ;;  %v245_v47 = vmax.f32 %v191_v45, 0.0  ;;  %v183_v48 = vadd.f32 %v9549_v35, %v182_v46  ;;  %v8764_v45 = vld [vmem:[%s11594_s2 + $0x90] sm:$0xff]  }
  0xda   :  { %v8703_v49 = vpop.f32.mrf.mxu0  ;;  %7930 = vmatpush3.bf16.msra.mxu0 %v8764_v45 }
  0xdb   :  { %306 = vst.msk [vmem:[#allocation2 + $0x42] sm:$0xff] %vm120_vm0, %v245_v47  ;;  %v243_v51 = vmax.f32 %v183_v48, 0.0  ;;  %v204_v52 = vadd.f32 %v8703_v49, %v9549_v35  ;;  %v8765_v48 = vld [vmem:[%s11594_s2 + $0x118] sm:$0xff]   ;;  %7931 = vmatprep.subr.bf16.mxu0 %v8766_v53 }
  0xdc   :  { %v195_v57 = vpop.f32.mrf.mxu0  ;;  %7950 = vmatpush3.bf16.msra.mxu1 %v8765_v48 }
  0xdd   :  { %302 = vst.msk [vmem:[#allocation2 + $0x22] sm:$0xff] %vm120_vm0, %v243_v51  ;;  %v248_v62 = vmax.f32 %v204_v52, 0.0  ;;  %v196_v63 = vadd.f32 %v9549_v35, %v195_v57  ;;  %7951 = vmatprep.subr.bf16.mxu1 %v8767_v54 }
  0xde   :  { %v8704_v1 = vpop.f32.mrf.mxu0  ;;  %v495_v16 = vld [vmem:[#allocation2 + $0x32] sm:$0xff]  ;;  %7932 = vmatpush3.bf16.msra.mxu0 %v8768_v59 }
  0xdf   :  { %312 = vst.msk [vmem:[#allocation2 + $0x80] sm:$0xff] %vm120_vm0, %v248_v62  ;;  %v246_v5 = vmax.f32 %v196_v63, 0.0  ;;  %v207_v6 = vadd.f32 %v8704_v1, %v9549_v35  ;;  %499 = vst.msk [vmem:[#allocation4 + $0xa8] sm:$0xff] %vm120_vm0, %v495_v16  ;;  %v463_v20 = vld [vmem:[#allocation2 + $0x30] sm:$0xff]  ;;  %7933 = vmatprep.subr.bf16.mxu0 %v8770_v0  ;;  %v8787_v0 = vld [vmem:[%s11594_s2 + $0x68] sm:$0xff]  }
  0xe0   :  { %v198_v8 = vpop.f32.mrf.mxu0  ;;  %v493_v9 = vld [vmem:[#allocation2 + $0x12] sm:$0xff]  ;;  %372 = vst.msk [vmem:[#allocation4 + $0xc8] sm:$0xff] %vm120_vm0, %v495_v16  ;;  %467 = vst.msk [vmem:[#allocation4 + $0xa0] sm:$0xff] %vm120_vm0, %v463_v20 }
  0xe1   :  { %v461_v10 = vld [vmem:[#allocation2 + $0x10] sm:$0xff]  ;;  %308 = vst.msk [vmem:[#allocation2 + $0x60] sm:$0xff] %vm120_vm0, %v246_v5  ;;  %v249_v11 = vmax.f32 %v207_v6, 0.0  ;;  %v199_v13 = vadd.f32 %v9549_v35, %v198_v8  ;;  %497 = vst.msk [vmem:[#allocation4 + $0x28] sm:$0xff] %vm120_vm0, %v493_v9  ;;  %v8774_v6 = vld [vmem:[%s11594_s2 + $0x140] sm:$0xff]  }
  0xe2   :  { %465 = vst.msk [vmem:[#allocation4 + $0x20] sm:$0xff] %vm120_vm0, %v461_v10  ;;  %370 = vst.msk [vmem:[#allocation4 + $0x48] sm:$0xff] %vm120_vm0, %v493_v9  ;;  %v8707_v17 = vpop.f32.mrf.mxu0  ;;  %v496_v38 = vld [vmem:[#allocation2 + $0x42] sm:$0xff]  ;;  %v8769_v62 = vld [vmem:[%s11594_s2 + $0x110] sm:$0xff]   ;;  %7934 = vmatpush3.bf16.msra.mxu0 %v8772_v2 }
  0xe3   :  { %336 = vst.msk [vmem:[#allocation4 + $0x40] sm:$0xff] %vm120_vm0, %v461_v10  ;;  %314 = vst.msk [vmem:[#allocation2 + $0x90] sm:$0xff] %vm120_vm0, %v249_v11  ;;  %v247_v18 = vmax.f32 %v199_v13, 0.0  ;;  %v220_v19 = vadd.f32 %v8707_v17, %v9549_v35  ;;  %7952 = vmatpush3.bf16.msra.mxu1 %v8769_v62  ;;  %v8776_v8 = vld [vmem:[%s11594_s2 + $0x100] sm:$0xff]   ;;  %7963 = vmatprep.subr.bf16.mxu0 %v8775_v7  ;;  %v8779_v11 = vld [vmem:[%s11594_s2 + $0x78] sm:$0xff]  }
  0xe4   :  { %v211_v21 = vpop.f32.mrf.mxu0  ;;  %v494_v22 = vld [vmem:[#allocation2 + $0x22] sm:$0xff]  ;;  %338 = vst.msk [vmem:[#allocation4 + $0xc0] sm:$0xff] %vm120_vm0, %v463_v20  ;;  %500 = vst.msk [vmem:[#allocation4 + $0xe8] sm:$0xff] %vm120_vm0, %v496_v38  ;;  %v8785_v62 = vld [vmem:[%s11594_s2 + $0x30] sm:$0xff]  }
  0xe5   :  { %310 = vst.msk [vmem:[#allocation2 + $0x70] sm:$0xff] %vm120_vm0, %v247_v18  ;;  %v252_v23 = vmax.f32 %v220_v19, 0.0  ;;  %v212_v24 = vadd.f32 %v9549_v35, %v211_v21  ;;  %498 = vst.msk [vmem:[#allocation4 + $0x68] sm:$0xff] %vm120_vm0, %v494_v22  ;;  %v462_v25 = vld [vmem:[#allocation2 + $0x20] sm:$0xff] }
  0xe6   :  { %371 = vst.msk [vmem:[#allocation4 + $0x88] sm:$0xff] %vm120_vm0, %v494_v22  ;;  %v8708_v26 = vpop.f32.mrf.mxu0  ;;  %466 = vst.msk [vmem:[#allocation4 + $0x60] sm:$0xff] %vm120_vm0, %v462_v25  ;;  %v464_v17 = vld [vmem:[#allocation2 + $0x40] sm:$0xff] }
  0xe7   :  { %337 = vst.msk [vmem:[#allocation4 + $0x80] sm:$0xff] %vm120_vm0, %v462_v25  ;;  %320 = vst.msk [vmem:[#allocation2 + $0xc2] sm:$0xff] %vm120_vm0, %v252_v23  ;;  %v250_v28 = vmax.f32 %v212_v24, 0.0  ;;  %v223_v29 = vadd.f32 %v8708_v26, %v9549_v35  ;;  %v503_v22 = vld [vmem:[#allocation2 + $0x82] sm:$0xff] }
  0xe8   :  { %v214_v33 = vpop.f32.mrf.mxu0  ;;  %v9633_v34 = vld [vmem:[#allocation2 + $0x62] sm:$0xff]  ;;  %468 = vst.msk [vmem:[#allocation4 + $0xe0] sm:$0xff] %vm120_vm0, %v464_v17 }
  0xe9   :  { %316 = vst.msk [vmem:[#allocation2 + $0xa2] sm:$0xff] %vm120_vm0, %v250_v28  ;;  %v253_v36 = vmax.f32 %v223_v29, 0.0  ;;  %v215_v37 = vadd.f32 %v9549_v35, %v214_v33  ;;  %509 = vrot.lane.b32.xlu0 %v9633_v34, %s9308_s0  ;;  %v469_v14 = vld [vmem:[#allocation2 + $0x60] sm:$0xff]  ;;  %v568_v29 = vld [vmem:[#allocation2 + $0x132] sm:$0xff]  ;;  %v8798_v17 = vld [vmem:[%s11594_s2 + $0x1c8] sm:$0xff]  }
  0xea   :  { %v8711_v39 = vpop.f32.mrf.mxu0  ;;  %v471_v24 = vld [vmem:[#allocation2 + $0x80] sm:$0xff]  ;;  %v504_v26 = vld [vmem:[#allocation2 + $0x92] sm:$0xff] }
  0xeb   :  { %322 = vst.msk [vmem:[#allocation2 + $0xd2] sm:$0xff] %vm120_vm0, %v253_v36  ;;  %v251_v40 = vmax.f32 %v215_v37, 0.0  ;;  %v236_v41 = vadd.f32 %v8711_v39, %v9549_v35  ;;  %v472_v27 = vld [vmem:[#allocation2 + $0x90] sm:$0xff]  ;;  %v8788_v2 = vld [vmem:[%s11594_s2 + $0x1a0] sm:$0xff]  }
  0xec   :  { %v227_v44 = vpop.f32.mrf.mxu0  ;;  %v502_v18 = vld [vmem:[#allocation2 + $0x72] sm:$0xff] }
  0xed   :  { %318 = vst.msk [vmem:[#allocation2 + $0xb2] sm:$0xff] %vm120_vm0, %v251_v40  ;;  %v256_v46 = vmax.f32 %v236_v41, 0.0  ;;  %v228_v47 = vadd.f32 %v9549_v35, %v227_v44  ;;  %v470_v20 = vld [vmem:[#allocation2 + $0x70] sm:$0xff]  ;;  %v8777_v41 = vld [vmem:[%s11594_s2 + $0x1b8] sm:$0xff]  }
  0xee   :  { %v8712_v49 = vpop.f32.mrf.mxu0  ;;  %v558_v50 = vld [vmem:[#allocation2 + $0xc2] sm:$0xff] }
  0xef   :  { %328 = vst.msk [vmem:[#allocation2 + $0x110] sm:$0xff] %vm120_vm0, %v256_v46  ;;  %v254_v51 = vmax.f32 %v228_v47, 0.0  ;;  %v239_v52 = vadd.f32 %v8712_v49, %v9549_v35  ;;  %562 = vst.msk [vmem:[#allocation4 + $0x78] sm:$0xff] %vm120_vm0, %v558_v50  ;;  %v526_v55 = vld [vmem:[#allocation2 + $0xc0] sm:$0xff]  ;;  %v8778_v46 = vld [vmem:[%s11594_s2 + $0x1f0] sm:$0xff]  }
  0xf0   :  { %435 = vst.msk [vmem:[#allocation4 + $0x98] sm:$0xff] %vm120_vm0, %v558_v50  ;;  %v230_v56 = vpop.f32.mrf.mxu0  ;;  %v429_v57 = vld [vmem:[#allocation2 + $0xa2] sm:$0xff]  ;;  %530 = vst.msk [vmem:[#allocation4 + $0x70] sm:$0xff] %vm120_vm0, %v526_v55  ;;  %v8780_v49 = vld [vmem:[%s11594_s2 + $0x1b0] sm:$0xff]  }
  0xf1   :  { %v397_v58 = vld [vmem:[#allocation2 + $0xa0] sm:$0xff]  ;;  %403 = vst.msk [vmem:[#allocation4 + $0x90] sm:$0xff] %vm120_vm0, %v526_v55  ;;  %324 = vst.msk [vmem:[#allocation2 + $0xf0] sm:$0xff] %vm120_vm0, %v254_v51  ;;  %v257_v60 = vmax.f32 %v239_v52, 0.0  ;;  %v231_v61 = vadd.f32 %v9549_v35, %v230_v56  ;;  %v8771_v35 = vld [vmem:[%s11594_s2 + $0x148] sm:$0xff]  }
  0xf2   :  { %433 = vst.msk [vmem:[#allocation4 + $0x18] sm:$0xff] %vm120_vm0, %v429_v57  ;;  %401 = vst.msk [vmem:[#allocation4 + $0x10] sm:$0xff] %vm120_vm0, %v397_v58  ;;  %7953 = vmatprep.subr.bf16.mxu1 %v8771_v35  ;;  %v559_v13 = vld [vmem:[#allocation2 + $0xd2] sm:$0xff]  ;;  %v8782_v51 = vld [vmem:[%s11594_s2 + $0x1e8] sm:$0xff]  }
  0xf3   :  { %330 = vst.msk [vmem:[#allocation2 + $0x120] sm:$0xff] %vm120_vm0, %v257_v60  ;;  %v255_v63 = vmax.f32 %v231_v61, 0.0  ;;  %7954 = vmatpush3.bf16.msra.mxu1 %v8773_v3  ;;  %563 = vst.msk [vmem:[#allocation4 + $0xb8] sm:$0xff] %vm120_vm0, %v559_v13  ;;  %v527_v15 = vld [vmem:[#allocation2 + $0xd0] sm:$0xff]  ;;  %v8781_v50 = vld [vmem:[%s11594_s2 + $0x38] sm:$0xff]  }
  0xf4   :  { %v557_v1 = vld [vmem:[#allocation2 + $0xb2] sm:$0xff]  ;;  %7955 = vmatprep.subr.bf16.mxu1 %v8774_v6  ;;  %436 = vst.msk [vmem:[#allocation4 + $0xd8] sm:$0xff] %vm120_vm0, %v559_v13  ;;  %531 = vst.msk [vmem:[#allocation4 + $0xb0] sm:$0xff] %vm120_vm0, %v527_v15  ;;  %v8784_v61 = vld [vmem:[%s11594_s2 + $0x1a8] sm:$0xff]  }
  0xf5   :  { %326 = vst.msk [vmem:[#allocation2 + $0x100] sm:$0xff] %vm120_vm0, %v255_v63  ;;  %561 = vst.msk [vmem:[#allocation4 + $0x38] sm:$0xff] %vm120_vm0, %v557_v1  ;;  %v525_v4 = vld [vmem:[#allocation2 + $0xb0] sm:$0xff]  ;;  %v8786_v63 = vld [vmem:[%s11594_s2 + $0x1e0] sm:$0xff]  }
  0xf6   :  { %434 = vst.msk [vmem:[#allocation4 + $0x58] sm:$0xff] %vm120_vm0, %v557_v1  ;;  %529 = vst.msk [vmem:[#allocation4 + $0x30] sm:$0xff] %vm120_vm0, %v525_v4  ;;  %v566_v19 = vld [vmem:[#allocation2 + $0x112] sm:$0xff]  ;;  %v8789_v3 = vld [vmem:[%s11594_s2 + $0x28] sm:$0xff]  }
  0xf7   :  { %402 = vst.msk [vmem:[#allocation4 + $0x50] sm:$0xff] %vm120_vm0, %v525_v4  ;;  %7956 = vmatpush3.bf16.msra.mxu1 %v8776_v8  ;;  %404 = vst.msk [vmem:[#allocation4 + $0xd0] sm:$0xff] %vm120_vm0, %v527_v15  ;;  %v534_v21 = vld [vmem:[#allocation2 + $0x110] sm:$0xff]  ;;  %v8790_v4 = vld [vmem:[%s11594_s2 + $0x1d8] sm:$0xff]  }
  0xf8   :  { %v437_v5 = vld [vmem:[#allocation2 + $0xf2] sm:$0xff]  ;;  %7985 = vmatprep.subr.bf16.mxu1 %v8779_v11 }
  0xf9   :  { %445 = vrot.lane.b32.xlu1 %v437_v5, %s9308_s0  ;;  %v405_v9 = vld [vmem:[#allocation2 + $0xf0] sm:$0xff]  ;;  %v8791_v5 = vld [vmem:[%s11594_s2 + $0x60] sm:$0xff]   ;;  %v8792_v8 = vld [vmem:[%s11594_s2 + $0x198] sm:$0xff]  }
  0xfa   :  { %v567_v23 = vld [vmem:[#allocation2 + $0x122] sm:$0xff]  ;;  %v8783_v56 = vld [vmem:[%s11594_s2 + $0x70] sm:$0xff]   ;;  %v8795_v11 = vld [vmem:[%s11594_s2 + $0x58] sm:$0xff]  }
  0xfb   :  { %v535_v25 = vld [vmem:[#allocation2 + $0x120] sm:$0xff]  ;;  %v8796_v15 = vld [vmem:[%s11594_s2 + $0x190] sm:$0xff]  }
  0xfc   :  { %v565_v10 = vld [vmem:[#allocation2 + $0x102] sm:$0xff] }
  0xfd   :  { %413 = vrot.lane.b32.xlu1 %v405_v9, %s9308_s0  ;;  %573 = vrot.lane.b32.xlu0 %v565_v10, %s9308_s0  ;;  %v533_v16 = vld [vmem:[#allocation2 + $0x100] sm:$0xff] }
  0xfe   :  { %v8793_v9 = vld [vmem:[%s11594_s2 + $0x20] sm:$0xff]  }
 0x101   :  { %477 = vrot.lane.b32.xlu1 %v469_v14, %s9308_s0  ;;  %383 = vrot.lane.b32.xlu0 %v9633_v34, %s9308_s0 }
 0x105   :  { %541 = vrot.lane.b32.xlu1 %v533_v16, %s9308_s0  ;;  %447 = vrot.lane.b32.xlu0 %v565_v10, %s9308_s0  ;;  %v8794_v10 = vld [vmem:[%s11594_s2 + $0x1d0] sm:$0xff]  }
 0x109   :  { %511 = vrot.lane.b32.xlu0 %v502_v18, %s9308_s0  ;;  %350 = vrot.lane.b32.xlu1 %v469_v14, %s9308_s0 }
 0x10d   :  { %575 = vrot.lane.b32.xlu0 %v566_v19, %s9308_s0  ;;  %415 = vrot.lane.b32.xlu1 %v533_v16, %s9308_s0  ;;  %v8797_v16 = vld [vmem:[%s11594_s2 + $0x18] sm:$0xff]  }
 0x111   :  { %385 = vrot.lane.b32.xlu0 %v502_v18, %s9308_s0  ;;  %479 = vrot.lane.b32.xlu1 %v470_v20, %s9308_s0  ;;  %v8799_v18 = vld [vmem:[%s11594_s2 + $0x50] sm:$0xff]  }
 0x115   :  { %449 = vrot.lane.b32.xlu0 %v566_v19, %s9308_s0  ;;  %543 = vrot.lane.b32.xlu1 %v534_v21, %s9308_s0 }
 0x119   :  { %513 = vrot.lane.b32.xlu0 %v503_v22, %s9308_s0  ;;  %352 = vrot.lane.b32.xlu1 %v470_v20, %s9308_s0 }
 0x11d   :  { %577 = vrot.lane.b32.xlu0 %v567_v23, %s9308_s0  ;;  %417 = vrot.lane.b32.xlu1 %v534_v21, %s9308_s0  ;;  %v8800_v21 = vld [vmem:[%s11594_s2 + $0x188] sm:$0xff]  }
 0x121   :  { %387 = vrot.lane.b32.xlu0 %v503_v22, %s9308_s0  ;;  %481 = vrot.lane.b32.xlu1 %v471_v24, %s9308_s0  ;;  %v8801_v22 = vld [vmem:[%s11594_s2 + $0x10] sm:$0xff]  }
 0x125   :  { %451 = vrot.lane.b32.xlu0 %v567_v23, %s9308_s0  ;;  %545 = vrot.lane.b32.xlu1 %v535_v25, %s9308_s0  ;;  %v8802_v23 = vld [vmem:[%s11594_s2 + $0x1c0] sm:$0xff]  }
 0x129   :  { %515 = vrot.lane.b32.xlu0 %v504_v26, %s9308_s0  ;;  %354 = vrot.lane.b32.xlu1 %v471_v24, %s9308_s0  ;;  %v8803_v24 = vld [vmem:[%s11594_s2 + $0x48] sm:$0xff]  }
 0x12d   :  { %419 = vrot.lane.b32.xlu1 %v535_v25, %s9308_s0  ;;  %579 = vrot.lane.b32.xlu0 %v568_v29, %s9308_s0  ;;  %v8806_v29 = vld [vmem:[%s11594_s2 + $0x40] sm:$0xff]  }
 0x131   :  { %483 = vrot.lane.b32.xlu1 %v472_v27, %s9308_s0  ;;  %v8804_v27 = vld [vmem:[%s11594_s2 + $0x180] sm:$0xff]  }
 0x135   :  { %547 = vrot.lane.b32.xlu1 %v536_v30, %s9308_s0  ;;  %v8807_v30 = vld [vmem:[%s11594_s2 + $0xf8] sm:$0xff]  }
 0x15b   :  { %v510_v28 = vpop.permute.xlu0 %509 }
 0x15c   :  { %521 = vst.msk [vmem:[#allocation4 + $0x28] sm:$0xff] %vm360_vm2, %v510_v28  ;;  %v8805_v28 = vld [vmem:[%s11594_s2 + $0x8] sm:$0xff]  }
 0x163   :  { %v609_v31 = vld [vmem:[#allocation4 + $0x28] sm:$0xff] }
 0x164   :  { %v617_v32 = vpack.c.bf16 %v609_v31, %v609_v31 }
 0x166   :  { %1249 = vmatprep.mubr.bf16.mxu1 %v617_v32  ;;  %v8808_v32 = vld [vmem:[%s11594_s2] sm:$0xff]  }
 0x16b   :  { %v446_v33 = vpop.permute.xlu1 %445 }
 0x16c   :  { %457 = vst.msk [vmem:[#allocation4 + $0x18] sm:$0xff] %vm360_vm2, %v446_v33  ;;  %v8809_v33 = vld [vmem:[%s11594_s2 + $0xb8] sm:$0xff]  }
 0x16f   :  { %v414_v34 = vpop.permute.xlu1 %413  ;;  %v574_v36 = vpop.permute.xlu0 %573 }
 0x170   :  { %425 = vst.msk [vmem:[#allocation4 + $0x10] sm:$0xff] %vm360_vm2, %v414_v34  ;;  %585 = vst.msk [vmem:[#allocation4 + $0x38] sm:$0xff] %vm360_vm2, %v574_v36  ;;  %v8810_v34 = vld [vmem:[%s11594_s2 + $0xf0] sm:$0xff]  }
 0x173   :  { %v478_v37 = vpop.permute.xlu1 %477  ;;  %v384_v38 = vpop.permute.xlu0 %383  ;;  %v607_v39 = vld [vmem:[#allocation4 + $0x18] sm:$0xff] }
 0x174   :  { %489 = vst.msk [vmem:[#allocation4 + $0x20] sm:$0xff] %vm360_vm2, %v478_v37  ;;  %394 = vst.msk [vmem:[#allocation4 + $0x48] sm:$0xff] %vm360_vm2, %v384_v38  ;;  %v615_v40 = vpack.c.bf16 %v607_v39, %v607_v39 }
 0x176   :  { %1209 = vmatprep.mubr.bf16.mxu0 %v615_v40  ;;  %v8811_v40 = vld [vmem:[%s11594_s2 + $0x178] sm:$0xff]  }
 0x177   :  { %v542_v42 = vpop.permute.xlu1 %541  ;;  %v448_v43 = vpop.permute.xlu0 %447  ;;  %v606_v44 = vld [vmem:[#allocation4 + $0x10] sm:$0xff]  ;;  %v611_v45 = vld [vmem:[#allocation4 + $0x38] sm:$0xff] }
 0x178   :  { %553 = vst.msk [vmem:[#allocation4 + $0x30] sm:$0xff] %vm360_vm2, %v542_v42  ;;  %458 = vst.msk [vmem:[#allocation4 + $0x58] sm:$0xff] %vm360_vm2, %v448_v43  ;;  %v614_v47 = vpack.c.bf16 %v606_v44, %v606_v44  ;;  %v619_v48 = vpack.c.bf16 %v611_v45, %v611_v45  ;;  %v8812_v43 = vld [vmem:[%s11594_s2 + $0xb0] sm:$0xff]   ;;  %v8813_v44 = vld [vmem:[%s11594_s2 + $0x138] sm:$0xff]  }
 0x17a   :  { %1210 = vmatmul.mubr.bf16.vlgmr.msra.gmra.mxu0 %v614_v47 }
 0x17b   :  { %7964 = vmatpush3.bf16.msra.mxu0 %v8777_v41  ;;  %1289 = vmatprep.mubr.bf16.mxu0 %v619_v48  ;;  %v512_v52 = vpop.permute.xlu0 %511  ;;  %v351_v53 = vpop.permute.xlu1 %350  ;;  %v608_v54 = vld [vmem:[#allocation4 + $0x20] sm:$0xff]  ;;  %v1302_v55 = vld [vmem:[#allocation4 + $0x48] sm:$0xff]  ;;  %v8814_v48 = vld [vmem:[%s11594_s2 + $0xe8] sm:$0xff]  }
 0x17c   :  { %522 = vst.msk [vmem:[#allocation4 + $0x68] sm:$0xff] %vm360_vm2, %v512_v52  ;;  %362 = vst.msk [vmem:[#allocation4 + $0x40] sm:$0xff] %vm360_vm2, %v351_v53  ;;  %7965 = vmatprep.subr.bf16.mxu0 %v8778_v46  ;;  %v616_v57 = vpack.c.bf16 %v608_v54, %v608_v54  ;;  %v1310_v58 = vpack.c.bf16 %v1302_v55, %v1302_v55  ;;  %v8816_v52 = vld [vmem:[%s11594_s2 + $0xa8] sm:$0xff]   ;;  %v8817_v54 = vld [vmem:[%s11594_s2 + $0x130] sm:$0xff]  }
 0x17d   :  { %v8818_v55 = vld [vmem:[%s11594_s2 + $0xe0] sm:$0xff]  }
 0x17e   :  { %1250 = vmatmul.mubr.bf16.vlgmr.msra.gmra.mxu1 %v616_v57 }
 0x17f   :  { %7966 = vmatpush3.bf16.msra.mxu0 %v8780_v49  ;;  %7986 = vmatpush3.bf16.msra.mxu1 %v8781_v50  ;;  %v576_v59 = vpop.permute.xlu0 %575  ;;  %v416_v60 = vpop.permute.xlu1 %415  ;;  %v610_v31 = vld [vmem:[#allocation4 + $0x30] sm:$0xff]  ;;  %v1304_v38 = vld [vmem:[#allocation4 + $0x58] sm:$0xff]  ;;  %v8815_v49 = vld [vmem:[%s11594_s2 + $0x170] sm:$0xff]  }
 0x180   :  { %586 = vst.msk [vmem:[#allocation4 + $0x78] sm:$0xff] %vm360_vm2, %v576_v59  ;;  %426 = vst.msk [vmem:[#allocation4 + $0x50] sm:$0xff] %vm360_vm2, %v416_v60  ;;  %1866 = vmatprep.mubr.bf16.mxu1 %v1310_v58  ;;  %7967 = vmatprep.subr.bf16.mxu0 %v8782_v51  ;;  %v618_v41 = vpack.c.bf16 %v610_v31, %v610_v31  ;;  %v1312_v42 = vpack.c.bf16 %v1304_v38, %v1304_v38  ;;  %v8820_v58 = vld [vmem:[%s11594_s2 + $0xa0] sm:$0xff]   ;;  %v8821_v59 = vld [vmem:[%s11594_s2 + $0x128] sm:$0xff]  }
 0x181   :  { %7987 = vmatprep.subr.bf16.mxu1 %v8783_v56  ;;  %v8819_v56 = vld [vmem:[%s11594_s2 + $0x168] sm:$0xff]   ;;  %v8822_v60 = vld [vmem:[%s11594_s2 + $0xd8] sm:$0xff]   ;;  %v8850_v38 = vld [vmem:[%s11594_s2 + $0x1e0] sm:$0xff]  }
 0x183   :  { %7968 = vmatpush3.bf16.msra.mxu0 %v8784_v61  ;;  %7988 = vmatpush3.bf16.msra.mxu1 %v8785_v62  ;;  %v386_v35 = vpop.permute.xlu0 %385  ;;  %v480_v1 = vpop.permute.xlu1 %479  ;;  %v1301_v39 = vld [vmem:[#allocation4 + $0x40] sm:$0xff]  ;;  %v1306_v47 = vld [vmem:[#allocation4 + $0x68] sm:$0xff]  ;;  %v8823_v61 = vld [vmem:[%s11594_s2 + $0x160] sm:$0xff]  }
 0x184   :  { %395 = vst.msk [vmem:[#allocation4 + $0x88] sm:$0xff] %vm360_vm2, %v386_v35  ;;  %490 = vst.msk [vmem:[#allocation4 + $0x60] sm:$0xff] %vm360_vm2, %v480_v1  ;;  %7969 = vmatprep.subr.bf16.mxu0 %v8786_v63  ;;  %7989 = vmatprep.subr.bf16.mxu1 %v8787_v0  ;;  %v1309_v50 = vpack.c.bf16 %v1301_v39, %v1301_v39  ;;  %v1314_v51 = vpack.c.bf16 %v1306_v47, %v1306_v47  ;;  %v8824_v62 = vld [vmem:[%s11594_s2 + $0x98] sm:$0xff]   ;;  %v8825_v63 = vld [vmem:[%s11594_s2 + $0x120] sm:$0xff]  }
 0x185   :  { %v8826_v0 = vld [vmem:[%s11594_s2 + $0xd0] sm:$0xff]   ;;  %v8827_v35 = vld [vmem:[%s11594_s2 + $0x158] sm:$0xff]   ;;  %v8851_v39 = vld [vmem:[%s11594_s2 + $0x68] sm:$0xff]  }
 0x186   :  { %v8828_v1 = vld [vmem:[%s11594_s2 + $0x90] sm:$0xff]   ;;  %v8859_v47 = vld [vmem:[%s11594_s2 + $0x58] sm:$0xff]  }
 0x187   :  { %7970 = vmatpush3.bf16.msra.mxu0 %v8788_v2  ;;  %7990 = vmatpush3.bf16.msra.mxu1 %v8789_v3  ;;  %v450_v6 = vpop.permute.xlu0 %449  ;;  %v544_v7 = vpop.permute.xlu1 %543  ;;  %v8829_v2 = vld [vmem:[%s11594_s2 + $0x118] sm:$0xff]   ;;  %v8830_v3 = vld [vmem:[%s11594_s2 + $0xc8] sm:$0xff]  }
 0x188   :  { %459 = vst.msk [vmem:[#allocation4 + $0x98] sm:$0xff] %vm360_vm2, %v450_v6  ;;  %554 = vst.msk [vmem:[#allocation4 + $0x70] sm:$0xff] %vm360_vm2, %v544_v7  ;;  %7971 = vmatprep.subr.bf16.mxu0 %v8790_v4  ;;  %7991 = vmatprep.subr.bf16.mxu1 %v8791_v5  ;;  %v8831_v4 = vld [vmem:[%s11594_s2 + $0x150] sm:$0xff]   ;;  %v8832_v5 = vld [vmem:[%s11594_s2 + $0x88] sm:$0xff]  }
 0x189   :  { %v8833_v6 = vld [vmem:[%s11594_s2 + $0x110] sm:$0xff]   ;;  %v8834_v7 = vld [vmem:[%s11594_s2 + $0xc0] sm:$0xff]  }
 0x18b   :  { %7972 = vmatpush3.bf16.msra.mxu0 %v8792_v8  ;;  %7992 = vmatpush3.bf16.msra.mxu1 %v8793_v9  ;;  %v514_v13 = vpop.permute.xlu0 %513  ;;  %v353_v14 = vpop.permute.xlu1 %352  ;;  %v8835_v8 = vld [vmem:[%s11594_s2 + $0x148] sm:$0xff]   ;;  %v1999_v31 = vld [vmem:[#allocation4 + $0x88] sm:$0xff] }
 0x18c   :  { %523 = vst.msk [vmem:[#allocation4 + $0xa8] sm:$0xff] %vm360_vm2, %v514_v13  ;;  %363 = vst.msk [vmem:[#allocation4 + $0x80] sm:$0xff] %vm360_vm2, %v353_v14  ;;  %7973 = vmatprep.subr.bf16.mxu0 %v8794_v10  ;;  %7993 = vmatprep.subr.bf16.mxu1 %v8795_v11  ;;  %v7913_v9 = vpop.f32.mrf.mxu1  ;;  %v8836_v10 = vld [vmem:[%s11594_s2 + $0x80] sm:$0xff]   ;;  %v8837_v11 = vld [vmem:[%s11594_s2 + $0x108] sm:$0xff]  }
 0x18d   :  { %v8838_v13 = vld [vmem:[%s11594_s2 + $0x140] sm:$0xff]  }
 0x18e   :  { %v7914_v14 = vpop.f32.mrf.mxu1 }
 0x18f   :  { %7974 = vmatpush3.bf16.msra.mxu0 %v8796_v15  ;;  %7994 = vmatpush3.bf16.msra.mxu1 %v8797_v16  ;;  %v578_v19 = vpop.permute.xlu0 %577  ;;  %v418_v20 = vpop.permute.xlu1 %417  ;;  %v8839_v15 = vld [vmem:[%s11594_s2 + $0x1f8] sm:$0xff]   ;;  %v9957_v16 = vadd.f32 %v7914_v14, %v7913_v9  ;;  %v8879_v14 = vld [vmem:[%s11594_s2 + $0x170] sm:$0xff]  }
 0x190   :  { %587 = vst.msk [vmem:[#allocation4 + $0xb8] sm:$0xff] %vm360_vm2, %v578_v19  ;;  %427 = vst.msk [vmem:[#allocation4 + $0x90] sm:$0xff] %vm360_vm2, %v418_v20  ;;  %7975 = vmatprep.subr.bf16.mxu0 %v8798_v17  ;;  %7995 = vmatprep.subr.bf16.mxu1 %v8799_v18  ;;  %v1303_v17 = vld [vmem:[#allocation4 + $0x50] sm:$0xff]  ;;  %v8841_v19 = vld [vmem:[%s11594_s2 + $0x1b8] sm:$0xff]   ;;  %v7916_v20 = vpop.f32.mrf.mxu1 }
 0x191   :  { %v8840_v18 = vld [vmem:[%s11594_s2 + $0x100] sm:$0xff]   ;;  %v8877_v9 = vld [vmem:[%s11594_s2 + $0x138] sm:$0xff]  }
 0x192   :  { %v8884_v20 = vld [vmem:[%s11594_s2 + $0xa0] sm:$0xff]  }
 0x193   :  { %7976 = vmatpush3.bf16.msra.mxu0 %v8800_v21  ;;  %7996 = vmatpush3.bf16.msra.mxu1 %v8801_v22  ;;  %v388_v25 = vpop.permute.xlu0 %387  ;;  %v482_v26 = vpop.permute.xlu1 %481  ;;  %v8842_v21 = vld [vmem:[%s11594_s2 + $0x1f0] sm:$0xff]   ;;  %v1308_v22 = vld [vmem:[#allocation4 + $0x78] sm:$0xff] }
 0x194   :  { %396 = vst.msk [vmem:[#allocation4 + $0xc8] sm:$0xff] %vm360_vm2, %v388_v25  ;;  %491 = vst.msk [vmem:[#allocation4 + $0xa0] sm:$0xff] %vm360_vm2, %v482_v26  ;;  %7977 = vmatprep.subr.bf16.mxu0 %v8802_v23  ;;  %7997 = vmatprep.subr.bf16.mxu1 %v8803_v24  ;;  %v7917_v23 = vpop.f32.mrf.mxu1  ;;  %v1311_v24 = vpack.c.bf16 %v1303_v17, %v1303_v17  ;;  %v8843_v25 = vld [vmem:[%s11594_s2 + $0x78] sm:$0xff]   ;;  %v1305_v26 = vld [vmem:[#allocation4 + $0x60] sm:$0xff] }
 0x195   :  { %v8881_v17 = vld [vmem:[%s11594_s2 + $0x130] sm:$0xff]   ;;  %v8887_v23 = vld [vmem:[%s11594_s2 + $0x160] sm:$0xff]  }
 0x197   :  { %7978 = vmatpush3.bf16.msra.mxu0 %v8804_v27  ;;  %7998 = vmatpush3.bf16.msra.mxu1 %v8805_v28  ;;  %v452_v36 = vpop.permute.xlu0 %451  ;;  %v546_v37 = vpop.permute.xlu1 %545  ;;  %v8844_v27 = vld [vmem:[%s11594_s2 + $0x1b0] sm:$0xff]   ;;  %v8845_v28 = vld [vmem:[%s11594_s2 + $0x38] sm:$0xff]  }
 0x198   :  { %460 = vst.msk [vmem:[#allocation4 + $0xd8] sm:$0xff] %vm360_vm2, %v452_v36  ;;  %555 = vst.msk [vmem:[#allocation4 + $0xb0] sm:$0xff] %vm360_vm2, %v546_v37  ;;  %7999 = vmatprep.subr.bf16.mxu1 %v8806_v29  ;;  %8007 = vmatprep.subr.bf16.mxu0 %v8807_v30  ;;  %v1316_v29 = vpack.c.bf16 %v1308_v22, %v1308_v22  ;;  %v8846_v30 = vld [vmem:[%s11594_s2 + $0x1e8] sm:$0xff]   ;;  %v8849_v36 = vld [vmem:[%s11594_s2 + $0x30] sm:$0xff]   ;;  %v2007_v37 = vpack.c.bf16 %v1999_v31, %v1999_v31 }
 0x199   :  { %v8886_v22 = vld [vmem:[%s11594_s2 + $0xd8] sm:$0xff]  }
 0x19a   :  { %1290 = vmatmul.mubr.bf16.vlgmr.msra.gmra.mxu0 %v618_v41  ;;  %v8853_v41 = vld [vmem:[%s11594_s2 + $0x28] sm:$0xff]   ;;  %v8893_v31 = vld [vmem:[%s11594_s2 + $0x118] sm:$0xff]  }
 0x19b   :  { %8000 = vmatpush3.bf16.msra.mxu1 %v8808_v32  ;;  %8008 = vmatpush3.bf16.msra.mxu0 %v8809_v33  ;;  %v516_v45 = vpop.permute.xlu0 %515  ;;  %v355_v46 = vpop.permute.xlu1 %354  ;;  %v1313_v32 = vpack.c.bf16 %v1305_v26, %v1305_v26  ;;  %v8847_v33 = vld [vmem:[%s11594_s2 + $0x70] sm:$0xff]   ;;  %v8888_v26 = vld [vmem:[%s11594_s2 + $0x98] sm:$0xff]  }
 0x19c   :  { %1906 = vmatprep.mubr.bf16.mxu0 %v1312_v42  ;;  %524 = vst.msk [vmem:[#allocation4 + $0xe8] sm:$0xff] %vm360_vm2, %v516_v45  ;;  %364 = vst.msk [vmem:[#allocation4 + $0xc0] sm:$0xff] %vm360_vm2, %v355_v46  ;;  %8009 = vmatprep.subr.bf16.mxu0 %v8810_v34  ;;  %v8848_v34 = vld [vmem:[%s11594_s2 + $0x1a8] sm:$0xff]   ;;  %v8854_v42 = vld [vmem:[%s11594_s2 + $0x1d8] sm:$0xff]  }
 0x19d   :  { %8029 = vmatprep.subr.bf16.mxu1 %v8811_v40  ;;  %v8852_v40 = vld [vmem:[%s11594_s2 + $0x1a0] sm:$0xff]   ;;  %v8858_v46 = vld [vmem:[%s11594_s2 + $0x1d0] sm:$0xff]  }
 0x19e   :  { %1867 = vmatmul.mubr.bf16.vlgmr.msra.gmra.mxu1 %v1309_v50  ;;  %v8857_v45 = vld [vmem:[%s11594_s2 + $0x20] sm:$0xff]  }
 0x19f   :  { %8010 = vmatpush3.bf16.msra.mxu0 %v8812_v43  ;;  %8030 = vmatpush3.bf16.msra.mxu1 %v8813_v44  ;;  %v420_v53 = vpop.permute.xlu1 %419  ;;  %v8855_v43 = vld [vmem:[%s11594_s2 + $0x60] sm:$0xff]   ;;  %v8856_v44 = vld [vmem:[%s11594_s2 + $0x198] sm:$0xff]  }
 0x1a0   :  { %1946 = vmatprep.mubr.bf16.mxu1 %v1314_v51  ;;  %428 = vst.msk [vmem:[#allocation4 + $0xd0] sm:$0xff] %vm360_vm2, %v420_v53  ;;  %8011 = vmatprep.subr.bf16.mxu0 %v8814_v48  ;;  %v8860_v48 = vld [vmem:[%s11594_s2 + $0x190] sm:$0xff]   ;;  %v560_v50 = vld [vmem:[#allocation2 + $0xe2] sm:$0xff] }
 0x1a1   :  { %8031 = vmatprep.subr.bf16.mxu1 %v8815_v49  ;;  %v8861_v49 = vld [vmem:[%s11594_s2 + $0x18] sm:$0xff]   ;;  %v8862_v51 = vld [vmem:[%s11594_s2 + $0x1c8] sm:$0xff]   ;;  %564 = vst.msk [vmem:[#allocation4 + $0xf8] sm:$0xff] %vm120_vm0, %v560_v50 }
 0x1a2   :  { %v8864_v53 = vld [vmem:[%s11594_s2 + $0x188] sm:$0xff]   ;;  %v8907_v50 = vld [vmem:[%s11594_s2 + $0x78] sm:$0xff]  }
 0x1a3   :  { %8012 = vmatpush3.bf16.msra.mxu0 %v8816_v52  ;;  %8032 = vmatpush3.bf16.msra.mxu1 %v8817_v54  ;;  %v484_v57 = vpop.permute.xlu1 %483  ;;  %v8863_v52 = vld [vmem:[%s11594_s2 + $0x50] sm:$0xff]  }
 0x1a4   :  { %492 = vst.msk [vmem:[#allocation4 + $0xe0] sm:$0xff] %vm360_vm2, %v484_v57  ;;  %8013 = vmatprep.subr.bf16.mxu0 %v8818_v55  ;;  %8033 = vmatprep.subr.bf16.mxu1 %v8819_v56  ;;  %v8865_v54 = vld [vmem:[%s11594_s2 + $0x10] sm:$0xff]   ;;  %v580_v55 = vpop.permute.xlu0 %579  ;;  %v528_v56 = vld [vmem:[#allocation2 + $0xe0] sm:$0xff] }
 0x1a5   :  { %588 = vst.msk [vmem:[#allocation4 + $0xf8] sm:$0xff] %vm360_vm2, %v580_v55 }
 0x1a6   :  { %532 = vst.msk [vmem:[#allocation4 + $0xf0] sm:$0xff] %vm120_vm0, %v528_v56  ;;  %v8910_v56 = vld [vmem:[%s11594_s2 + $0x1e8] sm:$0xff]  }
 0x1a7   :  { %8014 = vmatpush3.bf16.msra.mxu0 %v8820_v58  ;;  %8034 = vmatpush3.bf16.msra.mxu1 %v8821_v59  ;;  %v548_v57 = vpop.permute.xlu1 %547  ;;  %v8866_v58 = vld [vmem:[%s11594_s2 + $0x1c0] sm:$0xff]   ;;  %v8867_v59 = vld [vmem:[%s11594_s2 + $0x48] sm:$0xff]  }
 0x1a8   :  { %8015 = vmatprep.subr.bf16.mxu0 %v8822_v60  ;;  %8035 = vmatprep.subr.bf16.mxu1 %v8823_v61  ;;  %556 = vst.msk [vmem:[#allocation4 + $0xf0] sm:$0xff] %vm360_vm2, %v548_v57  ;;  %v8868_v60 = vld [vmem:[%s11594_s2 + $0x180] sm:$0xff]   ;;  %v8869_v61 = vld [vmem:[%s11594_s2 + $0x8] sm:$0xff]   ;;  %v8911_v57 = vld [vmem:[%s11594_s2 + $0x70] sm:$0xff]  }
 0x1ab   :  { %8016 = vmatpush3.bf16.msra.mxu0 %v8824_v62  ;;  %8036 = vmatpush3.bf16.msra.mxu1 %v8825_v63  ;;  %v8870_v62 = vld [vmem:[%s11594_s2 + $0x40] sm:$0xff]   ;;  %v8871_v63 = vld [vmem:[%s11594_s2 + $0xf8] sm:$0xff]  }
 0x1ac   :  { %8017 = vmatprep.subr.bf16.mxu0 %v8826_v0  ;;  %8037 = vmatprep.subr.bf16.mxu1 %v8827_v35  ;;  %v1307_v0 = vld [vmem:[#allocation4 + $0x70] sm:$0xff] }
 0x1ad   :  { %v8872_v35 = vld [vmem:[%s11594_s2] sm:$0xff]  }
 0x1af   :  { %8018 = vmatpush3.bf16.msra.mxu0 %v8828_v1  ;;  %8038 = vmatpush3.bf16.msra.mxu1 %v8829_v2  ;;  %v8873_v1 = vld [vmem:[%s11594_s2 + $0xb8] sm:$0xff]   ;;  %v2001_v2 = vld [vmem:[#allocation4 + $0x98] sm:$0xff] }
 0x1b0   :  { %8019 = vmatprep.subr.bf16.mxu0 %v8830_v3  ;;  %8039 = vmatprep.subr.bf16.mxu1 %v8831_v4  ;;  %v1315_v3 = vpack.c.bf16 %v1307_v0, %v1307_v0  ;;  %v8874_v4 = vld [vmem:[%s11594_s2 + $0xf0] sm:$0xff]   ;;  %v8917_v0 = vld [vmem:[%s11594_s2 + $0x28] sm:$0xff]  }
 0x1b3   :  { %8020 = vmatpush3.bf16.msra.mxu0 %v8832_v5  ;;  %8040 = vmatpush3.bf16.msra.mxu1 %v8833_v6  ;;  %v1998_v5 = vld [vmem:[#allocation4 + $0x80] sm:$0xff]  ;;  %v8875_v6 = vld [vmem:[%s11594_s2 + $0x178] sm:$0xff]  }
 0x1b4   :  { %8021 = vmatprep.subr.bf16.mxu0 %v8834_v7  ;;  %8041 = vmatprep.subr.bf16.mxu1 %v8835_v8  ;;  %v2009_v7 = vpack.c.bf16 %v2001_v2, %v2001_v2  ;;  %v8876_v8 = vld [vmem:[%s11594_s2 + $0xb0] sm:$0xff]   ;;  %v8920_v2 = vld [vmem:[%s11594_s2 + $0x198] sm:$0xff]  }
 0x1b7   :  { %8022 = vmatpush3.bf16.msra.mxu0 %v8836_v10  ;;  %8042 = vmatpush3.bf16.msra.mxu1 %v8837_v11  ;;  %v2003_v10 = vld [vmem:[#allocation4 + $0xa8] sm:$0xff]  ;;  %v2006_v11 = vpack.c.bf16 %v1998_v5, %v1998_v5 }
 0x1b8   :  { %8043 = vmatprep.subr.bf16.mxu1 %v8838_v13  ;;  %8051 = vmatprep.subr.bf16.mxu0 %v8839_v15  ;;  %v8878_v13 = vld [vmem:[%s11594_s2 + $0xe8] sm:$0xff]   ;;  %v2011_v15 = vpack.c.bf16 %v2003_v10, %v2003_v10  ;;  %v8923_v5 = vld [vmem:[%s11594_s2 + $0x58] sm:$0xff]  }
 0x1b9   :  { %v8928_v10 = vld [vmem:[%s11594_s2 + $0x188] sm:$0xff]  }
 0x1ba   :  { %1907 = vmatmul.mubr.bf16.vlgmr.msra.gmra.mxu0 %v1311_v24  ;;  %v3431_v24 = vld [vmem:[#allocation3 + $0x6] sm:$0xff] }
 0x1bb   :  { %8044 = vmatpush3.bf16.msra.mxu1 %v8840_v18  ;;  %8052 = vmatpush3.bf16.msra.mxu0 %v8841_v19  ;;  %v8882_v18 = vld [vmem:[%s11594_s2 + $0xe0] sm:$0xff]   ;;  %v8883_v19 = vld [vmem:[%s11594_s2 + $0x168] sm:$0xff]  }
 0x1bc   :  { %1986 = vmatprep.mubr.bf16.mxu0 %v1316_v29  ;;  %8053 = vmatprep.subr.bf16.mxu0 %v8842_v21  ;;  %v8885_v21 = vld [vmem:[%s11594_s2 + $0x128] sm:$0xff]   ;;  %v8891_v29 = vld [vmem:[%s11594_s2 + $0x158] sm:$0xff]  }
 0x1bd   :  { %8073 = vmatprep.subr.bf16.mxu1 %v8843_v25  ;;  %v3399_v25 = vld [vmem:[#allocation3 + $0x2] sm:$0xff]  ;;  %3439 = vrot.lane.b32.xlu0 %v3431_v24, %s9308_s0  ;;  %v8938_v24 = vld [vmem:[%s11594_s2 + $0xf0] sm:$0xff]  }
 0x1be   :  { %1947 = vmatmul.mubr.bf16.vlgmr.msra.gmra.mxu1 %v1313_v32  ;;  %3407 = vrot.lane.b32.xlu1 %v3399_v25, %s9308_s0  ;;  %v8894_v32 = vld [vmem:[%s11594_s2 + $0xc8] sm:$0xff]   ;;  %v2695_v25 = vld [vmem:[#allocation4 + $0xc0] sm:$0xff] }
 0x1bf   :  { %8054 = vmatpush3.bf16.msra.mxu0 %v8844_v27  ;;  %8074 = vmatpush3.bf16.msra.mxu1 %v8845_v28  ;;  %v8889_v27 = vld [vmem:[%s11594_s2 + $0x120] sm:$0xff]   ;;  %v8890_v28 = vld [vmem:[%s11594_s2 + $0xd0] sm:$0xff]  }
 0x1c0   :  { %2563 = vmatprep.mubr.bf16.mxu1 %v2007_v37  ;;  %8055 = vmatprep.subr.bf16.mxu0 %v8846_v30  ;;  %v8892_v30 = vld [vmem:[%s11594_s2 + $0x90] sm:$0xff]   ;;  %v8898_v37 = vld [vmem:[%s11594_s2 + $0xc0] sm:$0xff]  }
 0x1c1   :  { %8075 = vmatprep.subr.bf16.mxu1 %v8847_v33  ;;  %v8895_v33 = vld [vmem:[%s11594_s2 + $0x150] sm:$0xff]  }
 0x1c3   :  { %8056 = vmatpush3.bf16.msra.mxu0 %v8848_v34  ;;  %8076 = vmatpush3.bf16.msra.mxu1 %v8849_v36  ;;  %v8896_v34 = vld [vmem:[%s11594_s2 + $0x88] sm:$0xff]   ;;  %v8897_v36 = vld [vmem:[%s11594_s2 + $0x110] sm:$0xff]  }
 0x1c4   :  { %8057 = vmatprep.subr.bf16.mxu0 %v8850_v38  ;;  %8077 = vmatprep.subr.bf16.mxu1 %v8851_v39  ;;  %v8899_v38 = vld [vmem:[%s11594_s2 + $0x148] sm:$0xff]   ;;  %v8900_v39 = vld [vmem:[%s11594_s2 + $0x80] sm:$0xff]  }
 0x1c7   :  { %8058 = vmatpush3.bf16.msra.mxu0 %v8852_v40  ;;  %8078 = vmatpush3.bf16.msra.mxu1 %v8853_v41  ;;  %v8901_v40 = vld [vmem:[%s11594_s2 + $0x108] sm:$0xff]   ;;  %v8902_v41 = vld [vmem:[%s11594_s2 + $0x140] sm:$0xff]  }
 0x1c8   :  { %8059 = vmatprep.subr.bf16.mxu0 %v8854_v42  ;;  %8079 = vmatprep.subr.bf16.mxu1 %v8855_v43  ;;  %v8903_v42 = vld [vmem:[%s11594_s2 + $0x1f8] sm:$0xff]   ;;  %v2000_v43 = vld [vmem:[#allocation4 + $0x90] sm:$0xff] }
 0x1cb   :  { %8060 = vmatpush3.bf16.msra.mxu0 %v8856_v44  ;;  %8080 = vmatpush3.bf16.msra.mxu1 %v8857_v45  ;;  %v8904_v44 = vld [vmem:[%s11594_s2 + $0x100] sm:$0xff]   ;;  %v8905_v45 = vld [vmem:[%s11594_s2 + $0x1b8] sm:$0xff]  }
 0x1cc   :  { %8061 = vmatprep.subr.bf16.mxu0 %v8858_v46  ;;  %8081 = vmatprep.subr.bf16.mxu1 %v8859_v47  ;;  %v2005_v46 = vld [vmem:[#allocation4 + $0xb8] sm:$0xff]  ;;  %v2008_v47 = vpack.c.bf16 %v2000_v43, %v2000_v43  ;;  %v8951_v43 = vld [vmem:[%s11594_s2 + $0x160] sm:$0xff]  }
 0x1cf   :  { %8062 = vmatpush3.bf16.msra.mxu0 %v8860_v48  ;;  %8082 = vmatpush3.bf16.msra.mxu1 %v8861_v49  ;;  %v8906_v48 = vld [vmem:[%s11594_s2 + $0x1f0] sm:$0xff]  }
 0x1d0   :  { %8063 = vmatprep.subr.bf16.mxu0 %v8862_v51  ;;  %8083 = vmatprep.subr.bf16.mxu1 %v8863_v52  ;;  %v2002_v49 = vld [vmem:[#allocation4 + $0xa0] sm:$0xff]  ;;  %v2013_v51 = vpack.c.bf16 %v2005_v46, %v2005_v46 }
 0x1d1   :  { %v8908_v52 = vld [vmem:[%s11594_s2 + $0x1b0] sm:$0xff]   ;;  %v2010_v55 = vpack.c.bf16 %v2002_v49, %v2002_v49  ;;  %v8957_v49 = vld [vmem:[%s11594_s2 + $0x118] sm:$0xff]  }
 0x1d2   :  { %v8954_v46 = vld [vmem:[%s11594_s2 + $0xd0] sm:$0xff]  }
 0x1d3   :  { %8064 = vmatpush3.bf16.msra.mxu0 %v8864_v53  ;;  %8084 = vmatpush3.bf16.msra.mxu1 %v8865_v54  ;;  %v8909_v53 = vld [vmem:[%s11594_s2 + $0x38] sm:$0xff]  }
 0x1d4   :  { %8065 = vmatprep.subr.bf16.mxu0 %v8866_v58  ;;  %8085 = vmatprep.subr.bf16.mxu1 %v8867_v59  ;;  %v2696_v54 = vld [vmem:[#allocation4 + $0xc8] sm:$0xff]  ;;  %v8912_v59 = vld [vmem:[%s11594_s2 + $0x1a8] sm:$0xff]  }
 0x1d5   :  { %v2704_v58 = vpack.c.bf16 %v2696_v54, %v2696_v54  ;;  %v8962_v54 = vld [vmem:[%s11594_s2 + $0xc0] sm:$0xff]  }
 0x1d7   :  { %8066 = vmatpush3.bf16.msra.mxu0 %v8868_v60  ;;  %8086 = vmatpush3.bf16.msra.mxu1 %v8869_v61  ;;  %v8913_v60 = vld [vmem:[%s11594_s2 + $0x30] sm:$0xff]   ;;  %v8914_v61 = vld [vmem:[%s11594_s2 + $0x1e0] sm:$0xff]  }
 0x1d8   :  { %8087 = vmatprep.subr.bf16.mxu1 %v8870_v62  ;;  %8095 = vmatprep.subr.bf16.mxu0 %v8871_v63  ;;  %v8915_v62 = vld [vmem:[%s11594_s2 + $0x68] sm:$0xff]   ;;  %v8916_v63 = vld [vmem:[%s11594_s2 + $0x1a0] sm:$0xff]  }
 0x1da   :  { %1987 = vmatmul.mubr.bf16.vlgmr.msra.gmra.mxu0 %v1315_v3  ;;  %v8921_v3 = vld [vmem:[%s11594_s2 + $0x20] sm:$0xff]  }
 0x1db   :  { %8088 = vmatpush3.bf16.msra.mxu1 %v8872_v35  ;;  %8096 = vmatpush3.bf16.msra.mxu0 %v8873_v1  ;;  %v8918_v35 = vld [vmem:[%s11594_s2 + $0x1d8] sm:$0xff]   ;;  %v8919_v1 = vld [vmem:[%s11594_s2 + $0x60] sm:$0xff]  }
 0x1dc   :  { %2603 = vmatprep.mubr.bf16.mxu0 %v2009_v7  ;;  %8097 = vmatprep.subr.bf16.mxu0 %v8874_v4  ;;  %v8922_v4 = vld [vmem:[%s11594_s2 + $0x1d0] sm:$0xff]   ;;  %v8925_v7 = vld [vmem:[%s11594_s2 + $0x18] sm:$0xff]  }
 0x1dd   :  { %8117 = vmatprep.subr.bf16.mxu1 %v8875_v6  ;;  %v8924_v6 = vld [vmem:[%s11594_s2 + $0x190] sm:$0xff]  }
 0x1de   :  { %2564 = vmatmul.mubr.bf16.vlgmr.msra.gmra.mxu1 %v2006_v11  ;;  %v8929_v11 = vld [vmem:[%s11594_s2 + $0x10] sm:$0xff]  }
 0x1df   :  { %8098 = vmatpush3.bf16.msra.mxu0 %v8876_v8  ;;  %8118 = vmatpush3.bf16.msra.mxu1 %v8877_v9  ;;  %v8926_v8 = vld [vmem:[%s11594_s2 + $0x1c8] sm:$0xff]   ;;  %v8927_v9 = vld [vmem:[%s11594_s2 + $0x50] sm:$0xff]  }
 0x1e0   :  { %2643 = vmatprep.mubr.bf16.mxu1 %v2011_v15  ;;  %8099 = vmatprep.subr.bf16.mxu0 %v8878_v13  ;;  %v8930_v13 = vld [vmem:[%s11594_s2 + $0x1c0] sm:$0xff]  }
 0x1e1   :  { %8119 = vmatprep.subr.bf16.mxu1 %v8879_v14  ;;  %v8931_v14 = vld [vmem:[%s11594_s2 + $0x48] sm:$0xff]   ;;  %v8932_v15 = vld [vmem:[%s11594_s2 + $0x180] sm:$0xff]  }
 0x1e3   :  { %8100 = vmatpush3.bf16.msra.mxu0 %v8880_v12  ;;  %8120 = vmatpush3.bf16.msra.mxu1 %v8881_v17  ;;  %v8933_v12 = vld [vmem:[%s11594_s2 + $0x8] sm:$0xff]   ;;  %v8934_v17 = vld [vmem:[%s11594_s2 + $0x40] sm:$0xff]  }
 0x1e4   :  { %8101 = vmatprep.subr.bf16.mxu0 %v8882_v18  ;;  %8121 = vmatprep.subr.bf16.mxu1 %v8883_v19  ;;  %v8935_v18 = vld [vmem:[%s11594_s2 + $0xf8] sm:$0xff]   ;;  %v2004_v19 = vld [vmem:[#allocation4 + $0xb0] sm:$0xff] }
 0x1e7   :  { %8102 = vmatpush3.bf16.msra.mxu0 %v8884_v20  ;;  %8122 = vmatpush3.bf16.msra.mxu1 %v8885_v21  ;;  %v8936_v20 = vld [vmem:[%s11594_s2] sm:$0xff]   ;;  %v8937_v21 = vld [vmem:[%s11594_s2 + $0xb8] sm:$0xff]  }
 0x1e8   :  { %8103 = vmatprep.subr.bf16.mxu0 %v8886_v22  ;;  %8123 = vmatprep.subr.bf16.mxu1 %v8887_v23  ;;  %v2698_v22 = vld [vmem:[#allocation4 + $0xd8] sm:$0xff]  ;;  %v2012_v23 = vpack.c.bf16 %v2004_v19, %v2004_v19 }
 0x1e9   :  { %v3423_v19 = vld [vmem:[#allocation3 + $0x4] sm:$0xff] }
 0x1ea   :  { %3427 = vst.msk [vmem:[#allocation4 + $0x8] sm:$0xff] %vm120_vm0, %v3423_v19 }
 0x1eb   :  { %8104 = vmatpush3.bf16.msra.mxu0 %v8888_v26  ;;  %8124 = vmatpush3.bf16.msra.mxu1 %v8889_v27  ;;  %v8939_v26 = vld [vmem:[%s11594_s2 + $0x178] sm:$0xff]   ;;  %v2706_v27 = vpack.c.bf16 %v2698_v22, %v2698_v22 }
 0x1ec   :  { %8105 = vmatprep.subr.bf16.mxu0 %v8890_v28  ;;  %8125 = vmatprep.subr.bf16.mxu1 %v8891_v29  ;;  %v8940_v28 = vld [vmem:[%s11594_s2 + $0xb0] sm:$0xff]   ;;  %v8941_v29 = vld [vmem:[%s11594_s2 + $0x138] sm:$0xff]  }
 0x1ed   :  { %v8985_v22 = vld [vmem:[%s11596_s3 + $0x38] sm:$0xff]  }
 0x1ef   :  { %8106 = vmatpush3.bf16.msra.mxu0 %v8892_v30  ;;  %8126 = vmatpush3.bf16.msra.mxu1 %v8893_v31  ;;  %v2700_v30 = vld [vmem:[#allocation4 + $0xe8] sm:$0xff]  ;;  %v2703_v31 = vpack.c.bf16 %v2695_v25, %v2695_v25  ;;  %v8988_v25 = vld [vmem:[%s11596_s3 + $0x70] sm:$0xff]  }
 0x1f0   :  { %8107 = vmatprep.subr.bf16.mxu0 %v8894_v32  ;;  %8127 = vmatprep.subr.bf16.mxu1 %v8895_v33  ;;  %v8942_v32 = vld [vmem:[%s11594_s2 + $0xe8] sm:$0xff]   ;;  %v8943_v33 = vld [vmem:[%s11594_s2 + $0x170] sm:$0xff]  }
 0x1f3   :  { %8108 = vmatpush3.bf16.msra.mxu0 %v8896_v34  ;;  %8128 = vmatpush3.bf16.msra.mxu1 %v8897_v36  ;;  %v2708_v34 = vpack.c.bf16 %v2700_v30, %v2700_v30  ;;  %v8944_v36 = vld [vmem:[%s11594_s2 + $0xa8] sm:$0xff]  }
 0x1f4   :  { %8109 = vmatprep.subr.bf16.mxu0 %v8898_v37  ;;  %8129 = vmatprep.subr.bf16.mxu1 %v8899_v38  ;;  %v8945_v37 = vld [vmem:[%s11594_s2 + $0x130] sm:$0xff]   ;;  %v8946_v38 = vld [vmem:[%s11594_s2 + $0xe0] sm:$0xff]   ;;  %v8993_v30 = vld [vmem:[%s11596_s3 + $0x28] sm:$0xff]  }
 0x1f7   :  { %8110 = vmatpush3.bf16.msra.mxu0 %v8900_v39  ;;  %8130 = vmatpush3.bf16.msra.mxu1 %v8901_v40  ;;  %v8947_v39 = vld [vmem:[%s11594_s2 + $0x168] sm:$0xff]   ;;  %v8948_v40 = vld [vmem:[%s11594_s2 + $0xa0] sm:$0xff]  }
 0x1f8   :  { %8131 = vmatprep.subr.bf16.mxu1 %v8902_v41  ;;  %8139 = vmatprep.subr.bf16.mxu0 %v8903_v42  ;;  %v8949_v41 = vld [vmem:[%s11594_s2 + $0x128] sm:$0xff]   ;;  %v8950_v42 = vld [vmem:[%s11594_s2 + $0xd8] sm:$0xff]  }
 0x1fa   :  { %2604 = vmatmul.mubr.bf16.vlgmr.msra.gmra.mxu0 %v2008_v47  ;;  %v8955_v47 = vld [vmem:[%s11594_s2 + $0x158] sm:$0xff]  }
 0x1fb   :  { %8132 = vmatpush3.bf16.msra.mxu1 %v8904_v44  ;;  %8140 = vmatpush3.bf16.msra.mxu0 %v8905_v45  ;;  %v8952_v44 = vld [vmem:[%s11594_s2 + $0x98] sm:$0xff]   ;;  %v8953_v45 = vld [vmem:[%s11594_s2 + $0x120] sm:$0xff]  }
 0x1fc   :  { %2683 = vmatprep.mubr.bf16.mxu0 %v2013_v51  ;;  %8141 = vmatprep.subr.bf16.mxu0 %v8906_v48  ;;  %v8956_v48 = vld [vmem:[%s11594_s2 + $0x90] sm:$0xff]  }
 0x1fd   :  { %8161 = vmatprep.subr.bf16.mxu1 %v8907_v50  ;;  %v8958_v50 = vld [vmem:[%s11594_s2 + $0xc8] sm:$0xff]   ;;  %v8959_v51 = vld [vmem:[%s11594_s2 + $0x150] sm:$0xff]  }
 0x1fe   :  { %2644 = vmatmul.mubr.bf16.vlgmr.msra.gmra.mxu1 %v2010_v55  ;;  %v8963_v55 = vld [vmem:[%s11594_s2 + $0x148] sm:$0xff]  }
 0x1ff   :  { %8142 = vmatpush3.bf16.msra.mxu0 %v8908_v52  ;;  %8162 = vmatpush3.bf16.msra.mxu1 %v8909_v53  ;;  %v8960_v52 = vld [vmem:[%s11594_s2 + $0x88] sm:$0xff]   ;;  %v8961_v53 = vld [vmem:[%s11594_s2 + $0x110] sm:$0xff]  }
 0x200   :  { %3260 = vmatprep.mubr.bf16.mxu1 %v2704_v58  ;;  %8143 = vmatprep.subr.bf16.mxu0 %v8910_v56  ;;  %v8964_v56 = vld [vmem:[%s11594_s2 + $0x80] sm:$0xff]  }
 0x201   :  { %8163 = vmatprep.subr.bf16.mxu1 %v8911_v57  ;;  %v8965_v57 = vld [vmem:[%s11594_s2 + $0x108] sm:$0xff]   ;;  %v8966_v58 = vld [vmem:[%s11594_s2 + $0x140] sm:$0xff]  }
 0x203   :  { %8144 = vmatpush3.bf16.msra.mxu0 %v8912_v59  ;;  %8164 = vmatpush3.bf16.msra.mxu1 %v8913_v60  ;;  %v8967_v59 = vld [vmem:[%s11594_s2 + $0x1f8] sm:$0xff]   ;;  %v2697_v60 = vld [vmem:[#allocation4 + $0xd0] sm:$0xff] }
 0x204   :  { %8145 = vmatprep.subr.bf16.mxu0 %v8914_v61  ;;  %8165 = vmatprep.subr.bf16.mxu1 %v8915_v62  ;;  %v2702_v61 = vld [vmem:[#allocation4 + $0xf8] sm:$0xff]  ;;  %v8968_v62 = vld [vmem:[%s11594_s2 + $0x100] sm:$0xff]  }
 0x207   :  { %8146 = vmatpush3.bf16.msra.mxu0 %v8916_v63  ;;  %8166 = vmatpush3.bf16.msra.mxu1 %v8917_v0  ;;  %v8969_v63 = vld [vmem:[%s11594_s2 + $0x1b8] sm:$0xff]   ;;  %v2705_v0 = vpack.c.bf16 %v2697_v60, %v2697_v60  ;;  %v8998_v60 = vld [vmem:[%s11596_s3 + $0xe0] sm:$0xff]  }
 0x208   :  { %8147 = vmatprep.subr.bf16.mxu0 %v8918_v35  ;;  %8167 = vmatprep.subr.bf16.mxu1 %v8919_v1  ;;  %v8970_v35 = vld [vmem:[%s11594_s2 + $0x1f0] sm:$0xff]   ;;  %v2710_v1 = vpack.c.bf16 %v2702_v61, %v2702_v61 }
 0x20b   :  { %8148 = vmatpush3.bf16.msra.mxu0 %v8920_v2  ;;  %8168 = vmatpush3.bf16.msra.mxu1 %v8921_v3  ;;  %v2699_v2 = vld [vmem:[#allocation4 + $0xe0] sm:$0xff] }
 0x20c   :  { %8149 = vmatprep.subr.bf16.mxu0 %v8922_v4  ;;  %8169 = vmatprep.subr.bf16.mxu1 %v8923_v5  ;;  %v8971_v4 = vld [vmem:[%s11594_s2 + $0x1b0] sm:$0xff]  }
 0x20f   :  { %8150 = vmatpush3.bf16.msra.mxu0 %v8924_v6  ;;  %8170 = vmatpush3.bf16.msra.mxu1 %v8925_v7  ;;  %v2707_v6 = vpack.c.bf16 %v2699_v2, %v2699_v2  ;;  %v8972_v7 = vld [vmem:[%s11594_s2 + $0x1e8] sm:$0xff]   ;;  %v9005_v2 = vld [vmem:[%s11596_s3 + $0x10] sm:$0xff]  }
 0x210   :  { %8151 = vmatprep.subr.bf16.mxu0 %v8926_v8  ;;  %8171 = vmatprep.subr.bf16.mxu1 %v8927_v9 }
 0x213   :  { %8152 = vmatpush3.bf16.msra.mxu0 %v8928_v10  ;;  %8172 = vmatpush3.bf16.msra.mxu1 %v8929_v11  ;;  %v8973_v10 = vld [vmem:[%s11594_s2 + $0x1a8] sm:$0xff]  }
 0x214   :  { %8153 = vmatprep.subr.bf16.mxu0 %v8930_v13  ;;  %8173 = vmatprep.subr.bf16.mxu1 %v8931_v14  ;;  %v8974_v14 = vld [vmem:[%s11594_s2 + $0x1e0] sm:$0xff]  }
 0x217   :  { %8154 = vmatpush3.bf16.msra.mxu0 %v8932_v15  ;;  %8174 = vmatpush3.bf16.msra.mxu1 %v8933_v12  ;;  %v8975_v12 = vld [vmem:[%s11594_s2 + $0x1a0] sm:$0xff]  }
 0x218   :  { %8175 = vmatprep.subr.bf16.mxu1 %v8934_v17  ;;  %8183 = vmatprep.subr.bf16.mxu0 %v8935_v18  ;;  %v8976_v18 = vld [vmem:[%s11594_s2 + $0x1d8] sm:$0xff]  }
 0x21a   :  { %2684 = vmatmul.mubr.bf16.vlgmr.msra.gmra.mxu0 %v2012_v23  ;;  %v8977_v23 = vld [vmem:[%s11594_s2 + $0x198] sm:$0xff]  }
 0x21b   :  { %8176 = vmatpush3.bf16.msra.mxu1 %v8936_v20  ;;  %8184 = vmatpush3.bf16.msra.mxu0 %v8937_v21  ;;  %v3391_v20 = vld [vmem:[#allocation3] sm:$0xff]  ;;  %v8984_v21 = vld [vmem:[%s11596_s3 + $0x78] sm:$0xff]  }
 0x21c   :  { %3300 = vmatprep.mubr.bf16.mxu0 %v2706_v27  ;;  %8185 = vmatprep.subr.bf16.mxu0 %v8938_v24  ;;  %3395 = vst.msk [vmem:[#allocation4] sm:$0xff] %vm120_vm0, %v3391_v20  ;;  %v8978_v24 = vld [vmem:[%s11594_s2 + $0x1d0] sm:$0xff]   ;;  %v9010_v20 = vld [vmem:[%s11596_s3 + $0xc8] sm:$0xff]  }
 0x21d   :  { %8205 = vmatprep.subr.bf16.mxu1 %v8939_v26  ;;  %v8989_v26 = vld [vmem:[%s11596_s3 + $0x30] sm:$0xff]  }
 0x21e   :  { %3261 = vmatmul.mubr.bf16.vlgmr.msra.gmra.mxu1 %v2703_v31  ;;  %v8979_v27 = vld [vmem:[%s11594_s2 + $0x190] sm:$0xff]   ;;  %v8981_v31 = vld [vmem:[%s11594_s2 + $0x188] sm:$0xff]  }
 0x21f   :  { %8186 = vmatpush3.bf16.msra.mxu0 %v8940_v28  ;;  %8206 = vmatpush3.bf16.msra.mxu1 %v8941_v29  ;;  %v8980_v28 = vld [vmem:[%s11594_s2 + $0x1c8] sm:$0xff]  }
 0x220   :  { %3340 = vmatprep.mubr.bf16.mxu1 %v2708_v34  ;;  %8187 = vmatprep.subr.bf16.mxu0 %v8942_v32  ;;  %v8992_v29 = vld [vmem:[%s11596_s3 + $0x68] sm:$0xff]   ;;  %v8982_v32 = vld [vmem:[%s11594_s2 + $0x1c0] sm:$0xff]  }
 0x221   :  { %8207 = vmatprep.subr.bf16.mxu1 %v8943_v33  ;;  %v8983_v33 = vld [vmem:[%s11594_s2 + $0x180] sm:$0xff]  }
 0x222   :  { %v8996_v34 = vld [vmem:[%s11596_s3 + $0x60] sm:$0xff]  }
 0x223   :  { %8188 = vmatpush3.bf16.msra.mxu0 %v8944_v36  ;;  %8208 = vmatpush3.bf16.msra.mxu1 %v8945_v37  ;;  %v8997_v36 = vld [vmem:[%s11596_s3 + $0x20] sm:$0xff]  }
 0x224   :  { %8189 = vmatprep.subr.bf16.mxu0 %v8946_v38  ;;  %8209 = vmatprep.subr.bf16.mxu1 %v8947_v39  ;;  %v2701_v37 = vld [vmem:[#allocation4 + $0xf0] sm:$0xff]  ;;  %v8986_v39 = vld [vmem:[%s11596_s3 + $0xf8] sm:$0xff]  }
 0x225   :  { %v10441_v38 = vld [vmem:[%s11595_s5 + $0x1] ss:$0 sm:$0xff] }
 0x227   :  { %8190 = vmatpush3.bf16.msra.mxu0 %v8948_v40  ;;  %8210 = vmatpush3.bf16.msra.mxu1 %v8949_v41  ;;  %v8987_v40 = vld [vmem:[%s11596_s3 + $0xb8] sm:$0xff]  }
 0x228   :  { %8191 = vmatprep.subr.bf16.mxu0 %v8950_v42  ;;  %8211 = vmatprep.subr.bf16.mxu1 %v8951_v43  ;;  %v9000_v41 = vld [vmem:[%s11596_s3 + $0x58] sm:$0xff]   ;;  %v2709_v42 = vpack.c.bf16 %v2701_v37, %v2701_v37  ;;  %v9019_v37 = vld [vmem:[%s11596_s3 + $0x130] sm:$0xff]  }
 0x229   :  { %v9001_v43 = vld [vmem:[%s11596_s3 + $0x18] sm:$0xff]  }
 0x22b   :  { %8192 = vmatpush3.bf16.msra.mxu0 %v8952_v44  ;;  %8212 = vmatpush3.bf16.msra.mxu1 %v8953_v45  ;;  %v8990_v45 = vld [vmem:[%s11596_s3 + $0xf0] sm:$0xff]  }
 0x22c   :  { %8193 = vmatprep.subr.bf16.mxu0 %v8954_v46  ;;  %8213 = vmatprep.subr.bf16.mxu1 %v8955_v47 }
 0x22f   :  { %8194 = vmatpush3.bf16.msra.mxu0 %v8956_v48  ;;  %8214 = vmatpush3.bf16.msra.mxu1 %v8957_v49  ;;  %v3440_v46 = vpop.permute.xlu0 %3439  ;;  %v1172_v48 = vadd.f32 %v9957_v16, %v10441_v38 }
 0x230   :  { %8195 = vmatprep.subr.bf16.mxu0 %v8958_v50  ;;  %8215 = vmatprep.subr.bf16.mxu1 %v8959_v51  ;;  %v3408_v47 = vpop.permute.xlu1 %3407  ;;  %3451 = vst.msk [vmem:[#allocation4 + $0x8] sm:$0xff] %vm360_vm2, %v3440_v46  ;;  %v8991_v50 = vld [vmem:[%s11596_s3 + $0xb0] sm:$0xff]  }
 0x231   :  { %3419 = vst.msk [vmem:[#allocation4] sm:$0xff] %vm360_vm2, %v3408_v47 }
 0x233   :  { %8196 = vmatpush3.bf16.msra.mxu0 %v8960_v52  ;;  %8216 = vmatpush3.bf16.msra.mxu1 %v8961_v53  ;;  %v8994_v52 = vld [vmem:[%s11596_s3 + $0xe8] sm:$0xff]   ;;  %v9004_v53 = vld [vmem:[%s11596_s3 + $0x50] sm:$0xff]  }
 0x234   :  { %8197 = vmatprep.subr.bf16.mxu0 %v8962_v54  ;;  %8217 = vmatprep.subr.bf16.mxu1 %v8963_v55 }
 0x237   :  { %8198 = vmatpush3.bf16.msra.mxu0 %v8964_v56  ;;  %8218 = vmatpush3.bf16.msra.mxu1 %v8965_v57  ;;  %v8995_v57 = vld [vmem:[%s11596_s3 + $0xa8] sm:$0xff]  }
 0x238   :  { %8219 = vmatprep.subr.bf16.mxu1 %v8966_v58  ;;  %8227 = vmatprep.subr.bf16.mxu0 %v8967_v59 }
 0x23a   :  { %3301 = vmatmul.mubr.bf16.vlgmr.msra.gmra.mxu0 %v2705_v0  ;;  %v10365_v3 = vpop.f32.mrf.mxu0 }
 0x23b   :  { %8220 = vmatpush3.bf16.msra.mxu1 %v8968_v62  ;;  %8228 = vmatpush3.bf16.msra.mxu0 %v8969_v63 }
 0x23c   :  { %v10370_v5 = vpop.f32.mrf.mxu0  ;;  %8229 = vmatprep.subr.bf16.mxu0 %v8970_v35  ;;  %3380 = vmatprep.mubr.bf16.mxu0 %v2710_v1  ;;  %v8999_v1 = vld [vmem:[%s11596_s3 + $0xa0] sm:$0xff]  }
 0x23d   :  { %8249 = vmatprep.subr.bf16.mxu1 %v8984_v21  ;;  %v7937_v44 = vadd.f32 %v10370_v5, %v10365_v3  ;;  %v9008_v5 = vld [vmem:[%s11596_s3 + $0x48] sm:$0xff]  }
 0x23e   :  { %3341 = vmatmul.mubr.bf16.vlgmr.msra.gmra.mxu1 %v2707_v6  ;;  %v7938_v8 = vpop.f32.mrf.mxu0  ;;  %v10375_v9 = vpop.f32.mrf.mxu1  ;;  %v9009_v6 = vld [vmem:[%s11596_s3 + $0x8] sm:$0xff]  }
 0x23f   :  { %8230 = vmatpush3.bf16.msra.mxu0 %v8971_v4  ;;  %8250 = vmatpush3.bf16.msra.mxu1 %v8985_v22  ;;  %v1212_v54 = vadd.f32 %v7937_v44, %v1172_v48  ;;  %v9002_v4 = vld [vmem:[%s11596_s3 + $0xd8] sm:$0xff]   ;;  %v9012_v8 = vld [vmem:[%s11596_s3 + $0x40] sm:$0xff]   ;;  %v9011_v22 = vld [vmem:[%s11596_s3 + $0x88] sm:$0xff]  }
 0x240   :  { %v7939_v11 = vpop.f32.mrf.mxu0  ;;  %v10380_v13 = vpop.f32.mrf.mxu1  ;;  %8231 = vmatprep.subr.bf16.mxu0 %v8972_v7  ;;  %8251 = vmatprep.subr.bf16.mxu1 %v8988_v25  ;;  %v9003_v7 = vld [vmem:[%s11596_s3 + $0x98] sm:$0xff]  }
 0x241   :  { %v7959_v49 = vadd.f32 %v10380_v13, %v10375_v9  ;;  %v3648_v9 = vld [vmem:[#allocation4 + $0x8] sm:$0xff]  ;;  %v9013_v11 = vld [vmem:[%s11596_s3] sm:$0xff]  }
 0x242   :  { %v7960_v15 = vpop.f32.mrf.mxu1  ;;  %v3656_v13 = vpack.c.bf16 %v3648_v9, %v3648_v9 }
 0x243   :  { %8232 = vmatpush3.bf16.msra.mxu0 %v8973_v10  ;;  %8252 = vmatpush3.bf16.msra.mxu1 %v8989_v26  ;;  %v1252_v55 = vadd.f32 %v7959_v49, %v1212_v54  ;;  %v9006_v10 = vld [vmem:[%s11596_s3 + $0xd0] sm:$0xff]   ;;  %v9025_v49 = vld [vmem:[%s11596_s3 + $0x118] sm:$0xff]  }
 0x244   :  { %v7961_v17 = vpop.f32.mrf.mxu1  ;;  %8233 = vmatprep.subr.bf16.mxu0 %v8974_v14  ;;  %8253 = vmatprep.subr.bf16.mxu1 %v8992_v29  ;;  %v3647_v14 = vld [vmem:[#allocation4] sm:$0xff] }
 0x245   :  { %4212 = vmatprep.mubr.bf16.mxu1 %v3656_v13  ;;  %v3655_v21 = vpack.c.bf16 %v3647_v14, %v3647_v14  ;;  %v9032_v14 = vld [vmem:[%s11596_s3 + $0x1f8] sm:$0xff]  }
 0x247   :  { %8234 = vmatpush3.bf16.msra.mxu0 %v8975_v12  ;;  %8254 = vmatpush3.bf16.msra.mxu1 %v8993_v30 }
 0x248   :  { %8235 = vmatprep.subr.bf16.mxu0 %v8976_v18  ;;  %8255 = vmatprep.subr.bf16.mxu1 %v8996_v34  ;;  %v9007_v18 = vld [vmem:[%s11596_s3 + $0x90] sm:$0xff]   ;;  %v9017_v34 = vld [vmem:[%s11596_s3 + $0x138] sm:$0xff]  }
 0x24b   :  { %8236 = vmatpush3.bf16.msra.mxu0 %v8977_v23  ;;  %8256 = vmatpush3.bf16.msra.mxu1 %v8997_v36  ;;  %v9014_v23 = vld [vmem:[%s11596_s3 + $0xc0] sm:$0xff]   ;;  %v9018_v36 = vld [vmem:[%s11596_s3 + $0x170] sm:$0xff]  }
 0x24c   :  { %8237 = vmatprep.subr.bf16.mxu0 %v8978_v24  ;;  %8257 = vmatprep.subr.bf16.mxu1 %v9000_v41  ;;  %v9015_v24 = vld [vmem:[%s11596_s3 + $0x80] sm:$0xff]  }
 0x24d   :  { %v9022_v41 = vld [vmem:[%s11596_s3 + $0x160] sm:$0xff]  }
 0x24f   :  { %8238 = vmatpush3.bf16.msra.mxu0 %v8979_v27  ;;  %8258 = vmatpush3.bf16.msra.mxu1 %v9001_v43  ;;  %v9024_v43 = vld [vmem:[%s11596_s3 + $0x158] sm:$0xff]  }
 0x250   :  { %8239 = vmatprep.subr.bf16.mxu0 %v8980_v28  ;;  %8259 = vmatprep.subr.bf16.mxu1 %v9004_v53 }
 0x253   :  { %8240 = vmatpush3.bf16.msra.mxu0 %v8981_v31  ;;  %8260 = vmatpush3.bf16.msra.mxu1 %v9005_v2 }
 0x254   :  { %8241 = vmatprep.subr.bf16.mxu0 %v8982_v32  ;;  %8261 = vmatprep.subr.bf16.mxu1 %v9008_v5 }
 0x257   :  { %8242 = vmatpush3.bf16.msra.mxu0 %v8983_v33  ;;  %8262 = vmatpush3.bf16.msra.mxu1 %v9009_v6  ;;  %v9016_v33 = vld [vmem:[%s11596_s3 + $0x178] sm:$0xff]  }
 0x258   :  { %8271 = vmatprep.subr.bf16.mxu0 %v8986_v39  ;;  %8263 = vmatprep.subr.bf16.mxu1 %v9012_v8  ;;  %v9020_v39 = vld [vmem:[%s11596_s3 + $0x168] sm:$0xff]  }
 0x25a   :  { %v7979_v51 = vpop.f32.mrf.mxu0  ;;  %3381 = vmatmul.mubr.bf16.vlgmr.msra.gmra.mxu0 %v2709_v42  ;;  %v9023_v42 = vld [vmem:[%s11596_s3 + $0x120] sm:$0xff]  }
 0x25b   :  { %8272 = vmatpush3.bf16.msra.mxu0 %v8987_v40  ;;  %8264 = vmatpush3.bf16.msra.mxu1 %v9013_v11  ;;  %v9021_v40 = vld [vmem:[%s11596_s3 + $0x128] sm:$0xff]  }
 0x25c   :  { %v7980_v16 = vpop.f32.mrf.mxu0  ;;  %8273 = vmatprep.subr.bf16.mxu0 %v8990_v45  ;;  %8293 = vmatprep.subr.bf16.mxu1 %v9016_v33 }
 0x25d   :  { %v7981_v56 = vadd.f32 %v7980_v16, %v7979_v51 }
 0x25e   :  { %v7982_v58 = vpop.f32.mrf.mxu0  ;;  %v10478_v59 = vpop.f32.mrf.mxu1  ;;  %4213 = vmatmul.mubr.bf16.vlgmr.msra.gmra.mxu1 %v3655_v21 }
 0x25f   :  { %v1292_v61 = vadd.f32 %v7981_v56, %v1252_v55  ;;  %8274 = vmatpush3.bf16.msra.mxu0 %v8991_v50  ;;  %8294 = vmatpush3.bf16.msra.mxu1 %v9017_v34 }
 0x260   :  { %v7983_v62 = vpop.f32.mrf.mxu0  ;;  %v10483_v63 = vpop.f32.mrf.mxu1  ;;  %8275 = vmatprep.subr.bf16.mxu0 %v8994_v52  ;;  %8295 = vmatprep.subr.bf16.mxu1 %v9018_v36 }
 0x261   :  { %v1297_v0 = vmax.f32 %v1292_v61, 0.0  ;;  %v8003_v44 = vadd.f32 %v10483_v63, %v10478_v59  ;;  %v9027_v61 = vld [vmem:[%s11596_s3 + $0x110] sm:$0xff]   ;;  %v9028_v62 = vld [vmem:[%s11596_s3 + $0x148] sm:$0xff]  }
 0x262   :  { %v8004_v35 = vpop.f32.mrf.mxu1 }
 0x263   :  { %1299 = vst.msk [vmem:[#allocation3 + $0x12] sm:$0xff] %vm120_vm0, %v1297_v0  ;;  %8276 = vmatpush3.bf16.msra.mxu0 %v8995_v57  ;;  %8296 = vmatpush3.bf16.msra.mxu1 %v9019_v37  ;;  %v1869_v46 = vadd.f32 %v8003_v44, %v10441_v38  ;;  %v9029_v0 = vld [vmem:[%s11596_s3 + $0x108] sm:$0xff]   ;;  %v9030_v35 = vld [vmem:[%s11596_s3 + $0x140] sm:$0xff]   ;;  %v9034_v44 = vld [vmem:[%s11596_s3 + $0x1f0] sm:$0xff]  }
 0x264   :  { %v8005_v3 = vpop.f32.mrf.mxu1  ;;  %8277 = vmatprep.subr.bf16.mxu0 %v8998_v60  ;;  %8297 = vmatprep.subr.bf16.mxu1 %v9020_v39  ;;  %v9026_v60 = vld [vmem:[%s11596_s3 + $0x150] sm:$0xff]   ;;  %v9033_v39 = vld [vmem:[%s11596_s3 + $0x1b8] sm:$0xff]  }
 0x267   :  { %8278 = vmatpush3.bf16.msra.mxu0 %v8999_v1  ;;  %8298 = vmatpush3.bf16.msra.mxu1 %v9021_v40  ;;  %v9031_v1 = vld [vmem:[%s11596_s3 + $0x100] sm:$0xff]  }
 0x268   :  { %8279 = vmatprep.subr.bf16.mxu0 %v9002_v4  ;;  %8299 = vmatprep.subr.bf16.mxu1 %v9022_v41 }
 0x26a   :  { %v10513_v15 = vld [vmem:[#allocation3 + $0x16] sm:$0xff] }
 0x26b   :  { %v10515_v12 = vld [vmem:[#allocation3 + $0x12] sm:$0xff]  ;;  %3503 = vrot.lane.b32.xlu0 %v10513_v15, %s9308_s0  ;;  %8280 = vmatpush3.bf16.msra.mxu0 %v9003_v7 }
 0x26c   :  { %v3487_v17 = vld [vmem:[#allocation3 + $0x14] sm:$0xff]  ;;  %3471 = vrot.lane.b32.xlu1 %v10515_v12, %s9308_s0  ;;  %8281 = vmatprep.subr.bf16.mxu0 %v9006_v10 }
 0x26d   :  { %3491 = vst.msk [vmem:[#allocation4 + $0x18] sm:$0xff] %vm120_vm0, %v3487_v17  ;;  %v3455_v19 = vld [vmem:[#allocation3 + $0x10] sm:$0xff]  ;;  %3428 = vst.msk [vmem:[#allocation4 + $0x48] sm:$0xff] %vm120_vm0, %v3487_v17  ;;  %8300 = vmatpush3.bf16.msra.mxu1 %v9023_v42 }
 0x26e   :  { %3459 = vst.msk [vmem:[#allocation4 + $0x10] sm:$0xff] %vm120_vm0, %v3455_v19  ;;  %3396 = vst.msk [vmem:[#allocation4 + $0x40] sm:$0xff] %vm120_vm0, %v3455_v19  ;;  %8301 = vmatprep.subr.bf16.mxu1 %v9024_v43 }
 0x26f   :  { %8282 = vmatpush3.bf16.msra.mxu0 %v9007_v18  ;;  %v9035_v18 = vld [vmem:[%s11596_s3 + $0x78] sm:$0xff]  }
 0x270   :  { %8283 = vmatprep.subr.bf16.mxu0 %v9010_v20 }
 0x271   :  { %8302 = vmatpush3.bf16.msra.mxu1 %v9025_v49 }
 0x272   :  { %8303 = vmatprep.subr.bf16.mxu1 %v9026_v60  ;;  %v9056_v60 = vld [vmem:[%s11596_s3 + $0x188] sm:$0xff]  }
 0x273   :  { %8284 = vmatpush3.bf16.msra.mxu0 %v9011_v22 }
 0x274   :  { %8285 = vmatprep.subr.bf16.mxu0 %v9014_v23 }
 0x275   :  { %8304 = vmatpush3.bf16.msra.mxu1 %v9027_v61  ;;  %v9058_v61 = vld [vmem:[%s11596_s3 + $0x1c0] sm:$0xff]  }
 0x276   :  { %8305 = vmatprep.subr.bf16.mxu1 %v9028_v62 }
 0x277   :  { %8286 = vmatpush3.bf16.msra.mxu0 %v9015_v24 }
 0x278   :  { %8315 = vmatprep.subr.bf16.mxu0 %v9032_v14 }
 0x279   :  { %8306 = vmatpush3.bf16.msra.mxu1 %v9029_v0 }
 0x27a   :  { %v8023_v25 = vpop.f32.mrf.mxu0  ;;  %8307 = vmatprep.subr.bf16.mxu1 %v9030_v35  ;;  %v9060_v35 = vld [vmem:[%s11596_s3 + $0x180] sm:$0xff]  }
 0x27c   :  { %v8024_v26 = vpop.f32.mrf.mxu0 }
 0x27d   :  { %v8025_v45 = vadd.f32 %v8024_v26, %v8023_v25  ;;  %8308 = vmatpush3.bf16.msra.mxu1 %v9031_v1  ;;  %v9063_v1 = vld [vmem:[%s11596_s3 + $0xf8] sm:$0xff]  }
 0x27e   :  { %v8026_v27 = vpop.f32.mrf.mxu0  ;;  %v8045_v28 = vpop.f32.mrf.mxu1  ;;  %8337 = vmatprep.subr.bf16.mxu1 %v9035_v18 }
 0x27f   :  { %v1909_v50 = vadd.f32 %v8025_v45, %v1869_v46  ;;  %v9036_v45 = vld [vmem:[%s11596_s3 + $0x1b0] sm:$0xff]  }
 0x280   :  { %v8027_v29 = vpop.f32.mrf.mxu0  ;;  %v8046_v30 = vpop.f32.mrf.mxu1 }
 0x281   :  { %v8047_v47 = vadd.f32 %v8046_v30, %v8045_v28 }
 0x282   :  { %v8048_v31 = vpop.f32.mrf.mxu1 }
 0x283   :  { %v1949_v52 = vadd.f32 %v8047_v47, %v1909_v50  ;;  %v9038_v50 = vld [vmem:[%s11596_s3 + $0x1e8] sm:$0xff]  }
 0x284   :  { %v8049_v32 = vpop.f32.mrf.mxu1 }
 0x29a   :  { %v8067_v48 = vpop.f32.mrf.mxu0 }
 0x29c   :  { %v8068_v51 = vpop.f32.mrf.mxu0 }
 0x29d   :  { %v8069_v53 = vadd.f32 %v8068_v51, %v8067_v48  ;;  %v9040_v51 = vld [vmem:[%s11596_s3 + $0x1a8] sm:$0xff]  }
 0x29e   :  { %v8070_v54 = vpop.f32.mrf.mxu0  ;;  %v8089_v16 = vpop.f32.mrf.mxu1 }
 0x29f   :  { %v1989_v55 = vadd.f32 %v8069_v53, %v1949_v52  ;;  %v9042_v52 = vld [vmem:[%s11596_s3 + $0x1e0] sm:$0xff]   ;;  %v9050_v54 = vld [vmem:[%s11596_s3 + $0x1d0] sm:$0xff]  }
 0x2a0   :  { %v8071_v56 = vpop.f32.mrf.mxu0  ;;  %v8090_v57 = vpop.f32.mrf.mxu1  ;;  %v9044_v53 = vld [vmem:[%s11596_s3 + $0x1a0] sm:$0xff]  }
 0x2a1   :  { %v1994_v58 = vmax.f32 %v1989_v55, 0.0  ;;  %v8091_v19 = vadd.f32 %v8090_v57, %v8089_v16  ;;  %v9052_v55 = vld [vmem:[%s11596_s3 + $0x190] sm:$0xff]   ;;  %v9054_v56 = vld [vmem:[%s11596_s3 + $0x1c8] sm:$0xff]  }
 0x2a2   :  { %v8092_v59 = vpop.f32.mrf.mxu1 }
 0x2a3   :  { %1996 = vst.msk [vmem:[#allocation3 + $0x22] sm:$0xff] %vm120_vm0, %v1994_v58  ;;  %v2566_v21 = vadd.f32 %v8091_v19, %v10441_v38 }
 0x2a4   :  { %v8093_v63 = vpop.f32.mrf.mxu1 }
 0x2aa   :  { %v10592_v2 = vld [vmem:[#allocation3 + $0x26] sm:$0xff] }
 0x2ab   :  { %v10594_v3 = vld [vmem:[#allocation3 + $0x22] sm:$0xff]  ;;  %3567 = vrot.lane.b32.xlu0 %v10592_v2, %s9308_s0 }
 0x2ac   :  { %v3551_v4 = vld [vmem:[#allocation3 + $0x24] sm:$0xff]  ;;  %3535 = vrot.lane.b32.xlu1 %v10594_v3, %s9308_s0 }
 0x2ad   :  { %3555 = vst.msk [vmem:[#allocation4 + $0x28] sm:$0xff] %vm120_vm0, %v3551_v4  ;;  %v3519_v5 = vld [vmem:[#allocation3 + $0x20] sm:$0xff]  ;;  %3492 = vst.msk [vmem:[#allocation4 + $0x58] sm:$0xff] %vm120_vm0, %v3551_v4 }
 0x2ae   :  { %3429 = vst.msk [vmem:[#allocation4 + $0x88] sm:$0xff] %vm120_vm0, %v3551_v4  ;;  %3523 = vst.msk [vmem:[#allocation4 + $0x20] sm:$0xff] %vm120_vm0, %v3519_v5 }
 0x2af   :  { %3460 = vst.msk [vmem:[#allocation4 + $0x50] sm:$0xff] %vm120_vm0, %v3519_v5  ;;  %3397 = vst.msk [vmem:[#allocation4 + $0x80] sm:$0xff] %vm120_vm0, %v3519_v5 }
 0x2ba   :  { %v8111_v6 = vpop.f32.mrf.mxu0 }
 0x2bc   :  { %v8112_v7 = vpop.f32.mrf.mxu0 }
 0x2bd   :  { %v8113_v20 = vadd.f32 %v8112_v7, %v8111_v6  ;;  %v9306_v7 = vld [vmem:[%s11595_s5 + $0x1] ss:$0 sm:$0xff] }
 0x2be   :  { %v8114_v8 = vpop.f32.mrf.mxu0  ;;  %v8133_v9 = vpop.f32.mrf.mxu1 }
 0x2bf   :  { %v2606_v24 = vadd.f32 %v8113_v20, %v2566_v21 }
 0x2c0   :  { %v8115_v10 = vpop.f32.mrf.mxu0  ;;  %v8134_v11 = vpop.f32.mrf.mxu1 }
 0x2c1   :  { %v8135_v22 = vadd.f32 %v8134_v11, %v8133_v9 }
 0x2c2   :  { %v8136_v13 = vpop.f32.mrf.mxu1 }
 0x2c3   :  { %v2646_v26 = vadd.f32 %v8135_v22, %v2606_v24 }
 0x2c4   :  { %v8137_v17 = vpop.f32.mrf.mxu1 }
 0x2da   :  { %v8155_v23 = vpop.f32.mrf.mxu0 }
 0x2dc   :  { %v8156_v25 = vpop.f32.mrf.mxu0 }
 0x2dd   :  { %v8157_v27 = vadd.f32 %v8156_v25, %v8155_v23  ;;  %v3504_v28 = vpop.permute.xlu0 %3503 }
 0x2de   :  { %v3472_v29 = vpop.permute.xlu1 %3471  ;;  %3515 = vst.msk [vmem:[#allocation4 + $0x18] sm:$0xff] %vm360_vm2, %v3504_v28  ;;  %v8158_v30 = vpop.f32.mrf.mxu0  ;;  %v9037_v28 = vld [vmem:[%s11596_s3 + $0x38] sm:$0xff]  }
 0x2df   :  { %3483 = vst.msk [vmem:[#allocation4 + $0x10] sm:$0xff] %vm360_vm2, %v3472_v29  ;;  %v10615_v31 = vpop.f32.mrf.mxu1  ;;  %v2686_v32 = vadd.f32 %v8157_v27, %v2646_v26  ;;  %v9039_v29 = vld [vmem:[%s11596_s3 + $0x70] sm:$0xff]  }
 0x2e0   :  { %v8159_v33 = vpop.f32.mrf.mxu0  ;;  %v9041_v30 = vld [vmem:[%s11596_s3 + $0x30] sm:$0xff]  }
 0x2e1   :  { %v10617_v34 = vpop.f32.mrf.mxu1  ;;  %v2691_v38 = vmax.f32 %v2686_v32, 0.0 }
 0x2e2   :  { %v8179_v5 = vadd.f32 %v10617_v34, %v10615_v31 }
 0x2e3   :  { %v8180_v36 = vpop.f32.mrf.mxu1  ;;  %2693 = vst.msk [vmem:[#allocation3 + $0x32] sm:$0xff] %vm120_vm0, %v2691_v38  ;;  %v9043_v38 = vld [vmem:[%s11596_s3 + $0x68] sm:$0xff]  }
 0x2e4   :  { %v3263_v8 = vadd.f32 %v9306_v7, %v8179_v5  ;;  %v9045_v36 = vld [vmem:[%s11596_s3 + $0x28] sm:$0xff]  }
 0x2e5   :  { %v8181_v37 = vpop.f32.mrf.mxu1  ;;  %v3650_v40 = vld [vmem:[#allocation4 + $0x18] sm:$0xff] }
 0x2e6   :  { %v3649_v41 = vld [vmem:[#allocation4 + $0x10] sm:$0xff]  ;;  %v3658_v42 = vpack.c.bf16 %v3650_v40, %v3650_v40  ;;  %v3617_v37 = vld [vmem:[#allocation3 + $0x54] sm:$0xff] }
 0x2e7   :  { %v3657_v43 = vpack.c.bf16 %v3649_v41, %v3649_v41  ;;  %v9047_v40 = vld [vmem:[%s11596_s3 + $0x60] sm:$0xff]   ;;  %3621 = vst.msk [vmem:[#allocation4 + $0xb8] sm:$0xff] %vm120_vm0, %v3617_v37  ;;  %3558 = vst.msk [vmem:[#allocation4 + $0xe8] sm:$0xff] %vm120_vm0, %v3617_v37  ;;  %v9088_v37 = vld [vmem:[%s11596_s3 + $0x88] sm:$0xff]  }
 0x2e8   :  { %4252 = vmatprep.mubr.bf16.mxu0 %v3658_v42 }
 0x2e9   :  { %4253 = vmatmul.mubr.bf16.vlgmr.msra.gmra.mxu0 %v3657_v43  ;;  %v9051_v43 = vld [vmem:[%s11596_s3 + $0x58] sm:$0xff]  }
 0x2ea   :  { %v10629_v46 = vld [vmem:[#allocation3 + $0x36] sm:$0xff]  ;;  %8316 = vmatpush3.bf16.msra.mxu0 %v9033_v39 }
 0x2eb   :  { %v10631_v47 = vld [vmem:[#allocation3 + $0x32] sm:$0xff]  ;;  %3631 = vrot.lane.b32.xlu0 %v10629_v46, %s9308_s0  ;;  %8317 = vmatprep.subr.bf16.mxu0 %v9034_v44 }
 0x2ec   :  { %v3615_v48 = vld [vmem:[#allocation3 + $0x34] sm:$0xff]  ;;  %3599 = vrot.lane.b32.xlu1 %v10631_v47, %s9308_s0 }
 0x2ed   :  { %3619 = vst.msk [vmem:[#allocation4 + $0x38] sm:$0xff] %vm120_vm0, %v3615_v48  ;;  %v3583_v49 = vld [vmem:[#allocation3 + $0x30] sm:$0xff]  ;;  %3556 = vst.msk [vmem:[#allocation4 + $0x68] sm:$0xff] %vm120_vm0, %v3615_v48 }
 0x2ee   :  { %3493 = vst.msk [vmem:[#allocation4 + $0x98] sm:$0xff] %vm120_vm0, %v3615_v48  ;;  %3430 = vst.msk [vmem:[#allocation4 + $0xc8] sm:$0xff] %vm120_vm0, %v3615_v48  ;;  %8318 = vmatpush3.bf16.msra.mxu0 %v9036_v45  ;;  %v3585_v39 = vld [vmem:[#allocation3 + $0x50] sm:$0xff]  ;;  %v9053_v45 = vld [vmem:[%s11596_s3 + $0x18] sm:$0xff]  }
 0x2ef   :  { %3587 = vst.msk [vmem:[#allocation4 + $0x30] sm:$0xff] %vm120_vm0, %v3583_v49  ;;  %3524 = vst.msk [vmem:[#allocation4 + $0x60] sm:$0xff] %vm120_vm0, %v3583_v49  ;;  %3441 = vrot.lane.b32.xlu0 %v10513_v15, %s9308_s0  ;;  %8319 = vmatprep.subr.bf16.mxu0 %v9038_v50  ;;  %v9046_v15 = vld [vmem:[%s11596_s3 + $0x1d8] sm:$0xff]  }
 0x2f0   :  { %3461 = vst.msk [vmem:[#allocation4 + $0x90] sm:$0xff] %vm120_vm0, %v3583_v49  ;;  %3398 = vst.msk [vmem:[#allocation4 + $0xc0] sm:$0xff] %vm120_vm0, %v3583_v49  ;;  %3409 = vrot.lane.b32.xlu1 %v10515_v12, %s9308_s0  ;;  %v9048_v12 = vld [vmem:[%s11596_s3 + $0x198] sm:$0xff]  }
 0x2f1   :  { %3589 = vst.msk [vmem:[#allocation4 + $0xb0] sm:$0xff] %vm120_vm0, %v3585_v39  ;;  %3526 = vst.msk [vmem:[#allocation4 + $0xe0] sm:$0xff] %vm120_vm0, %v3585_v39  ;;  %v3625_v49 = vld [vmem:[#allocation3 + $0x56] sm:$0xff] }
 0x2f2   :  { %8320 = vmatpush3.bf16.msra.mxu0 %v9040_v51  ;;  %v3593_v50 = vld [vmem:[#allocation3 + $0x52] sm:$0xff] }
 0x2f3   :  { %3505 = vrot.lane.b32.xlu0 %v10592_v2, %s9308_s0  ;;  %8321 = vmatprep.subr.bf16.mxu0 %v9042_v52  ;;  %v9055_v51 = vld [vmem:[%s11596_s3 + $0x50] sm:$0xff]  }
 0x2f4   :  { %3473 = vrot.lane.b32.xlu1 %v10594_v3, %s9308_s0  ;;  %v9057_v52 = vld [vmem:[%s11596_s3 + $0x10] sm:$0xff]  }
 0x2f5   :  { %v9089_v39 = vld [vmem:[%s11596_s3 + $0x110] sm:$0xff]  }
 0x2f6   :  { %8322 = vmatpush3.bf16.msra.mxu0 %v9044_v53  ;;  %v9059_v53 = vld [vmem:[%s11596_s3 + $0x48] sm:$0xff]  }
 0x2f7   :  { %3569 = vrot.lane.b32.xlu0 %v10629_v46, %s9308_s0  ;;  %8323 = vmatprep.subr.bf16.mxu0 %v9046_v15  ;;  %v9061_v15 = vld [vmem:[%s11596_s3 + $0x8] sm:$0xff]  }
 0x2f8   :  { %3537 = vrot.lane.b32.xlu1 %v10631_v47, %s9308_s0 }
 0x2fa   :  { %v8199_v16 = vpop.f32.mrf.mxu0  ;;  %8324 = vmatpush3.bf16.msra.mxu0 %v9048_v12  ;;  %v9062_v12 = vld [vmem:[%s11596_s3 + $0x40] sm:$0xff]  }
 0x2fb   :  { %8325 = vmatprep.subr.bf16.mxu0 %v9050_v54  ;;  %v9064_v54 = vld [vmem:[%s11596_s3] sm:$0xff]  }
 0x2fc   :  { %v8200_v57 = vpop.f32.mrf.mxu0 }
 0x2fd   :  { %v8201_v6 = vadd.f32 %v8200_v57, %v8199_v16  ;;  %v3594_v16 = vld [vmem:[#allocation3 + $0x62] sm:$0xff] }
 0x2fe   :  { %v8202_v58 = vpop.f32.mrf.mxu0  ;;  %v8221_v59 = vpop.f32.mrf.mxu1  ;;  %8326 = vmatpush3.bf16.msra.mxu0 %v9052_v55 }
 0x2ff   :  { %8327 = vmatprep.subr.bf16.mxu0 %v9054_v56  ;;  %v3303_v11 = vadd.f32 %v8201_v6, %v3263_v8 }
 0x300   :  { %v8203_v62 = vpop.f32.mrf.mxu0  ;;  %v8222_v63 = vpop.f32.mrf.mxu1 }
 0x301   :  { %v8223_v9 = vadd.f32 %v8222_v63, %v8221_v59 }
 0x302   :  { %v8224_v0 = vpop.f32.mrf.mxu1  ;;  %8328 = vmatpush3.bf16.msra.mxu0 %v9056_v60 }
 0x303   :  { %8329 = vmatprep.subr.bf16.mxu0 %v9058_v61  ;;  %v3343_v14 = vadd.f32 %v8223_v9, %v3303_v11  ;;  %v9069_v11 = vld [vmem:[%s11596_s3 + $0x138] sm:$0xff]  }
 0x304   :  { %v8225_v4 = vpop.f32.mrf.mxu1 }
 0x306   :  { %8330 = vmatpush3.bf16.msra.mxu0 %v9060_v35  ;;  %v9065_v35 = vld [vmem:[%s11596_s3 + $0xb8] sm:$0xff]  }
 0x307   :  { %8359 = vmatprep.subr.bf16.mxu0 %v9063_v1  ;;  %v9066_v1 = vld [vmem:[%s11596_s3 + $0xf0] sm:$0xff]  }
 0x31a   :  { %v8243_v10 = vpop.f32.mrf.mxu0 }
 0x31c   :  { %v8244_v13 = vpop.f32.mrf.mxu0 }
 0x31d   :  { %v8245_v17 = vadd.f32 %v8244_v13, %v8243_v10  ;;  %v3568_v18 = vpop.permute.xlu0 %3567  ;;  %v9068_v10 = vld [vmem:[%s11596_s3 + $0xb0] sm:$0xff]   ;;  %v9070_v13 = vld [vmem:[%s11596_s3 + $0xe8] sm:$0xff]  }
 0x31e   :  { %v3536_v19 = vpop.permute.xlu1 %3535  ;;  %3579 = vst.msk [vmem:[#allocation4 + $0x28] sm:$0xff] %vm360_vm2, %v3568_v18  ;;  %v8246_v20 = vpop.f32.mrf.mxu0 }
 0x31f   :  { %3547 = vst.msk [vmem:[#allocation4 + $0x20] sm:$0xff] %vm360_vm2, %v3536_v19  ;;  %v3383_v21 = vadd.f32 %v8245_v17, %v3343_v14  ;;  %v8265_v41 = vpop.f32.mrf.mxu1  ;;  %v9071_v14 = vld [vmem:[%s11596_s3 + $0x170] sm:$0xff]   ;;  %v9072_v19 = vld [vmem:[%s11596_s3 + $0xa8] sm:$0xff]  }
 0x320   :  { %v8247_v22 = vpop.f32.mrf.mxu0  ;;  %v9073_v20 = vld [vmem:[%s11596_s3 + $0x130] sm:$0xff]  }
 0x321   :  { %v3388_v23 = vmax.f32 %v3383_v21, 0.0  ;;  %v9074_v21 = vld [vmem:[%s11596_s3 + $0xe0] sm:$0xff]   ;;  %v9075_v22 = vld [vmem:[%s11596_s3 + $0x168] sm:$0xff]  }
 0x323   :  { %3390 = vst.msk [vmem:[#allocation3 + $0x42] sm:$0xff] %vm120_vm0, %v3388_v23 }
 0x325   :  { %v3652_v24 = vld [vmem:[#allocation4 + $0x28] sm:$0xff] }
 0x326   :  { %v3651_v25 = vld [vmem:[#allocation4 + $0x20] sm:$0xff]  ;;  %v3660_v26 = vpack.c.bf16 %v3652_v24, %v3652_v24 }
 0x327   :  { %v3659_v27 = vpack.c.bf16 %v3651_v25, %v3651_v25  ;;  %v9076_v25 = vld [vmem:[%s11596_s3 + $0xa0] sm:$0xff]  }
 0x328   :  { %4292 = vmatprep.mubr.bf16.mxu1 %v3660_v26  ;;  %v9077_v26 = vld [vmem:[%s11596_s3 + $0x128] sm:$0xff]  }
 0x329   :  { %4293 = vmatmul.mubr.bf16.vlgmr.msra.gmra.mxu1 %v3659_v27  ;;  %v9078_v27 = vld [vmem:[%s11596_s3 + $0xd8] sm:$0xff]  }
 0x32a   :  { %v3624_v31 = vld [vmem:[#allocation3 + $0x46] sm:$0xff]  ;;  %8338 = vmatpush3.bf16.msra.mxu1 %v9037_v28 }
 0x32b   :  { %v3592_v32 = vld [vmem:[#allocation3 + $0x42] sm:$0xff]  ;;  %3633 = vrot.lane.b32.xlu0 %v3624_v31, %s9308_s0  ;;  %8339 = vmatprep.subr.bf16.mxu1 %v9039_v29  ;;  %v9080_v29 = vld [vmem:[%s11596_s3 + $0x98] sm:$0xff]  }
 0x32c   :  { %v3616_v33 = vld [vmem:[#allocation3 + $0x44] sm:$0xff]  ;;  %3601 = vrot.lane.b32.xlu1 %v3592_v32, %s9308_s0 }
 0x32d   :  { %3620 = vst.msk [vmem:[#allocation4 + $0x78] sm:$0xff] %vm120_vm0, %v3616_v33  ;;  %v3584_v34 = vld [vmem:[#allocation3 + $0x40] sm:$0xff]  ;;  %3557 = vst.msk [vmem:[#allocation4 + $0xa8] sm:$0xff] %vm120_vm0, %v3616_v33 }
 0x32e   :  { %3494 = vst.msk [vmem:[#allocation4 + $0xd8] sm:$0xff] %vm120_vm0, %v3616_v33  ;;  %3588 = vst.msk [vmem:[#allocation4 + $0x70] sm:$0xff] %vm120_vm0, %v3584_v34  ;;  %8340 = vmatpush3.bf16.msra.mxu1 %v9041_v30  ;;  %v9079_v28 = vld [vmem:[%s11596_s3 + $0x160] sm:$0xff]   ;;  %v9084_v33 = vld [vmem:[%s11596_s3 + $0x90] sm:$0xff]  }
 0x32f   :  { %3525 = vst.msk [vmem:[#allocation4 + $0xa0] sm:$0xff] %vm120_vm0, %v3584_v34  ;;  %3462 = vst.msk [vmem:[#allocation4 + $0xd0] sm:$0xff] %vm120_vm0, %v3584_v34  ;;  %3443 = vrot.lane.b32.xlu0 %v10592_v2, %s9308_s0  ;;  %8341 = vmatprep.subr.bf16.mxu1 %v9043_v38  ;;  %v9049_v2 = vld [vmem:[%s11596_s3 + $0x20] sm:$0xff]   ;;  %v9085_v34 = vld [vmem:[%s11596_s3 + $0x118] sm:$0xff]  }
 0x330   :  { %3411 = vrot.lane.b32.xlu1 %v10594_v3, %s9308_s0  ;;  %v8266_v3 = vpop.f32.mrf.mxu1  ;;  %v9081_v30 = vld [vmem:[%s11596_s3 + $0x120] sm:$0xff]   ;;  %v9086_v38 = vld [vmem:[%s11596_s3 + $0xc8] sm:$0xff]  }
 0x331   :  { %v10745_v42 = vadd.f32 %v8266_v3, %v8265_v41  ;;  %v9091_v41 = vld [vmem:[%s11596_s3 + $0x148] sm:$0xff]  }
 0x332   :  { %8342 = vmatpush3.bf16.msra.mxu1 %v9045_v36  ;;  %v8268_v44 = vpop.f32.mrf.mxu1  ;;  %v9087_v36 = vld [vmem:[%s11596_s3 + $0x150] sm:$0xff]   ;;  %v9093_v3 = vld [vmem:[%s11596_s3 + $0x108] sm:$0xff]  }
 0x333   :  { %3507 = vrot.lane.b32.xlu0 %v10629_v46, %s9308_s0  ;;  %8343 = vmatprep.subr.bf16.mxu1 %v9047_v40  ;;  %v9090_v40 = vld [vmem:[%s11596_s3 + $0xc0] sm:$0xff]   ;;  %v9095_v44 = vld [vmem:[%s11596_s3 + $0x1f8] sm:$0xff]  }
 0x334   :  { %3475 = vrot.lane.b32.xlu1 %v10631_v47, %s9308_s0  ;;  %v8269_v48 = vpop.f32.mrf.mxu1 }
 0x335   :  { %v9096_v48 = vld [vmem:[%s11596_s3 + $0x100] sm:$0xff]  }
 0x336   :  { %8344 = vmatpush3.bf16.msra.mxu1 %v9049_v2  ;;  %v9092_v2 = vld [vmem:[%s11596_s3 + $0x80] sm:$0xff]  }
 0x337   :  { %3571 = vrot.lane.b32.xlu0 %v3624_v31, %s9308_s0  ;;  %8345 = vmatprep.subr.bf16.mxu1 %v9051_v43  ;;  %v9094_v43 = vld [vmem:[%s11596_s3 + $0x140] sm:$0xff]  }
 0x338   :  { %3539 = vrot.lane.b32.xlu1 %v3592_v32, %s9308_s0 }
 0x33a   :  { %8346 = vmatpush3.bf16.msra.mxu1 %v9053_v45 }
 0x33b   :  { %3635 = vrot.lane.b32.xlu0 %v3625_v49, %s9308_s0  ;;  %8347 = vmatprep.subr.bf16.mxu1 %v9055_v51  ;;  %v9098_v51 = vld [vmem:[%s11596_s3 + $0x1f0] sm:$0xff]  }
 0x33c   :  { %3603 = vrot.lane.b32.xlu1 %v3593_v50, %s9308_s0 }
 0x33e   :  { %8348 = vmatpush3.bf16.msra.mxu1 %v9057_v52  ;;  %v9099_v52 = vld [vmem:[%s11596_s3 + $0x78] sm:$0xff]  }
 0x33f   :  { %3445 = vrot.lane.b32.xlu0 %v10629_v46, %s9308_s0  ;;  %8349 = vmatprep.subr.bf16.mxu1 %v9059_v53  ;;  %v9067_v46 = vld [vmem:[%s11596_s3 + $0x178] sm:$0xff]  }
 0x340   :  { %3413 = vrot.lane.b32.xlu1 %v10631_v47, %s9308_s0  ;;  %v3626_v47 = vld [vmem:[#allocation3 + $0x66] sm:$0xff] }
 0x342   :  { %8350 = vmatpush3.bf16.msra.mxu1 %v9061_v15  ;;  %v9100_v15 = vld [vmem:[%s11596_s3 + $0x1b0] sm:$0xff]  }
 0x343   :  { %3509 = vrot.lane.b32.xlu0 %v3624_v31, %s9308_s0  ;;  %8351 = vmatprep.subr.bf16.mxu1 %v9062_v12  ;;  %v9082_v31 = vld [vmem:[%s11596_s3 + $0xd0] sm:$0xff]   ;;  %v9101_v12 = vld [vmem:[%s11596_s3 + $0x38] sm:$0xff]  }
 0x344   :  { %3477 = vrot.lane.b32.xlu1 %v3592_v32, %s9308_s0  ;;  %v9083_v32 = vld [vmem:[%s11596_s3 + $0x158] sm:$0xff]  }
 0x346   :  { %8352 = vmatpush3.bf16.msra.mxu1 %v9064_v54 }
 0x347   :  { %8381 = vmatprep.subr.bf16.mxu1 %v9067_v46  ;;  %3573 = vrot.lane.b32.xlu0 %v3625_v49, %s9308_s0  ;;  %v9097_v49 = vld [vmem:[%s11596_s3 + $0x1b8] sm:$0xff]   ;;  %v9102_v46 = vld [vmem:[%s11596_s3 + $0x1e8] sm:$0xff]  }
 0x348   :  { %3541 = vrot.lane.b32.xlu1 %v3593_v50, %s9308_s0 }
 0x34b   :  { %3637 = vrot.lane.b32.xlu0 %v3626_v47, %s9308_s0  ;;  %v9103_v47 = vld [vmem:[%s11596_s3 + $0x70] sm:$0xff]  }
 0x34c   :  { %3605 = vrot.lane.b32.xlu1 %v3594_v16, %s9308_s0  ;;  %v9104_v16 = vld [vmem:[%s11596_s3 + $0x1a8] sm:$0xff]  }
 0x35d   :  { %v3632_v55 = vpop.permute.xlu0 %3631 }
 0x35e   :  { %v3600_v56 = vpop.permute.xlu1 %3599  ;;  %3643 = vst.msk [vmem:[#allocation4 + $0x38] sm:$0xff] %vm360_vm2, %v3632_v55  ;;  %v9105_v55 = vld [vmem:[%s11596_s3 + $0x30] sm:$0xff]  }
 0x35f   :  { %3611 = vst.msk [vmem:[#allocation4 + $0x30] sm:$0xff] %vm360_vm2, %v3600_v56  ;;  %v9106_v56 = vld [vmem:[%s11596_s3 + $0x1e0] sm:$0xff]  }
 0x361   :  { %v3442_v57 = vpop.permute.xlu0 %3441 }
 0x362   :  { %v3410_v58 = vpop.permute.xlu1 %3409  ;;  %3452 = vst.msk [vmem:[#allocation4 + $0x48] sm:$0xff] %vm360_vm2, %v3442_v57  ;;  %v9107_v57 = vld [vmem:[%s11596_s3 + $0x68] sm:$0xff]  }
 0x363   :  { %3420 = vst.msk [vmem:[#allocation4 + $0x40] sm:$0xff] %vm360_vm2, %v3410_v58  ;;  %v9108_v58 = vld [vmem:[%s11596_s3 + $0x1a0] sm:$0xff]  }
 0x365   :  { %v3506_v59 = vpop.permute.xlu0 %3505  ;;  %v3654_v61 = vld [vmem:[#allocation4 + $0x38] sm:$0xff] }
 0x366   :  { %v3474_v60 = vpop.permute.xlu1 %3473  ;;  %v3653_v62 = vld [vmem:[#allocation4 + $0x30] sm:$0xff]  ;;  %3516 = vst.msk [vmem:[#allocation4 + $0x58] sm:$0xff] %vm360_vm2, %v3506_v59  ;;  %v3662_v63 = vpack.c.bf16 %v3654_v61, %v3654_v61  ;;  %v9109_v59 = vld [vmem:[%s11596_s3 + $0x28] sm:$0xff]  }
 0x367   :  { %3484 = vst.msk [vmem:[#allocation4 + $0x50] sm:$0xff] %vm360_vm2, %v3474_v60  ;;  %v3661_v0 = vpack.c.bf16 %v3653_v62, %v3653_v62  ;;  %v9110_v60 = vld [vmem:[%s11596_s3 + $0x1d8] sm:$0xff]   ;;  %v9111_v61 = vld [vmem:[%s11596_s3 + $0x60] sm:$0xff]  }
 0x368   :  { %4332 = vmatprep.mubr.bf16.mxu0 %v3662_v63  ;;  %v9112_v62 = vld [vmem:[%s11596_s3 + $0x198] sm:$0xff]   ;;  %v9113_v63 = vld [vmem:[%s11596_s3 + $0x20] sm:$0xff]  }
 0x369   :  { %4333 = vmatmul.mubr.bf16.vlgmr.msra.gmra.mxu0 %v3661_v0  ;;  %v3570_v4 = vpop.permute.xlu0 %3569  ;;  %v4372_v6 = vld [vmem:[#allocation4 + $0x48] sm:$0xff]  ;;  %v9114_v0 = vld [vmem:[%s11596_s3 + $0x1d0] sm:$0xff]  }
 0x36a   :  { %v3538_v5 = vpop.permute.xlu1 %3537  ;;  %v4371_v7 = vld [vmem:[#allocation4 + $0x40] sm:$0xff]  ;;  %8360 = vmatpush3.bf16.msra.mxu0 %v9065_v35  ;;  %3580 = vst.msk [vmem:[#allocation4 + $0x68] sm:$0xff] %vm360_vm2, %v3570_v4  ;;  %v4380_v8 = vpack.c.bf16 %v4372_v6, %v4372_v6  ;;  %v9115_v35 = vld [vmem:[%s11596_s3 + $0x58] sm:$0xff]   ;;  %v9118_v6 = vld [vmem:[%s11596_s3 + $0x1c8] sm:$0xff]  }
 0x36b   :  { %3548 = vst.msk [vmem:[#allocation4 + $0x60] sm:$0xff] %vm360_vm2, %v3538_v5  ;;  %v4379_v9 = vpack.c.bf16 %v4371_v7, %v4371_v7  ;;  %8361 = vmatprep.subr.bf16.mxu0 %v9066_v1  ;;  %v9116_v1 = vld [vmem:[%s11596_s3 + $0x18] sm:$0xff]   ;;  %v9117_v4 = vld [vmem:[%s11596_s3 + $0x190] sm:$0xff]   ;;  %v3618_v5 = vld [vmem:[#allocation3 + $0x64] sm:$0xff] }
 0x36c   :  { %4936 = vmatprep.mubr.bf16.mxu1 %v4380_v8  ;;  %v9119_v7 = vld [vmem:[%s11596_s3 + $0x50] sm:$0xff]   ;;  %3622 = vst.msk [vmem:[#allocation4 + $0xf8] sm:$0xff] %vm120_vm0, %v3618_v5 }
 0x36d   :  { %4937 = vmatmul.mubr.bf16.vlgmr.msra.gmra.mxu1 %v4379_v9  ;;  %v4374_v17 = vld [vmem:[#allocation4 + $0x58] sm:$0xff]  ;;  %v9146_v5 = vld [vmem:[%s11596_s3 + $0xd0] sm:$0xff]  }
 0x36e   :  { %8362 = vmatpush3.bf16.msra.mxu0 %v9068_v10  ;;  %8382 = vmatpush3.bf16.msra.mxu1 %v9069_v11  ;;  %v4382_v18 = vpack.c.bf16 %v4374_v17, %v4374_v17  ;;  %v4373_v45 = vld [vmem:[#allocation4 + $0x50] sm:$0xff]  ;;  %v9120_v10 = vld [vmem:[%s11596_s3 + $0x188] sm:$0xff]   ;;  %v9121_v11 = vld [vmem:[%s11596_s3 + $0x10] sm:$0xff]  }
 0x36f   :  { %8363 = vmatprep.subr.bf16.mxu0 %v9070_v13  ;;  %8383 = vmatprep.subr.bf16.mxu1 %v9071_v14  ;;  %v4381_v50 = vpack.c.bf16 %v4373_v45, %v4373_v45  ;;  %v3586_v13 = vld [vmem:[#allocation3 + $0x60] sm:$0xff]  ;;  %v9123_v17 = vld [vmem:[%s11596_s3 + $0x48] sm:$0xff]  }
 0x370   :  { %4976 = vmatprep.mubr.bf16.mxu0 %v4382_v18  ;;  %v9122_v14 = vld [vmem:[%s11596_s3 + $0x1c0] sm:$0xff]   ;;  %3590 = vst.msk [vmem:[#allocation4 + $0xf0] sm:$0xff] %vm120_vm0, %v3586_v13  ;;  %v9151_v13 = vld [vmem:[%s11596_s3 + $0x150] sm:$0xff]  }
 0x371   :  { %v4376_v23 = vld [vmem:[#allocation4 + $0x68] sm:$0xff] }
 0x372   :  { %8364 = vmatpush3.bf16.msra.mxu0 %v9072_v19  ;;  %8384 = vmatpush3.bf16.msra.mxu1 %v9073_v20  ;;  %v4384_v24 = vpack.c.bf16 %v4376_v23, %v4376_v23  ;;  %v4375_v53 = vld [vmem:[#allocation4 + $0x60] sm:$0xff]  ;;  %v9124_v20 = vld [vmem:[%s11596_s3 + $0x180] sm:$0xff]   ;;  %v9127_v23 = vld [vmem:[%s11596_s3 + $0xf8] sm:$0xff]  }
 0x373   :  { %8365 = vmatprep.subr.bf16.mxu0 %v9074_v21  ;;  %8385 = vmatprep.subr.bf16.mxu1 %v9075_v22  ;;  %v4383_v54 = vpack.c.bf16 %v4375_v53, %v4375_v53  ;;  %v9125_v21 = vld [vmem:[%s11596_s3 + $0x8] sm:$0xff]   ;;  %v9126_v22 = vld [vmem:[%s11596_s3 + $0x40] sm:$0xff]  }
 0x374   :  { %5016 = vmatprep.mubr.bf16.mxu1 %v4384_v24 }
 0x376   :  { %8366 = vmatpush3.bf16.msra.mxu0 %v9076_v25  ;;  %8386 = vmatpush3.bf16.msra.mxu1 %v9077_v26 }
 0x377   :  { %8367 = vmatprep.subr.bf16.mxu0 %v9078_v27  ;;  %8387 = vmatprep.subr.bf16.mxu1 %v9079_v28 }
 0x37a   :  { %8368 = vmatpush3.bf16.msra.mxu0 %v9080_v29  ;;  %8388 = vmatpush3.bf16.msra.mxu1 %v9081_v30  ;;  %v9128_v30 = vld [vmem:[%s11596_s3] sm:$0xff]  }
 0x37b   :  { %8369 = vmatprep.subr.bf16.mxu0 %v9082_v31  ;;  %8389 = vmatprep.subr.bf16.mxu1 %v9083_v32  ;;  %v9129_v31 = vld [vmem:[%s11596_s3 + $0xb8] sm:$0xff]   ;;  %v7560_v32 = vld [vmem:[%s11595_s5 + $0x2] ss:$0 sm:$0xff] }
 0x37e   :  { %8370 = vmatpush3.bf16.msra.mxu0 %v9084_v33  ;;  %8390 = vmatpush3.bf16.msra.mxu1 %v9085_v34  ;;  %v9130_v33 = vld [vmem:[%s11596_s3 + $0xf0] sm:$0xff]   ;;  %v9131_v34 = vld [vmem:[%s11596_s3 + $0x178] sm:$0xff]  }
 0x37f   :  { %8371 = vmatprep.subr.bf16.mxu0 %v9086_v38  ;;  %8391 = vmatprep.subr.bf16.mxu1 %v9087_v36 }
 0x382   :  { %8372 = vmatpush3.bf16.msra.mxu0 %v9088_v37  ;;  %8392 = vmatpush3.bf16.msra.mxu1 %v9089_v39 }
 0x383   :  { %8373 = vmatprep.subr.bf16.mxu0 %v9090_v40  ;;  %8393 = vmatprep.subr.bf16.mxu1 %v9091_v41  ;;  %v4215_v40 = vadd.f32 %v10745_v42, %v7560_v32  ;;  %v9134_v42 = vld [vmem:[%s11596_s3 + $0xe8] sm:$0xff]   ;;  %v9163_v32 = vld [vmem:[%s11596_s3 + $0x78] sm:$0xff]  }
 0x386   :  { %8374 = vmatpush3.bf16.msra.mxu0 %v9092_v2  ;;  %8394 = vmatpush3.bf16.msra.mxu1 %v9093_v3  ;;  %v9132_v3 = vld [vmem:[%s11596_s3 + $0xb0] sm:$0xff]  }
 0x387   :  { %8395 = vmatprep.subr.bf16.mxu1 %v9094_v43  ;;  %8403 = vmatprep.subr.bf16.mxu0 %v9095_v44  ;;  %v9133_v44 = vld [vmem:[%s11596_s3 + $0x138] sm:$0xff]  }
 0x389   :  { %4977 = vmatmul.mubr.bf16.vlgmr.msra.gmra.mxu0 %v4381_v50 }
 0x38a   :  { %8396 = vmatpush3.bf16.msra.mxu1 %v9096_v48  ;;  %8404 = vmatpush3.bf16.msra.mxu0 %v9097_v49  ;;  %v9135_v48 = vld [vmem:[%s11596_s3 + $0x170] sm:$0xff]  }
 0x38b   :  { %8405 = vmatprep.subr.bf16.mxu0 %v9098_v51  ;;  %8425 = vmatprep.subr.bf16.mxu1 %v9099_v52 }
 0x38d   :  { %5017 = vmatmul.mubr.bf16.vlgmr.msra.gmra.mxu1 %v4383_v54  ;;  %v9136_v54 = vld [vmem:[%s11596_s3 + $0xa8] sm:$0xff]  }
 0x38e   :  { %8406 = vmatpush3.bf16.msra.mxu0 %v9100_v15  ;;  %8426 = vmatpush3.bf16.msra.mxu1 %v9101_v12 }
 0x38f   :  { %8407 = vmatprep.subr.bf16.mxu0 %v9102_v46  ;;  %8427 = vmatprep.subr.bf16.mxu1 %v9103_v47  ;;  %v9137_v46 = vld [vmem:[%s11596_s3 + $0x130] sm:$0xff]  }
 0x392   :  { %8408 = vmatpush3.bf16.msra.mxu0 %v9104_v16  ;;  %8428 = vmatpush3.bf16.msra.mxu1 %v9105_v55  ;;  %v9138_v16 = vld [vmem:[%s11596_s3 + $0xe0] sm:$0xff]   ;;  %v9139_v55 = vld [vmem:[%s11596_s3 + $0x168] sm:$0xff]  }
 0x393   :  { %8409 = vmatprep.subr.bf16.mxu0 %v9106_v56  ;;  %8429 = vmatprep.subr.bf16.mxu1 %v9107_v57 }
 0x396   :  { %8410 = vmatpush3.bf16.msra.mxu0 %v9108_v58  ;;  %8430 = vmatpush3.bf16.msra.mxu1 %v9109_v59 }
 0x397   :  { %8411 = vmatprep.subr.bf16.mxu0 %v9110_v60  ;;  %8431 = vmatprep.subr.bf16.mxu1 %v9111_v61  ;;  %v9140_v60 = vld [vmem:[%s11596_s3 + $0xa0] sm:$0xff]   ;;  %v9141_v61 = vld [vmem:[%s11596_s3 + $0x128] sm:$0xff]  }
 0x39a   :  { %8412 = vmatpush3.bf16.msra.mxu0 %v9112_v62  ;;  %8432 = vmatpush3.bf16.msra.mxu1 %v9113_v63  ;;  %v9142_v62 = vld [vmem:[%s11596_s3 + $0xd8] sm:$0xff]   ;;  %v9143_v63 = vld [vmem:[%s11596_s3 + $0x160] sm:$0xff]  }
 0x39b   :  { %8413 = vmatprep.subr.bf16.mxu0 %v9114_v0  ;;  %8433 = vmatprep.subr.bf16.mxu1 %v9115_v35 }
 0x39d   :  { %v3634_v8 = vpop.permute.xlu0 %3633 }
 0x39e   :  { %v3602_v9 = vpop.permute.xlu1 %3601  ;;  %3644 = vst.msk [vmem:[#allocation4 + $0x78] sm:$0xff] %vm360_vm2, %v3634_v8  ;;  %8434 = vmatpush3.bf16.msra.mxu1 %v9116_v1  ;;  %8414 = vmatpush3.bf16.msra.mxu0 %v9117_v4  ;;  %v9144_v1 = vld [vmem:[%s11596_s3 + $0x98] sm:$0xff]   ;;  %v9145_v4 = vld [vmem:[%s11596_s3 + $0x120] sm:$0xff]   ;;  %v9148_v8 = vld [vmem:[%s11596_s3 + $0x90] sm:$0xff]  }
 0x39f   :  { %3612 = vst.msk [vmem:[#allocation4 + $0x70] sm:$0xff] %vm360_vm2, %v3602_v9  ;;  %8415 = vmatprep.subr.bf16.mxu0 %v9118_v6  ;;  %8435 = vmatprep.subr.bf16.mxu1 %v9119_v7  ;;  %v9147_v6 = vld [vmem:[%s11596_s3 + $0x158] sm:$0xff]  }
 0x3a0   :  { %v9149_v9 = vld [vmem:[%s11596_s3 + $0x118] sm:$0xff]  }
 0x3a1   :  { %v3444_v18 = vpop.permute.xlu0 %3443 }
 0x3a2   :  { %v3412_v19 = vpop.permute.xlu1 %3411  ;;  %8416 = vmatpush3.bf16.msra.mxu0 %v9120_v10  ;;  %8436 = vmatpush3.bf16.msra.mxu1 %v9121_v11  ;;  %3453 = vst.msk [vmem:[#allocation4 + $0x88] sm:$0xff] %vm360_vm2, %v3444_v18  ;;  %v9150_v11 = vld [vmem:[%s11596_s3 + $0xc8] sm:$0xff]   ;;  %v9153_v18 = vld [vmem:[%s11596_s3 + $0x110] sm:$0xff]  }
 0x3a3   :  { %3421 = vst.msk [vmem:[#allocation4 + $0x80] sm:$0xff] %vm360_vm2, %v3412_v19  ;;  %8417 = vmatprep.subr.bf16.mxu0 %v9122_v14  ;;  %8437 = vmatprep.subr.bf16.mxu1 %v9123_v17  ;;  %v9152_v17 = vld [vmem:[%s11596_s3 + $0x88] sm:$0xff]  }
 0x3a5   :  { %v3508_v24 = vpop.permute.xlu0 %3507  ;;  %v4378_v26 = vld [vmem:[#allocation4 + $0x78] sm:$0xff] }
 0x3a6   :  { %v3476_v25 = vpop.permute.xlu1 %3475  ;;  %v4377_v27 = vld [vmem:[#allocation4 + $0x70] sm:$0xff]  ;;  %8418 = vmatpush3.bf16.msra.mxu0 %v9124_v20  ;;  %8438 = vmatpush3.bf16.msra.mxu1 %v9125_v21  ;;  %3517 = vst.msk [vmem:[#allocation4 + $0x98] sm:$0xff] %vm360_vm2, %v3508_v24  ;;  %v4386_v28 = vpack.c.bf16 %v4378_v26, %v4378_v26  ;;  %v9155_v21 = vld [vmem:[%s11596_s3 + $0x148] sm:$0xff]  }
 0x3a7   :  { %3485 = vst.msk [vmem:[#allocation4 + $0x90] sm:$0xff] %vm360_vm2, %v3476_v25  ;;  %v4385_v29 = vpack.c.bf16 %v4377_v27, %v4377_v27  ;;  %8439 = vmatprep.subr.bf16.mxu1 %v9126_v22  ;;  %8447 = vmatprep.subr.bf16.mxu0 %v9127_v23  ;;  %v9154_v20 = vld [vmem:[%s11596_s3 + $0xc0] sm:$0xff]   ;;  %v9157_v23 = vld [vmem:[%s11596_s3 + $0x108] sm:$0xff]   ;;  %v9159_v25 = vld [vmem:[%s11596_s3 + $0x1f8] sm:$0xff]  }
 0x3a8   :  { %5056 = vmatprep.mubr.bf16.mxu0 %v4386_v28  ;;  %v9156_v22 = vld [vmem:[%s11596_s3 + $0x80] sm:$0xff]  }
 0x3a9   :  { %v8287_v38 = vpop.f32.mrf.mxu0  ;;  %5057 = vmatmul.mubr.bf16.vlgmr.msra.gmra.mxu0 %v4385_v29  ;;  %v3572_v36 = vpop.permute.xlu0 %3571  ;;  %v5095_v37 = vld [vmem:[#allocation4 + $0x88] sm:$0xff]  ;;  %v9158_v24 = vld [vmem:[%s11596_s3 + $0x140] sm:$0xff]  }
 0x3aa   :  { %v5094_v39 = vld [vmem:[#allocation4 + $0x80] sm:$0xff]  ;;  %8440 = vmatpush3.bf16.msra.mxu1 %v9128_v30  ;;  %8448 = vmatpush3.bf16.msra.mxu0 %v9129_v31  ;;  %3581 = vst.msk [vmem:[#allocation4 + $0xa8] sm:$0xff] %vm360_vm2, %v3572_v36  ;;  %v3540_v41 = vpop.permute.xlu1 %3539  ;;  %v5103_v2 = vpack.c.bf16 %v5095_v37, %v5095_v37  ;;  %v9160_v28 = vld [vmem:[%s11596_s3 + $0x100] sm:$0xff]   ;;  %v9161_v29 = vld [vmem:[%s11596_s3 + $0x1b8] sm:$0xff]  }
 0x3ab   :  { %v5102_v43 = vpack.c.bf16 %v5094_v39, %v5094_v39  ;;  %3549 = vst.msk [vmem:[#allocation4 + $0xa0] sm:$0xff] %vm360_vm2, %v3540_v41  ;;  %v8288_v45 = vpop.f32.mrf.mxu0  ;;  %8449 = vmatprep.subr.bf16.mxu0 %v9130_v33  ;;  %8469 = vmatprep.subr.bf16.mxu1 %v9131_v34  ;;  %v9162_v31 = vld [vmem:[%s11596_s3 + $0x1f0] sm:$0xff]   ;;  %v9165_v36 = vld [vmem:[%s11596_s3 + $0x38] sm:$0xff]  }
 0x3ac   :  { %v8289_v49 = vadd.f32 %v8288_v45, %v8287_v38  ;;  %5659 = vmatprep.mubr.bf16.mxu1 %v5103_v2  ;;  %v9164_v38 = vld [vmem:[%s11596_s3 + $0x1b0] sm:$0xff]   ;;  %v9171_v45 = vld [vmem:[%s11596_s3 + $0x68] sm:$0xff]  }
 0x3ad   :  { %v8290_v50 = vpop.f32.mrf.mxu0  ;;  %v3636_v51 = vpop.permute.xlu0 %3635  ;;  %5660 = vmatmul.mubr.bf16.vlgmr.msra.gmra.mxu1 %v5102_v43  ;;  %v5097_v52 = vld [vmem:[#allocation4 + $0x98] sm:$0xff]  ;;  %v9167_v41 = vld [vmem:[%s11596_s3 + $0x70] sm:$0xff]  }
 0x3ae   :  { %v11020_v53 = vadd.f32 %v8289_v49, %v4215_v40  ;;  %8450 = vmatpush3.bf16.msra.mxu0 %v9132_v3  ;;  %3645 = vst.msk [vmem:[#allocation4 + $0xb8] sm:$0xff] %vm360_vm2, %v3636_v51  ;;  %v3604_v15 = vpop.permute.xlu1 %3603  ;;  %8470 = vmatpush3.bf16.msra.mxu1 %v9133_v44  ;;  %v5105_v12 = vpack.c.bf16 %v5097_v52, %v5097_v52  ;;  %v5096_v26 = vld [vmem:[#allocation4 + $0x90] sm:$0xff]  ;;  %v9166_v40 = vld [vmem:[%s11596_s3 + $0x1e8] sm:$0xff]   ;;  %v9169_v43 = vld [vmem:[%s11596_s3 + $0x30] sm:$0xff]  }
 0x3af   :  { %3613 = vst.msk [vmem:[#allocation4 + $0xb0] sm:$0xff] %vm360_vm2, %v3604_v15  ;;  %v8291_v47 = vpop.f32.mrf.mxu0  ;;  %8451 = vmatprep.subr.bf16.mxu0 %v9134_v42  ;;  %8471 = vmatprep.subr.bf16.mxu1 %v9135_v48  ;;  %v5104_v30 = vpack.c.bf16 %v5096_v26, %v5096_v26  ;;  %v9168_v3 = vld [vmem:[%s11596_s3 + $0x1a8] sm:$0xff]   ;;  %v9170_v44 = vld [vmem:[%s11596_s3 + $0x1e0] sm:$0xff]   ;;  %v9174_v49 = vld [vmem:[%s11596_s3 + $0x1d8] sm:$0xff]  }
 0x3b0   :  { %5699 = vmatprep.mubr.bf16.mxu0 %v5105_v12  ;;  %v9172_v42 = vld [vmem:[%s11596_s3 + $0x1a0] sm:$0xff]   ;;  %v9173_v48 = vld [vmem:[%s11596_s3 + $0x28] sm:$0xff]   ;;  %v9176_v51 = vld [vmem:[%s11596_s3 + $0x198] sm:$0xff]  }
 0x3b1   :  { %v3446_v56 = vpop.permute.xlu0 %3445  ;;  %v5099_v57 = vld [vmem:[#allocation4 + $0xa8] sm:$0xff]  ;;  %v9175_v50 = vld [vmem:[%s11596_s3 + $0x60] sm:$0xff]   ;;  %v9178_v15 = vld [vmem:[%s11596_s3 + $0x1d0] sm:$0xff]  }
 0x3b2   :  { %8452 = vmatpush3.bf16.msra.mxu0 %v9136_v54  ;;  %3454 = vst.msk [vmem:[#allocation4 + $0xc8] sm:$0xff] %vm360_vm2, %v3446_v56  ;;  %v3414_v58 = vpop.permute.xlu1 %3413  ;;  %8472 = vmatpush3.bf16.msra.mxu1 %v9137_v46  ;;  %v5107_v59 = vpack.c.bf16 %v5099_v57, %v5099_v57  ;;  %v5098_v33 = vld [vmem:[#allocation4 + $0xa0] sm:$0xff]  ;;  %v9177_v52 = vld [vmem:[%s11596_s3 + $0x20] sm:$0xff]   ;;  %v9179_v12 = vld [vmem:[%s11596_s3 + $0x58] sm:$0xff]  }
 0x3b3   :  { %3422 = vst.msk [vmem:[#allocation4 + $0xc0] sm:$0xff] %vm360_vm2, %v3414_v58  ;;  %8453 = vmatprep.subr.bf16.mxu0 %v9138_v16  ;;  %8473 = vmatprep.subr.bf16.mxu1 %v9139_v55  ;;  %v5106_v39 = vpack.c.bf16 %v5098_v33, %v5098_v33  ;;  %v9180_v54 = vld [vmem:[%s11596_s3 + $0x190] sm:$0xff]   ;;  %v9181_v46 = vld [vmem:[%s11596_s3 + $0x18] sm:$0xff]   ;;  %v9182_v47 = vld [vmem:[%s11596_s3 + $0x1c8] sm:$0xff]  }
 0x3b4   :  { %5739 = vmatprep.mubr.bf16.mxu1 %v5107_v59  ;;  %v9183_v16 = vld [vmem:[%s11596_s3 + $0x50] sm:$0xff]   ;;  %v9184_v55 = vld [vmem:[%s11596_s3 + $0x188] sm:$0xff]   ;;  %v9186_v57 = vld [vmem:[%s11596_s3 + $0x1c0] sm:$0xff]  }
 0x3b5   :  { %v3510_v0 = vpop.permute.xlu0 %3509  ;;  %v5101_v27 = vld [vmem:[#allocation4 + $0xb8] sm:$0xff]  ;;  %v9185_v56 = vld [vmem:[%s11596_s3 + $0x10] sm:$0xff]   ;;  %v9188_v59 = vld [vmem:[%s11596_s3 + $0x180] sm:$0xff]  }
 0x3b6   :  { %8454 = vmatpush3.bf16.msra.mxu0 %v9140_v60  ;;  %3518 = vst.msk [vmem:[#allocation4 + $0xd8] sm:$0xff] %vm360_vm2, %v3510_v0  ;;  %v3478_v35 = vpop.permute.xlu1 %3477  ;;  %8474 = vmatpush3.bf16.msra.mxu1 %v9141_v61  ;;  %v5109_v34 = vpack.c.bf16 %v5101_v27, %v5101_v27  ;;  %v9187_v58 = vld [vmem:[%s11596_s3 + $0x48] sm:$0xff]   ;;  %v5100_v61 = vld [vmem:[#allocation4 + $0xb0] sm:$0xff] }
 0x3b7   :  { %3486 = vst.msk [vmem:[#allocation4 + $0xd0] sm:$0xff] %vm360_vm2, %v3478_v35  ;;  %8455 = vmatprep.subr.bf16.mxu0 %v9142_v62  ;;  %8475 = vmatprep.subr.bf16.mxu1 %v9143_v63  ;;  %v9189_v60 = vld [vmem:[%s11596_s3 + $0x8] sm:$0xff]   ;;  %v9190_v62 = vld [vmem:[%s11596_s3 + $0x40] sm:$0xff]   ;;  %v9191_v63 = vld [vmem:[%s11596_s3 + $0xf8] sm:$0xff]   ;;  %v5108_v0 = vpack.c.bf16 %v5100_v61, %v5100_v61 }
 0x3b8   :  { %v9192_v35 = vld [vmem:[%s11596_s3] sm:$0xff]   ;;  %v9234_v61 = vld [vmem:[%s11596_s3 + $0x1d0] sm:$0xff]  }
 0x3b9   :  { %v3574_v7 = vpop.permute.xlu0 %3573  ;;  %v5818_v37 = vld [vmem:[#allocation4 + $0xc8] sm:$0xff]  ;;  %v9202_v27 = vld [vmem:[%s11596_s3 + $0xe0] sm:$0xff]  }
 0x3ba   :  { %8456 = vmatpush3.bf16.msra.mxu0 %v9144_v1  ;;  %8476 = vmatpush3.bf16.msra.mxu1 %v9145_v4  ;;  %3582 = vst.msk [vmem:[#allocation4 + $0xe8] sm:$0xff] %vm360_vm2, %v3574_v7  ;;  %v3542_v10 = vpop.permute.xlu1 %3541  ;;  %v5826_v2 = vpack.c.bf16 %v5818_v37, %v5818_v37  ;;  %v9193_v1 = vld [vmem:[%s11596_s3 + $0xb8] sm:$0xff]   ;;  %v9209_v33 = vld [vmem:[%s11596_s3 + $0x120] sm:$0xff]  }
 0x3bb   :  { %8457 = vmatprep.subr.bf16.mxu0 %v9146_v5  ;;  %8477 = vmatprep.subr.bf16.mxu1 %v9147_v6  ;;  %3550 = vst.msk [vmem:[#allocation4 + $0xe0] sm:$0xff] %vm360_vm2, %v3542_v10  ;;  %v9194_v5 = vld [vmem:[%s11596_s3 + $0xf0] sm:$0xff]   ;;  %v9195_v7 = vld [vmem:[%s11596_s3 + $0x178] sm:$0xff]  }
 0x3bc   :  { %v5817_v6 = vld [vmem:[#allocation4 + $0xc0] sm:$0xff]  ;;  %v9213_v37 = vld [vmem:[%s11596_s3 + $0x118] sm:$0xff]  }
 0x3bd   :  { %v3638_v14 = vpop.permute.xlu0 %3637  ;;  %v5820_v4 = vld [vmem:[#allocation4 + $0xd8] sm:$0xff] }
 0x3be   :  { %8458 = vmatpush3.bf16.msra.mxu0 %v9148_v8  ;;  %8478 = vmatpush3.bf16.msra.mxu1 %v9149_v9  ;;  %3646 = vst.msk [vmem:[#allocation4 + $0xf8] sm:$0xff] %vm360_vm2, %v3638_v14  ;;  %v3606_v19 = vpop.permute.xlu1 %3605  ;;  %v5828_v9 = vpack.c.bf16 %v5820_v4, %v5820_v4 }
 0x3bf   :  { %8459 = vmatprep.subr.bf16.mxu0 %v9150_v11  ;;  %8479 = vmatprep.subr.bf16.mxu1 %v9151_v13  ;;  %3614 = vst.msk [vmem:[#allocation4 + $0xf0] sm:$0xff] %vm360_vm2, %v3606_v19  ;;  %v9196_v11 = vld [vmem:[%s11596_s3 + $0xb0] sm:$0xff]   ;;  %v9197_v13 = vld [vmem:[%s11596_s3 + $0x138] sm:$0xff]  }
 0x3c0   :  { %v9199_v19 = vld [vmem:[%s11596_s3 + $0x170] sm:$0xff]  }
 0x3c1   :  { %v5822_v10 = vld [vmem:[#allocation4 + $0xe8] sm:$0xff] }
 0x3c2   :  { %8460 = vmatpush3.bf16.msra.mxu0 %v9152_v17  ;;  %8480 = vmatpush3.bf16.msra.mxu1 %v9153_v18  ;;  %v5825_v17 = vpack.c.bf16 %v5817_v6, %v5817_v6  ;;  %v9198_v18 = vld [vmem:[%s11596_s3 + $0xe8] sm:$0xff]   ;;  %v9309_v6 = vmov 1983009808  }
 0x3c3   :  { %8461 = vmatprep.subr.bf16.mxu0 %v9154_v20  ;;  %8481 = vmatprep.subr.bf16.mxu1 %v9155_v21  ;;  %v5830_v21 = vpack.c.bf16 %v5822_v10, %v5822_v10 }
 0x3c6   :  { %8462 = vmatpush3.bf16.msra.mxu0 %v9156_v22  ;;  %8482 = vmatpush3.bf16.msra.mxu1 %v9157_v23  ;;  %v5823_v4 = vld [vmem:[#allocation4 + $0xf0] sm:$0xff] }
 0x3c7   :  { %8483 = vmatprep.subr.bf16.mxu1 %v9158_v24  ;;  %8491 = vmatprep.subr.bf16.mxu0 %v9159_v25  ;;  %v9200_v24 = vld [vmem:[%s11596_s3 + $0xa8] sm:$0xff]   ;;  %v9201_v25 = vld [vmem:[%s11596_s3 + $0x130] sm:$0xff]  }
 0x3c9   :  { %5700 = vmatmul.mubr.bf16.vlgmr.msra.gmra.mxu0 %v5104_v30  ;;  %v9206_v30 = vld [vmem:[%s11596_s3 + $0xd8] sm:$0xff]  }
 0x3ca   :  { %8484 = vmatpush3.bf16.msra.mxu1 %v9160_v28  ;;  %8492 = vmatpush3.bf16.msra.mxu0 %v9161_v29  ;;  %v9204_v28 = vld [vmem:[%s11596_s3 + $0xa0] sm:$0xff]   ;;  %v9205_v29 = vld [vmem:[%s11596_s3 + $0x128] sm:$0xff]  }
 0x3cb   :  { %8493 = vmatprep.subr.bf16.mxu0 %v9162_v31  ;;  %8513 = vmatprep.subr.bf16.mxu1 %v9163_v32  ;;  %v9207_v31 = vld [vmem:[%s11596_s3 + $0x160] sm:$0xff]   ;;  %v9208_v32 = vld [vmem:[%s11596_s3 + $0x98] sm:$0xff]  }
 0x3cc   :  { %5779 = vmatprep.mubr.bf16.mxu0 %v5109_v34  ;;  %v9210_v34 = vld [vmem:[%s11596_s3 + $0xd0] sm:$0xff]  }
 0x3cd   :  { %5740 = vmatmul.mubr.bf16.vlgmr.msra.gmra.mxu1 %v5106_v39  ;;  %v9214_v39 = vld [vmem:[%s11596_s3 + $0xc8] sm:$0xff]  }
 0x3ce   :  { %8494 = vmatpush3.bf16.msra.mxu0 %v9164_v38  ;;  %8514 = vmatpush3.bf16.msra.mxu1 %v9165_v36  ;;  %v9211_v38 = vld [vmem:[%s11596_s3 + $0x158] sm:$0xff]   ;;  %v9212_v36 = vld [vmem:[%s11596_s3 + $0x90] sm:$0xff]  }
 0x3cf   :  { %6382 = vmatprep.mubr.bf16.mxu1 %v5826_v2  ;;  %8495 = vmatprep.subr.bf16.mxu0 %v9166_v40  ;;  %v9215_v40 = vld [vmem:[%s11596_s3 + $0x150] sm:$0xff]  }
 0x3d0   :  { %8515 = vmatprep.subr.bf16.mxu1 %v9167_v41  ;;  %v9216_v41 = vld [vmem:[%s11596_s3 + $0x88] sm:$0xff]   ;;  %v9217_v2 = vld [vmem:[%s11596_s3 + $0x110] sm:$0xff]  }
 0x3d2   :  { %8496 = vmatpush3.bf16.msra.mxu0 %v9168_v3  ;;  %8516 = vmatpush3.bf16.msra.mxu1 %v9169_v43  ;;  %v9218_v3 = vld [vmem:[%s11596_s3 + $0xc0] sm:$0xff]   ;;  %v9219_v43 = vld [vmem:[%s11596_s3 + $0x148] sm:$0xff]  }
 0x3d3   :  { %8497 = vmatprep.subr.bf16.mxu0 %v9170_v44  ;;  %8517 = vmatprep.subr.bf16.mxu1 %v9171_v45  ;;  %v9220_v44 = vld [vmem:[%s11596_s3 + $0x80] sm:$0xff]   ;;  %v9221_v45 = vld [vmem:[%s11596_s3 + $0x108] sm:$0xff]  }
 0x3d6   :  { %8498 = vmatpush3.bf16.msra.mxu0 %v9172_v42  ;;  %8518 = vmatpush3.bf16.msra.mxu1 %v9173_v48  ;;  %v9222_v42 = vld [vmem:[%s11596_s3 + $0x140] sm:$0xff]   ;;  %v9223_v48 = vld [vmem:[%s11596_s3 + $0x1f8] sm:$0xff]  }
 0x3d7   :  { %8499 = vmatprep.subr.bf16.mxu0 %v9174_v49  ;;  %8519 = vmatprep.subr.bf16.mxu1 %v9175_v50  ;;  %v5819_v49 = vld [vmem:[#allocation4 + $0xd0] sm:$0xff]  ;;  %v5824_v50 = vld [vmem:[#allocation4 + $0xf8] sm:$0xff] }
 0x3da   :  { %8500 = vmatpush3.bf16.msra.mxu0 %v9176_v51  ;;  %8520 = vmatpush3.bf16.msra.mxu1 %v9177_v52  ;;  %v9224_v51 = vld [vmem:[%s11596_s3 + $0x100] sm:$0xff]   ;;  %v9225_v52 = vld [vmem:[%s11596_s3 + $0x1b8] sm:$0xff]  }
 0x3db   :  { %8501 = vmatprep.subr.bf16.mxu0 %v9178_v15  ;;  %8521 = vmatprep.subr.bf16.mxu1 %v9179_v12  ;;  %v5821_v15 = vld [vmem:[#allocation4 + $0xe0] sm:$0xff]  ;;  %v5827_v12 = vpack.c.bf16 %v5819_v49, %v5819_v49  ;;  %v9250_v49 = vld [vmem:[%s11597_s4 + $0xe8] sm:$0xff]  }
 0x3de   :  { %8502 = vmatpush3.bf16.msra.mxu0 %v9180_v54  ;;  %8522 = vmatpush3.bf16.msra.mxu1 %v9181_v46  ;;  %v9226_v54 = vld [vmem:[%s11596_s3 + $0x1f0] sm:$0xff]   ;;  %v5832_v46 = vpack.c.bf16 %v5824_v50, %v5824_v50  ;;  %v9251_v50 = vld [vmem:[%s11597_s4 + $0xa8] sm:$0xff]  }
 0x3df   :  { %8503 = vmatprep.subr.bf16.mxu0 %v9182_v47  ;;  %8523 = vmatprep.subr.bf16.mxu1 %v9183_v16  ;;  %v5829_v47 = vpack.c.bf16 %v5821_v15, %v5821_v15  ;;  %v9227_v16 = vld [vmem:[%s11596_s3 + $0x1b0] sm:$0xff]   ;;  %v11401_v15 = vld [vmem:[%s11595_s5 + $0x2] ss:$0 sm:$0xff] }
 0x3e2   :  { %8504 = vmatpush3.bf16.msra.mxu0 %v9184_v55  ;;  %8524 = vmatpush3.bf16.msra.mxu1 %v9185_v56  ;;  %v9228_v55 = vld [vmem:[%s11596_s3 + $0x1e8] sm:$0xff]  }
 0x3e3   :  { %8505 = vmatprep.subr.bf16.mxu0 %v9186_v57  ;;  %8525 = vmatprep.subr.bf16.mxu1 %v9187_v58  ;;  %v9229_v56 = vld [vmem:[%s11596_s3 + $0x1a8] sm:$0xff]   ;;  %v9230_v57 = vld [vmem:[%s11596_s3 + $0x1e0] sm:$0xff]  }
 0x3e4   :  { %v9231_v58 = vld [vmem:[%s11596_s3 + $0x1a0] sm:$0xff]  }
 0x3e6   :  { %8506 = vmatpush3.bf16.msra.mxu0 %v9188_v59  ;;  %8526 = vmatpush3.bf16.msra.mxu1 %v9189_v60  ;;  %v9232_v59 = vld [vmem:[%s11596_s3 + $0x1d8] sm:$0xff]  }
 0x3e7   :  { %8527 = vmatprep.subr.bf16.mxu1 %v9190_v62  ;;  %8535 = vmatprep.subr.bf16.mxu0 %v9191_v63  ;;  %v9233_v60 = vld [vmem:[%s11596_s3 + $0x198] sm:$0xff]   ;;  %v9235_v62 = vld [vmem:[%s11596_s3 + $0x190] sm:$0xff]   ;;  %v9236_v63 = vld [vmem:[%s11596_s3 + $0x1c8] sm:$0xff]  }
 0x3e9   :  { %5780 = vmatmul.mubr.bf16.vlgmr.msra.gmra.mxu0 %v5108_v0  ;;  %v8309_v8 = vpop.f32.mrf.mxu1  ;;  %v9237_v0 = vld [vmem:[%s11596_s3 + $0x188] sm:$0xff]  }
 0x3ea   :  { %8528 = vmatpush3.bf16.msra.mxu1 %v9192_v35  ;;  %8536 = vmatpush3.bf16.msra.mxu0 %v9193_v1  ;;  %v9238_v35 = vld [vmem:[%s11596_s3 + $0x1c0] sm:$0xff]  }
 0x3eb   :  { %6422 = vmatprep.mubr.bf16.mxu0 %v5828_v9  ;;  %v8310_v14 = vpop.f32.mrf.mxu1  ;;  %8537 = vmatprep.subr.bf16.mxu0 %v9194_v5  ;;  %v9239_v1 = vld [vmem:[%s11596_s3 + $0x180] sm:$0xff]   ;;  %v5831_v5 = vpack.c.bf16 %v5823_v4, %v5823_v4 }
 0x3ec   :  { %v8311_v20 = vadd.f32 %v8310_v14, %v8309_v8  ;;  %8557 = vmatprep.subr.bf16.mxu1 %v9195_v7  ;;  %v4344_v7 = vunpack.c.l.s4 %v9309_v6  ;;  %v4346_v8 = vlaneseq }
 0x3ed   :  { %6383 = vmatmul.mubr.bf16.vlgmr.msra.gmra.mxu1 %v5825_v17  ;;  %v8312_v22 = vpop.f32.mrf.mxu1 }
 0x3ee   :  { %v11225_v23 = vadd.f32 %v8311_v20, %v11020_v53  ;;  %8538 = vmatpush3.bf16.msra.mxu0 %v9196_v11  ;;  %8558 = vmatpush3.bf16.msra.mxu1 %v9197_v13  ;;  %v9203_v53 = vld [vmem:[%s11596_s3 + $0x168] sm:$0xff]   ;;  %v4345_v10 = vunpack.c.0.s8 %v4344_v7  ;;  %v4347_v11 = vshrl.u32 %v4346_v8, 7  ;;  %v9256_v7 = vld [vmem:[%s11597_s4 + $0x58] sm:$0xff]  }
 0x3ef   :  { %v8313_v26 = vpop.f32.mrf.mxu1  ;;  %8539 = vmatprep.subr.bf16.mxu0 %v9198_v18  ;;  %8559 = vmatprep.subr.bf16.mxu1 %v9199_v19  ;;  %v9257_v8 = vld [vmem:[%s11597_s4 + $0x18] sm:$0xff]  }
 0x3f0   :  { %6462 = vmatprep.mubr.bf16.mxu1 %v5830_v21  ;;  %v11348_v20 = vsub.s32 %v4345_v10, %v4347_v11  ;;  %v9259_v11 = vld [vmem:[%s11597_s4 + $0x98] sm:$0xff]  }
 0x3f2   :  { %8540 = vmatpush3.bf16.msra.mxu0 %v9200_v24  ;;  %8560 = vmatpush3.bf16.msra.mxu1 %v9201_v25 }
 0x3f3   :  { %8541 = vmatprep.subr.bf16.mxu0 %v9202_v27  ;;  %8561 = vmatprep.subr.bf16.mxu1 %v9203_v53 }
 0x3f6   :  { %8542 = vmatpush3.bf16.msra.mxu0 %v9204_v28  ;;  %8562 = vmatpush3.bf16.msra.mxu1 %v9205_v29 }
 0x3f7   :  { %8543 = vmatprep.subr.bf16.mxu0 %v9206_v30  ;;  %8563 = vmatprep.subr.bf16.mxu1 %v9207_v31 }
 0x3fa   :  { %8544 = vmatpush3.bf16.msra.mxu0 %v9208_v32  ;;  %8564 = vmatpush3.bf16.msra.mxu1 %v9209_v33 }
 0x3fb   :  { %8545 = vmatprep.subr.bf16.mxu0 %v9210_v34  ;;  %8565 = vmatprep.subr.bf16.mxu1 %v9211_v38 }
 0x3fe   :  { %8546 = vmatpush3.bf16.msra.mxu0 %v9212_v36  ;;  %8566 = vmatpush3.bf16.msra.mxu1 %v9213_v37 }
 0x3ff   :  { %8547 = vmatprep.subr.bf16.mxu0 %v9214_v39  ;;  %8567 = vmatprep.subr.bf16.mxu1 %v9215_v40  ;;  %v9240_v39 = vld [vmem:[%s11597_s4 + $0x78] sm:$0xff]  }
 0x400   :  { %v9241_v40 = vld [vmem:[%s11597_s4 + $0x38] sm:$0xff]  }
 0x402   :  { %8548 = vmatpush3.bf16.msra.mxu0 %v9216_v41  ;;  %8568 = vmatpush3.bf16.msra.mxu1 %v9217_v2  ;;  %v9242_v41 = vld [vmem:[%s11597_s4 + $0xf8] sm:$0xff]  }
 0x403   :  { %8549 = vmatprep.subr.bf16.mxu0 %v9218_v3  ;;  %8569 = vmatprep.subr.bf16.mxu1 %v9219_v43  ;;  %v9243_v2 = vld [vmem:[%s11597_s4 + $0xb8] sm:$0xff]   ;;  %v9244_v3 = vld [vmem:[%s11597_s4 + $0x70] sm:$0xff]  }
 0x404   :  { %v9245_v43 = vld [vmem:[%s11597_s4 + $0x30] sm:$0xff]  }
 0x406   :  { %8550 = vmatpush3.bf16.msra.mxu0 %v9220_v44  ;;  %8570 = vmatpush3.bf16.msra.mxu1 %v9221_v45  ;;  %v9246_v44 = vld [vmem:[%s11597_s4 + $0xf0] sm:$0xff]  }
 0x407   :  { %8571 = vmatprep.subr.bf16.mxu1 %v9222_v42  ;;  %8579 = vmatprep.subr.bf16.mxu0 %v9223_v48  ;;  %v9247_v45 = vld [vmem:[%s11597_s4 + $0xb0] sm:$0xff]   ;;  %v9248_v42 = vld [vmem:[%s11597_s4 + $0x68] sm:$0xff]  }
 0x408   :  { %v9249_v48 = vld [vmem:[%s11597_s4 + $0x28] sm:$0xff]  }
 0x409   :  { %6423 = vmatmul.mubr.bf16.vlgmr.msra.gmra.mxu0 %v5827_v12 }
 0x40a   :  { %8572 = vmatpush3.bf16.msra.mxu1 %v9224_v51  ;;  %8580 = vmatpush3.bf16.msra.mxu0 %v9225_v52  ;;  %v9252_v51 = vld [vmem:[%s11597_s4 + $0x60] sm:$0xff]  }
 0x40b   :  { %8581 = vmatprep.subr.bf16.mxu0 %v9226_v54  ;;  %6502 = vmatprep.mubr.bf16.mxu0 %v5832_v46  ;;  %v9253_v52 = vld [vmem:[%s11597_s4 + $0x20] sm:$0xff]  }
 0x40c   :  { %8601 = vmatprep.subr.bf16.mxu1 %v9240_v39 }
 0x40d   :  { %6463 = vmatmul.mubr.bf16.vlgmr.msra.gmra.mxu1 %v5829_v47 }
 0x40e   :  { %8582 = vmatpush3.bf16.msra.mxu0 %v9227_v16  ;;  %8602 = vmatpush3.bf16.msra.mxu1 %v9241_v40 }
 0x40f   :  { %8583 = vmatprep.subr.bf16.mxu0 %v9228_v55  ;;  %8603 = vmatprep.subr.bf16.mxu1 %v9244_v3  ;;  %v9254_v55 = vld [vmem:[%s11597_s4 + $0xe0] sm:$0xff]  }
 0x412   :  { %8584 = vmatpush3.bf16.msra.mxu0 %v9229_v56  ;;  %8604 = vmatpush3.bf16.msra.mxu1 %v9245_v43  ;;  %v9255_v56 = vld [vmem:[%s11597_s4 + $0xa0] sm:$0xff]  }
 0x413   :  { %8585 = vmatprep.subr.bf16.mxu0 %v9230_v57  ;;  %8605 = vmatprep.subr.bf16.mxu1 %v9248_v42 }
 0x416   :  { %8586 = vmatpush3.bf16.msra.mxu0 %v9231_v58  ;;  %8606 = vmatpush3.bf16.msra.mxu1 %v9249_v48  ;;  %v9273_v48 = vld [vmem:[%s11597_s4 + $0x178] sm:$0xff]  }
 0x417   :  { %8587 = vmatprep.subr.bf16.mxu0 %v9232_v59  ;;  %8607 = vmatprep.subr.bf16.mxu1 %v9252_v51 }
 0x41a   :  { %8588 = vmatpush3.bf16.msra.mxu0 %v9233_v60  ;;  %8608 = vmatpush3.bf16.msra.mxu1 %v9253_v52 }
 0x41b   :  { %8589 = vmatprep.subr.bf16.mxu0 %v9234_v61  ;;  %8609 = vmatprep.subr.bf16.mxu1 %v9256_v7 }
 0x41e   :  { %8590 = vmatpush3.bf16.msra.mxu0 %v9235_v62  ;;  %8610 = vmatpush3.bf16.msra.mxu1 %v9257_v8 }
 0x41f   :  { %8591 = vmatprep.subr.bf16.mxu0 %v9236_v63 }
 0x422   :  { %8592 = vmatpush3.bf16.msra.mxu0 %v9237_v0 }
 0x423   :  { %8593 = vmatprep.subr.bf16.mxu0 %v9238_v35 }
 0x426   :  { %8594 = vmatpush3.bf16.msra.mxu0 %v9239_v1 }
 0x427   :  { %8623 = vmatprep.subr.bf16.mxu0 %v9242_v41 }
 0x429   :  { %6503 = vmatmul.mubr.bf16.vlgmr.msra.gmra.mxu0 %v5831_v5  ;;  %v8331_v9 = vpop.f32.mrf.mxu0 }
 0x42a   :  { %8624 = vmatpush3.bf16.msra.mxu0 %v9243_v2 }
 0x42b   :  { %v8332_v13 = vpop.f32.mrf.mxu0  ;;  %8625 = vmatprep.subr.bf16.mxu0 %v9246_v44 }
 0x42c   :  { %v8333_v14 = vadd.f32 %v8332_v13, %v8331_v9  ;;  %v9258_v9 = vld [vmem:[%s11597_s4 + $0xd8] sm:$0xff]   ;;  %v9260_v13 = vld [vmem:[%s11597_s4 + $0x50] sm:$0xff]  }
 0x42d   :  { %v8334_v17 = vpop.f32.mrf.mxu0  ;;  %v8353_v18 = vpop.f32.mrf.mxu1  ;;  %8611 = vmatprep.subr.bf16.mxu1 %v9260_v13 }
 0x42e   :  { %v4335_v19 = vadd.f32 %v8333_v14, %v11225_v23  ;;  %8626 = vmatpush3.bf16.msra.mxu0 %v9247_v45 }
 0x42f   :  { %v8335_v21 = vpop.f32.mrf.mxu0  ;;  %v8354_v22 = vpop.f32.mrf.mxu1  ;;  %8627 = vmatprep.subr.bf16.mxu0 %v9250_v49  ;;  %v9275_v49 = vld [vmem:[%s11597_s4 + $0x1f8] sm:$0xff]  }
 0x430   :  { %v4340_v24 = vmax.f32 %v4335_v19, 0.0  ;;  %v8355_v12 = vadd.f32 %v8354_v22, %v8353_v18  ;;  %v9262_v18 = vld [vmem:[%s11597_s4 + $0xd0] sm:$0xff]  }
 0x431   :  { %v8356_v25 = vpop.f32.mrf.mxu1  ;;  %v9261_v19 = vld [vmem:[%s11597_s4 + $0x10] sm:$0xff]  }
 0x432   :  { %v4356_v26 = vcombine.high %v4340_v24, %v4340_v24  ;;  %4341 = vst.msk [vmem:[#allocation5] sm:$0x3] %vm259_vm1, %v4340_v24  ;;  %v4349_v27 = vrot.slane %v4340_v24, %v11348_v20  ;;  %8628 = vmatpush3.bf16.msra.mxu0 %v9251_v50  ;;  %v4939_v46 = vadd.f32 %v8355_v12, %v11401_v15  ;;  %v9263_v21 = vld [vmem:[%s11597_s4 + $0x90] sm:$0xff]   ;;  %v9264_v24 = vld [vmem:[%s11597_s4 + $0x48] sm:$0xff]  }
 0x433   :  { %v8357_v53 = vpop.f32.mrf.mxu1  ;;  %8629 = vmatprep.subr.bf16.mxu0 %v9254_v55  ;;  %v9266_v25 = vld [vmem:[%s11597_s4 + $0xc8] sm:$0xff]   ;;  %8612 = vmatpush3.bf16.msra.mxu1 %v9261_v19 }
 0x434   :  { %v4350_v28 = vcombine.high %v4349_v27, %v4349_v27  ;;  %v4363_v29 = vrot.slane %v4356_v26, %v11348_v20  ;;  %v9265_v26 = vld [vmem:[%s11597_s4 + $0x8] sm:$0xff]   ;;  %v9268_v53 = vld [vmem:[%s11597_s4 + $0x40] sm:$0xff]   ;;  %8613 = vmatprep.subr.bf16.mxu1 %v9264_v24 }
 0x435   :  { %v9267_v27 = vld [vmem:[%s11597_s4 + $0x88] sm:$0xff]  }
 0x436   :  { %4351 = vrot.lane.b32.xlu0 %v4350_v28, %s9308_s0  ;;  %v4366_v30 = vcombine.high %v4363_v29, %v4363_v29  ;;  %4365 = vst.msk [vmem:[#allocation5 + $0x2] sm:$0x3] %vm259_vm1, %v4363_v29  ;;  %8630 = vmatpush3.bf16.msra.mxu0 %v9255_v56  ;;  %v9270_v28 = vld [vmem:[%s11597_s4 + $0xc0] sm:$0xff]  }
 0x437   :  { %8631 = vmatprep.subr.bf16.mxu0 %v9258_v9  ;;  %v9269_v29 = vld [vmem:[%s11597_s4] sm:$0xff]   ;;  %8614 = vmatpush3.bf16.msra.mxu1 %v9265_v26 }
 0x438   :  { %4367 = vrot.lane.b32.xlu1 %v4366_v30, %s9308_s0  ;;  %v9271_v30 = vld [vmem:[%s11597_s4 + $0x80] sm:$0xff]   ;;  %8615 = vmatprep.subr.bf16.mxu1 %v9268_v53 }
 0x43a   :  { %8632 = vmatpush3.bf16.msra.mxu0 %v9259_v11 }
 0x43b   :  { %8633 = vmatprep.subr.bf16.mxu0 %v9262_v18  ;;  %8616 = vmatpush3.bf16.msra.mxu1 %v9269_v29 }
 0x43c   :  { %8645 = vmatprep.subr.bf16.mxu1 %v9273_v48  ;;  %v9282_v48 = vld [vmem:[%s11597_s4 + $0x128] sm:$0xff]  }
 0x43e   :  { %8634 = vmatpush3.bf16.msra.mxu0 %v9263_v21 }
 0x43f   :  { %8635 = vmatprep.subr.bf16.mxu0 %v9266_v25 }
 0x442   :  { %8636 = vmatpush3.bf16.msra.mxu0 %v9267_v27 }
 0x443   :  { %8637 = vmatprep.subr.bf16.mxu0 %v9270_v28 }
 0x446   :  { %8638 = vmatpush3.bf16.msra.mxu0 %v9271_v30 }
 0x447   :  { %8667 = vmatprep.subr.bf16.mxu0 %v9275_v49  ;;  %v9285_v49 = vld [vmem:[%s11597_s4 + $0x160] sm:$0xff]  }
 0x449   :  { %v8375_v23 = vpop.f32.mrf.mxu0 }
 0x44b   :  { %v8376_v31 = vpop.f32.mrf.mxu0 }
 0x44c   :  { %v8377_v54 = vadd.f32 %v8376_v31, %v8375_v23 }
 0x44d   :  { %v8378_v32 = vpop.f32.mrf.mxu0  ;;  %v8397_v33 = vpop.f32.mrf.mxu1 }
 0x44e   :  { %v4979_v57 = vadd.f32 %v8377_v54, %v4939_v46 }
 0x44f   :  { %v8379_v34 = vpop.f32.mrf.mxu0  ;;  %v8398_v38 = vpop.f32.mrf.mxu1 }
 0x450   :  { %v8399_v47 = vadd.f32 %v8398_v38, %v8397_v33 }
 0x451   :  { %v8400_v36 = vpop.f32.mrf.mxu1 }
 0x452   :  { %v5019_v59 = vadd.f32 %v8399_v47, %v4979_v57 }
 0x453   :  { %v8401_v37 = vpop.f32.mrf.mxu1 }
 0x469   :  { %v8419_v16 = vpop.f32.mrf.mxu0 }
 0x46b   :  { %v8420_v58 = vpop.f32.mrf.mxu0 }
 0x46c   :  { %v8421_v60 = vadd.f32 %v8420_v58, %v8419_v16 }
 0x46d   :  { %v8422_v61 = vpop.f32.mrf.mxu0  ;;  %v8441_v62 = vpop.f32.mrf.mxu1 }
 0x46e   :  { %v5059_v63 = vadd.f32 %v8421_v60, %v5019_v59 }
 0x46f   :  { %v8423_v0 = vpop.f32.mrf.mxu0  ;;  %v8442_v35 = vpop.f32.mrf.mxu1 }
 0x470   :  { %v5064_v1 = vmax.f32 %v5059_v63, 0.0  ;;  %v8443_v39 = vadd.f32 %v8442_v35, %v8441_v62 }
 0x471   :  { %v8444_v4 = vpop.f32.mrf.mxu1 }
 0x472   :  { %v5079_v5 = vcombine.high %v5064_v1, %v5064_v1  ;;  %5065 = vst.msk [vmem:[#allocation5 + $0x4] sm:$0x3] %vm259_vm1, %v5064_v1  ;;  %v5073_v6 = vrot.slane %v5064_v1, %v11348_v20  ;;  %v5662_v41 = vadd.f32 %v8443_v39, %v11401_v15  ;;  %v9277_v39 = vld [vmem:[%s11597_s4 + $0x170] sm:$0xff]  }
 0x473   :  { %v8445_v10 = vpop.f32.mrf.mxu1 }
 0x474   :  { %v5074_v14 = vcombine.high %v5073_v6, %v5073_v6  ;;  %v5086_v17 = vrot.slane %v5079_v5, %v11348_v20 }
 0x476   :  { %5075 = vrot.lane.b32.xlu0 %v5074_v14, %s9308_s0  ;;  %v5089_v22 = vcombine.high %v5086_v17, %v5086_v17  ;;  %5088 = vst.msk [vmem:[#allocation5 + $0x6] sm:$0x3] %vm259_vm1, %v5086_v17 }
 0x478   :  { %5090 = vrot.lane.b32.xlu1 %v5089_v22, %s9308_s0 }
 0x489   :  { %v8463_v23 = vpop.f32.mrf.mxu0 }
 0x48b   :  { %v8464_v31 = vpop.f32.mrf.mxu0 }
 0x48c   :  { %v8465_v40 = vadd.f32 %v8464_v31, %v8463_v23 }
 0x48d   :  { %v8466_v32 = vpop.f32.mrf.mxu0  ;;  %v8485_v33 = vpop.f32.mrf.mxu1 }
 0x48e   :  { %v5702_v44 = vadd.f32 %v8465_v40, %v5662_v41  ;;  %v9276_v41 = vld [vmem:[%s11597_s4 + $0x1b8] sm:$0xff]  }
 0x48f   :  { %v8467_v34 = vpop.f32.mrf.mxu0  ;;  %v8486_v38 = vpop.f32.mrf.mxu1 }
 0x490   :  { %v8487_v2 = vadd.f32 %v8486_v38, %v8485_v33 }
 0x491   :  { %v8488_v36 = vpop.f32.mrf.mxu1 }
 0x492   :  { %v5742_v50 = vadd.f32 %v8487_v2, %v5702_v44  ;;  %v9274_v36 = vld [vmem:[%s11597_s4 + $0x138] sm:$0xff]   ;;  %v9281_v44 = vld [vmem:[%s11597_s4 + $0x168] sm:$0xff]  }
 0x493   :  { %v8489_v37 = vpop.f32.mrf.mxu1 }
 0x4a8   :  { %v4352_v3 = vpop.permute.xlu0 %4351 }
 0x4a9   :  { %4355 = vst.msk [vmem:[#allocation5] sm:$0x3] %vm4354_vm4, %v4352_v3  ;;  %v8507_v43 = vpop.f32.mrf.mxu0  ;;  %v9279_v3 = vld [vmem:[%s11597_s4 + $0x1f0] sm:$0xff]  }
 0x4aa   :  { %v4368_v45 = vpop.permute.xlu1 %4367 }
 0x4ab   :  { %v8508_v42 = vpop.f32.mrf.mxu0  ;;  %4370 = vst.msk [vmem:[#allocation5 + $0x2] sm:$0x3] %vm4354_vm4, %v4368_v45  ;;  %v9280_v45 = vld [vmem:[%s11597_s4 + $0x1b0] sm:$0xff]  }
 0x4ac   :  { %v8509_v51 = vadd.f32 %v8508_v42, %v8507_v43  ;;  %v9278_v43 = vld [vmem:[%s11597_s4 + $0x130] sm:$0xff]   ;;  %v9283_v42 = vld [vmem:[%s11597_s4 + $0x1e8] sm:$0xff]  }
 0x4ad   :  { %v8510_v52 = vpop.f32.mrf.mxu0  ;;  %v8529_v12 = vpop.f32.mrf.mxu1 }
 0x4ae   :  { %v5782_v54 = vadd.f32 %v8509_v51, %v5742_v50  ;;  %v9284_v50 = vld [vmem:[%s11597_s4 + $0x1a8] sm:$0xff]   ;;  %v9287_v51 = vld [vmem:[%s11597_s4 + $0x1e0] sm:$0xff]  }
 0x4af   :  { %v8511_v46 = vpop.f32.mrf.mxu0  ;;  %v8530_v47 = vpop.f32.mrf.mxu1  ;;  %v9286_v52 = vld [vmem:[%s11597_s4 + $0x120] sm:$0xff]  }
 0x4b0   :  { %v5787_v16 = vmax.f32 %v5782_v54, 0.0  ;;  %v8531_v7 = vadd.f32 %v8530_v47, %v8529_v12  ;;  %v9289_v12 = vld [vmem:[%s11597_s4 + $0x158] sm:$0xff]   ;;  %v9288_v54 = vld [vmem:[%s11597_s4 + $0x1a0] sm:$0xff]  }
 0x4b1   :  { %v8532_v55 = vpop.f32.mrf.mxu1  ;;  %v9291_v46 = vld [vmem:[%s11597_s4 + $0x1d8] sm:$0xff]  }
 0x4b2   :  { %v5802_v56 = vcombine.high %v5787_v16, %v5787_v16  ;;  %5788 = vst.msk [vmem:[#allocation5 + $0x8] sm:$0x3] %vm259_vm1, %v5787_v16  ;;  %v5796_v57 = vrot.slane %v5787_v16, %v11348_v20  ;;  %v6385_v9 = vadd.f32 %v8531_v7, %v11401_v15  ;;  %v9290_v47 = vld [vmem:[%s11597_s4 + $0x118] sm:$0xff]   ;;  %v9293_v16 = vld [vmem:[%s11597_s4 + $0x150] sm:$0xff]  }
 0x4b3   :  { %v8533_v58 = vpop.f32.mrf.mxu1  ;;  %v9292_v55 = vld [vmem:[%s11597_s4 + $0x198] sm:$0xff]  }
 0x4b4   :  { %v5797_v59 = vcombine.high %v5796_v57, %v5796_v57  ;;  %v5809_v60 = vrot.slane %v5802_v56, %v11348_v20  ;;  %v9295_v56 = vld [vmem:[%s11597_s4 + $0x1d0] sm:$0xff]   ;;  %v9297_v58 = vld [vmem:[%s11597_s4 + $0x148] sm:$0xff]  }
 0x4b5   :  { %v9294_v57 = vld [vmem:[%s11597_s4 + $0x110] sm:$0xff]  }
 0x4b6   :  { %5798 = vrot.lane.b32.xlu0 %v5797_v59, %s9308_s0  ;;  %v5812_v61 = vcombine.high %v5809_v60, %v5809_v60  ;;  %5811 = vst.msk [vmem:[#allocation5 + $0xa] sm:$0x3] %vm259_vm1, %v5809_v60  ;;  %v9296_v59 = vld [vmem:[%s11597_s4 + $0x190] sm:$0xff]   ;;  %v9299_v60 = vld [vmem:[%s11597_s4 + $0x1c8] sm:$0xff]  }
 0x4b8   :  { %5813 = vrot.lane.b32.xlu1 %v5812_v61, %s9308_s0  ;;  %v9298_v61 = vld [vmem:[%s11597_s4 + $0x108] sm:$0xff]  }
 0x4c9   :  { %v8551_v62 = vpop.f32.mrf.mxu0 }
 0x4cb   :  { %v8552_v63 = vpop.f32.mrf.mxu0 }
 0x4cc   :  { %v8553_v8 = vadd.f32 %v8552_v63, %v8551_v62  ;;  %v9301_v62 = vld [vmem:[%s11597_s4 + $0x140] sm:$0xff]   ;;  %v9300_v63 = vld [vmem:[%s11597_s4 + $0x188] sm:$0xff]  }
 0x4cd   :  { %v8554_v0 = vpop.f32.mrf.mxu0  ;;  %v8573_v35 = vpop.f32.mrf.mxu1 }
 0x4ce   :  { %v6425_v14 = vadd.f32 %v8553_v8, %v6385_v9  ;;  %v9303_v0 = vld [vmem:[%s11597_s4 + $0x1c0] sm:$0xff]  }
 0x4cf   :  { %v8555_v1 = vpop.f32.mrf.mxu0  ;;  %v8574_v4 = vpop.f32.mrf.mxu1 }
 0x4d0   :  { %v8575_v10 = vadd.f32 %v8574_v4, %v8573_v35  ;;  %v9302_v35 = vld [vmem:[%s11597_s4 + $0x100] sm:$0xff]  }
 0x4d1   :  { %v8576_v5 = vpop.f32.mrf.mxu1  ;;  %v9304_v1 = vld [vmem:[%s11597_s4 + $0x180] sm:$0xff]  }
 0x4d2   :  { %v6465_v19 = vadd.f32 %v8575_v10, %v6425_v14 }
 0x4d3   :  { %v8577_v6 = vpop.f32.mrf.mxu1 }
 0x4e8   :  { %v5076_v11 = vpop.permute.xlu0 %5075 }
 0x4e9   :  { %5078 = vst.msk [vmem:[#allocation5 + $0x4] sm:$0x3] %vm4354_vm4, %v5076_v11  ;;  %v8595_v13 = vpop.f32.mrf.mxu0 }
 0x4ea   :  { %v5091_v17 = vpop.permute.xlu1 %5090 }
 0x4eb   :  { %v8596_v18 = vpop.f32.mrf.mxu0  ;;  %5093 = vst.msk [vmem:[#allocation5 + $0x6] sm:$0x3] %vm4354_vm4, %v5091_v17 }
 0x4ec   :  { %v8597_v21 = vadd.f32 %v8596_v18, %v8595_v13 }
 0x4ed   :  { %v8598_v22 = vpop.f32.mrf.mxu0 }
 0x4ee   :  { %v6505_v24 = vadd.f32 %v8597_v21, %v6465_v19 }
 0x4ef   :  { %v8599_v25 = vpop.f32.mrf.mxu0 }
 0x4f0   :  { %v6510_v26 = vmax.f32 %v6505_v24, 0.0  ;;  %v7820_v24 = vld [vmem:[%s11598_s6] ss:$0 sm:$0xff] }
 0x4f2   :  { %v6525_v27 = vcombine.high %v6510_v26, %v6510_v26  ;;  %6511 = vst.msk [vmem:[#allocation5 + $0xc] sm:$0x3] %vm259_vm1, %v6510_v26  ;;  %v6519_v15 = vrot.slane %v6510_v26, %v11348_v20  ;;  %v6540_v53 = vld [vmem:[#allocation5] sm:$0xff] }
 0x4f3   :  { %v6551_v28 = vrot.slane %v6540_v53, %v11348_v20  ;;  %v6544_v29 = vcombine.high %v6540_v53, %v6540_v53 }
 0x4f4   :  { %v6520_v30 = vcombine.high %v6519_v15, %v6519_v15  ;;  %v6532_v23 = vrot.slane %v6525_v27, %v11348_v20 }
 0x4f5   :  { %v6559_v31 = vcombine.high %v6551_v28, %v6551_v28  ;;  %v6558_v32 = vrot.slane %v6544_v29, %v11348_v20  ;;  %v6586_v37 = vpack.c.bf16 %v6551_v28, %v6551_v28 }
 0x4f6   :  { %6521 = vrot.lane.b32.xlu0 %v6520_v30, %s9308_s0  ;;  %v6535_v33 = vcombine.high %v6532_v23, %v6532_v23  ;;  %6534 = vst.msk [vmem:[#allocation5 + $0xe] sm:$0x3] %vm259_vm1, %v6532_v23 }
 0x4f7   :  { %v6587_v34 = vpack.c.bf16 %v6559_v31, %v6559_v31  ;;  %v6560_v38 = vcombine.high %v6558_v32, %v6558_v32  ;;  %v6588_v2 = vpack.c.bf16 %v6558_v32, %v6558_v32 }
 0x4f8   :  { %6536 = vrot.lane.b32.xlu1 %v6535_v33, %s9308_s0 }
 0x4f9   :  { %7145 = vmatprep.mubr.bf16.mxu1 %v6587_v34  ;;  %v6589_v40 = vpack.c.bf16 %v6560_v38, %v6560_v38 }
 0x4fa   :  { %7146 = vmatmul.mubr.bf16.vlgmr.msra.gmra.mxu1 %v6586_v37 }
 0x4fb   :  { %7185 = vmatprep.mubr.bf16.mxu0 %v6589_v40  ;;  %8646 = vmatpush3.bf16.msra.mxu1 %v9274_v36 }
 0x4fc   :  { %7186 = vmatmul.mubr.bf16.vlgmr.msra.gmra.mxu0 %v6588_v2  ;;  %8647 = vmatprep.subr.bf16.mxu1 %v9277_v39 }
 0x4fd   :  { %8668 = vmatpush3.bf16.msra.mxu0 %v9276_v41 }
 0x4fe   :  { %8669 = vmatprep.subr.bf16.mxu0 %v9279_v3 }
 0x4ff   :  { %8648 = vmatpush3.bf16.msra.mxu1 %v9278_v43 }
 0x500   :  { %8649 = vmatprep.subr.bf16.mxu1 %v9281_v44 }
 0x501   :  { %8670 = vmatpush3.bf16.msra.mxu0 %v9280_v45 }
 0x502   :  { %8671 = vmatprep.subr.bf16.mxu0 %v9283_v42 }
 0x503   :  { %8650 = vmatpush3.bf16.msra.mxu1 %v9282_v48 }
 0x504   :  { %8651 = vmatprep.subr.bf16.mxu1 %v9285_v49 }
 0x505   :  { %8672 = vmatpush3.bf16.msra.mxu0 %v9284_v50 }
 0x506   :  { %8673 = vmatprep.subr.bf16.mxu0 %v9287_v51 }
 0x507   :  { %8652 = vmatpush3.bf16.msra.mxu1 %v9286_v52 }
 0x508   :  { %8653 = vmatprep.subr.bf16.mxu1 %v9289_v12 }
 0x509   :  { %8674 = vmatpush3.bf16.msra.mxu0 %v9288_v54 }
 0x50a   :  { %8675 = vmatprep.subr.bf16.mxu0 %v9291_v46 }
 0x50b   :  { %8654 = vmatpush3.bf16.msra.mxu1 %v9290_v47 }
 0x50c   :  { %8655 = vmatprep.subr.bf16.mxu1 %v9293_v16 }
 0x50d   :  { %8676 = vmatpush3.bf16.msra.mxu0 %v9292_v55 }
 0x50e   :  { %8677 = vmatprep.subr.bf16.mxu0 %v9295_v56 }
 0x50f   :  { %8656 = vmatpush3.bf16.msra.mxu1 %v9294_v57 }
 0x510   :  { %8657 = vmatprep.subr.bf16.mxu1 %v9297_v58 }
 0x511   :  { %8678 = vmatpush3.bf16.msra.mxu0 %v9296_v59 }
 0x512   :  { %8679 = vmatprep.subr.bf16.mxu0 %v9299_v60 }
 0x513   :  { %8658 = vmatpush3.bf16.msra.mxu1 %v9298_v61 }
 0x514   :  { %8659 = vmatprep.subr.bf16.mxu1 %v9301_v62 }
 0x515   :  { %8680 = vmatpush3.bf16.msra.mxu0 %v9300_v63 }
 0x516   :  { %8681 = vmatprep.subr.bf16.mxu0 %v9303_v0 }
 0x517   :  { %8660 = vmatpush3.bf16.msra.mxu1 %v9302_v35 }
 0x519   :  { %8682 = vmatpush3.bf16.msra.mxu0 %v9304_v1 }
 0x528   :  { %v5799_v4 = vpop.permute.xlu0 %5798 }
 0x529   :  { %5801 = vst.msk [vmem:[#allocation5 + $0x8] sm:$0x3] %vm4354_vm4, %v5799_v4 }
 0x52a   :  { %v5814_v5 = vpop.permute.xlu1 %5813 }
 0x52b   :  { %5816 = vst.msk [vmem:[#allocation5 + $0xa] sm:$0x3] %vm4354_vm4, %v5814_v5 }
 0x568   :  { %v6522_v6 = vpop.permute.xlu0 %6521 }
 0x569   :  { %6524 = vst.msk [vmem:[#allocation5 + $0xc] sm:$0x3] %vm4354_vm4, %v6522_v6 }
 0x56a   :  { %v6537_v7 = vpop.permute.xlu1 %6536 }
 0x56b   :  { %6539 = vst.msk [vmem:[#allocation5 + $0xe] sm:$0x3] %vm4354_vm4, %v6537_v7 }
 0x572   :  { %v6541_v8 = vld [vmem:[#allocation5 + $0x8] sm:$0xff] }
 0x573   :  { %v6568_v9 = vrot.slane %v6541_v8, %v11348_v20  ;;  %v6561_v10 = vcombine.high %v6541_v8, %v6541_v8 }
 0x575   :  { %v6576_v11 = vcombine.high %v6568_v9, %v6568_v9  ;;  %v6575_v13 = vrot.slane %v6561_v10, %v11348_v20  ;;  %v6590_v18 = vpack.c.bf16 %v6568_v9, %v6568_v9 }
 0x577   :  { %v6591_v14 = vpack.c.bf16 %v6576_v11, %v6576_v11  ;;  %v6577_v17 = vcombine.high %v6575_v13, %v6575_v13  ;;  %v6592_v21 = vpack.c.bf16 %v6575_v13, %v6575_v13 }
 0x579   :  { %7225 = vmatprep.mubr.bf16.mxu1 %v6591_v14  ;;  %v6593_v19 = vpack.c.bf16 %v6577_v17, %v6577_v17 }
 0x57a   :  { %7226 = vmatmul.mubr.bf16.vlgmr.msra.gmra.mxu1 %v6590_v18 }
 0x57b   :  { %7265 = vmatprep.mubr.bf16.mxu0 %v6593_v19 }
 0x57c   :  { %7266 = vmatmul.mubr.bf16.vlgmr.msra.gmra.mxu0 %v6592_v21 }
 0x5ba   :  { %v8617_v22 = vpop.f32.mrf.mxu1 }
 0x5bc   :  { %v8618_v25 = vpop.f32.mrf.mxu1  ;;  %v8639_v26 = vpop.f32.mrf.mxu0 }
 0x5bd   :  { %v8619_v27 = vadd.f32 %v8618_v25, %v8617_v22 }
 0x5be   :  { %v8620_v15 = vpop.f32.mrf.mxu1  ;;  %v8640_v53 = vpop.f32.mrf.mxu0 }
 0x5bf   :  { %v7148_v20 = vadd.f32 %v8619_v27, %v7820_v24  ;;  %v8641_v28 = vadd.f32 %v8640_v53, %v8639_v26 }
 0x5c0   :  { %v8621_v29 = vpop.f32.mrf.mxu1  ;;  %v8642_v30 = vpop.f32.mrf.mxu0 }
 0x5c1   :  { %v7188_v23 = vadd.f32 %v8641_v28, %v7148_v20 }
 0x5c2   :  { %v8643_v31 = vpop.f32.mrf.mxu0 }
 0x63a   :  { %v8661_v32 = vpop.f32.mrf.mxu1 }
 0x63c   :  { %v8662_v33 = vpop.f32.mrf.mxu1  ;;  %v8683_v34 = vpop.f32.mrf.mxu0 }
 0x63d   :  { %v8663_v38 = vadd.f32 %v8662_v33, %v8661_v32 }
 0x63e   :  { %v8664_v36 = vpop.f32.mrf.mxu1  ;;  %v8684_v37 = vpop.f32.mrf.mxu0 }
 0x63f   :  { %v7228_v39 = vadd.f32 %v8663_v38, %v7188_v23  ;;  %v8685_v40 = vadd.f32 %v8684_v37, %v8683_v34 }
 0x640   :  { %v8665_v41 = vpop.f32.mrf.mxu1  ;;  %v8686_v2 = vpop.f32.mrf.mxu0 }
 0x641   :  { %v7268_v3 = vadd.f32 %v8685_v40, %v7228_v39 }
 0x642   :  { %v8687_v43 = vpop.f32.mrf.mxu0 }
 0x643   :  { %7274 = vst.msk [vmem:[%s11599_s7] sm:$0x3] %vm7273_vm5, %v7268_v3 }

</bundles_post_ra>
